<compile_context>
chip_gen: v7x
topology: tpu7x:2x2x1
jax: 0.10.0
libtpu: 0.0.40
codegen_flags: <defaults>
</compile_context>

<pallas_src>
import jax
import jax.numpy as jnp
from jax.experimental import pallas as pl
from jax.experimental.pallas import tpu as pltpu


def _round_up(x, m):
    return (x + m - 1) // m * m


def _pad2d(x, rows, cols):
    r, c = x.shape
    if r == rows and c == cols:
        return x
    return jnp.pad(x, ((0, rows - r), (0, cols - c)))


# ---------------------------------------------------------------------------
# Pallas kernels (fused conv-as-GEMM + epilogue)
# ---------------------------------------------------------------------------

def _conv_lrelu_kernel(p_ref, w_ref, o_ref):
    y = jnp.dot(p_ref[...], w_ref[...], preferred_element_type=jnp.float32)
    o_ref[...] = jnp.maximum(y, 0.2 * y).astype(o_ref.dtype)


def _conv_bn_lrelu_kernel(p_ref, w_ref, g_ref, b_ref, o_ref):
    # GEMM (bf16 in, f32 accumulate)
    y = jnp.dot(p_ref[...], w_ref[...], preferred_element_type=jnp.float32)
    m = y.shape[0]                                   # static: N*OH*OW (no pad rows)
    # BatchNorm, training-mode (biased) batch statistics, eps=1e-5
    mean = jnp.sum(y, axis=0, keepdims=True) * (1.0 / m)
    yc = y - mean
    var = jnp.sum(yc * yc, axis=0, keepdims=True) * (1.0 / m)
    z = yc * jax.lax.rsqrt(var + 1e-5) * g_ref[...] + b_ref[...]
    # LeakyReLU(0.2)
    o_ref[...] = jnp.maximum(z, 0.2 * z).astype(o_ref.dtype)


def _conv_sigmoid_kernel(p_ref, w_ref, o_ref):
    y = jnp.dot(p_ref[...], w_ref[...], preferred_element_type=jnp.float32)
    o_ref[...] = (1.0 / (1.0 + jnp.exp(-y))).astype(o_ref.dtype)


# ---------------------------------------------------------------------------
# Layer wrappers (padding + pallas_call)
# ---------------------------------------------------------------------------

def conv_lrelu(patches, w2d):
    """Layer 1: fused GEMM + LeakyReLU, M-tiled, parallel grid axis."""
    M, K = patches.shape
    C = w2d.shape[1]
    K_pad = _round_up(K, 128)
    C_pad = _round_up(C, 128)
    tm = 512 if M >= 512 else _round_up(M, 16)
    M_pad = _round_up(M, tm)

    p = _pad2d(patches.astype(jnp.bfloat16), M_pad, K_pad)
    w = _pad2d(w2d.astype(jnp.bfloat16), K_pad, C_pad)

    out = pl.pallas_call(
        _conv_lrelu_kernel,
        out_shape=jax.ShapeDtypeStruct((M_pad, C_pad), jnp.bfloat16),
        grid=(M_pad // tm,),
        in_specs=[pl.BlockSpec((tm, K_pad), lambda i: (i, 0)),
                  pl.BlockSpec((K_pad, C_pad), lambda i: (0, 0))],
        out_specs=pl.BlockSpec((tm, C_pad), lambda i: (i, 0)),
        compiler_params=pltpu.CompilerParams(
            dimension_semantics=("parallel",)),
    )(p, w)
    return out[:M, :C]


def conv_bn_lrelu(patches, w2d, gamma, beta):
    """Layers 2-4: fully fused GEMM + BatchNorm(batch stats) + LeakyReLU.

    The whole activation (M rows) is processed in one grid step so the batch
    statistics are exact.  M = N*OH*OW is a multiple of 16 for this
    architecture, so no row padding is needed (padded rows would corrupt the
    BN reduction).  Padded channel columns produce exactly 0 because the
    padded weight columns and gamma/beta are zero.
    """
    M, K = patches.shape
    C = w2d.shape[1]
    assert M % 16 == 0, "BN kernel requires M to be a multiple of 16"
    K_pad = _round_up(K, 128)
    C_pad = _round_up(C, 128)

    p = _pad2d(patches.astype(jnp.bfloat16), M, K_pad)
    w = _pad2d(w2d.astype(jnp.bfloat16), K_pad, C_pad)
    g = _pad2d(gamma.reshape(1, -1).astype(jnp.float32), 1, C_pad)
    b = _pad2d(beta.reshape(1, -1).astype(jnp.float32), 1, C_pad)

    out = pl.pallas_call(
        _conv_bn_lrelu_kernel,
        out_shape=jax.ShapeDtypeStruct((M, C_pad), jnp.bfloat16),
        grid=(1,),
        in_specs=[pl.BlockSpec((M, K_pad), lambda i: (0, 0)),
                  pl.BlockSpec((K_pad, C_pad), lambda i: (0, 0)),
                  pl.BlockSpec((1, C_pad), lambda i: (0, 0)),
                  pl.BlockSpec((1, C_pad), lambda i: (0, 0))],
        out_specs=pl.BlockSpec((M, C_pad), lambda i: (0, 0)),
    )(p, w, g, b)
    return out[:, :C]


def conv_sigmoid(patches, w2d):
    """Final layer: fused GEMM + Sigmoid (M = batch, C = 1)."""
    M, K = patches.shape
    C = w2d.shape[1]
    M_pad = _round_up(M, 16)
    K_pad = _round_up(K, 128)
    C_pad = _round_up(C, 128)

    p = _pad2d(patches.astype(jnp.bfloat16), M_pad, K_pad)
    w = _pad2d(w2d.astype(jnp.bfloat16), K_pad, C_pad)

    out = pl.pallas_call(
        _conv_sigmoid_kernel,
        out_shape=jax.ShapeDtypeStruct((M_pad, C_pad), jnp.float32),
        grid=(1,),
        in_specs=[pl.BlockSpec((M_pad, K_pad), lambda i: (0, 0)),
                  pl.BlockSpec((K_pad, C_pad), lambda i: (0, 0))],
        out_specs=pl.BlockSpec((M_pad, C_pad), lambda i: (0, 0)),
    )(p, w)
    return out[:M, :C]


# ---------------------------------------------------------------------------
# Glue: im2col (XLA strided slices), weight reshape, forward pass
# ---------------------------------------------------------------------------

def _extract_patches(x_nhwc, k, stride, pad):
    N, H, W, C = x_nhwc.shape
    xp = jnp.pad(x_nhwc, ((0, 0), (pad, pad), (pad, pad), (0, 0)))
    OH = (H + 2 * pad - k) // stride + 1
    OW = (W + 2 * pad - k) // stride + 1
    cols = []
    for kh in range(k):
        for kw in range(k):
            cols.append(xp[:, kh:kh + stride * OH:stride,
                           kw:kw + stride * OW:stride, :])
    patches = jnp.stack(cols, axis=3)                  # (N, OH, OW, k*k, C)
    patches = patches.reshape(N * OH * OW, k * k * C)  # cols = (kh, kw, cin)
    return patches, (N, OH, OW)


def _w2d(w_oihw):
    cout, cin, kh, kw = w_oihw.shape
    # (Cout, Cin, KH, KW) -> (KH, KW, Cin, Cout) -> (KH*KW*Cin, Cout)
    return jnp.transpose(w_oihw, (2, 3, 1, 0)).reshape(kh * kw * cin, cout)


def discriminator_forward(x_nchw, params):
    # NCHW -> NHWC; bf16 activations between layers (f32 MXU accumulation)
    x = jnp.transpose(x_nchw, (0, 2, 3, 1)).astype(jnp.bfloat16)

    # layer 1: Conv(3 -> ndf, 4, 2, 1) + LeakyReLU(0.2)
    patches, (N, OH, OW) = _extract_patches(x, 4, 2, 1)
    C = params["w1"].shape[0]
    y = conv_lrelu(patches, _w2d(params["w1"]))
    x = y.reshape(N, OH, OW, C)

    # blocks 2-4: Conv(.., 4, 2, 1) + BatchNorm + LeakyReLU(0.2), fully fused
    for i in (2, 3, 4):
        patches, (N, OH, OW) = _extract_patches(x, 4, 2, 1)
        C = params[f"w{i}"].shape[0]
        y = conv_bn_lrelu(patches, _w2d(params[f"w{i}"]),
                          params[f"g{i}"], params[f"b{i}"])
        x = y.reshape(N, OH, OW, C)

    # final: Conv(8*ndf -> 1, 4, 1, 0) + Sigmoid  (spatial 4x4 -> 1x1)
    patches, (N, OH, OW) = _extract_patches(x, 4, 1, 0)
    y = conv_sigmoid(patches, _w2d(params["w5"]))
    return y.reshape(N, 1, 1, 1).astype(jnp.float32)   # PyTorch NCHW output


# ---------------------------------------------------------------------------
# Deterministic parameter init (PyTorch shapes; synthetic weights)
# ---------------------------------------------------------------------------

def init_params(key, ndf):
    ks = jax.random.split(key, 5)

    def conv_w(k, cout, cin):
        return 0.02 * jax.random.normal(k, (cout, cin, 4, 4), jnp.float32)

    return {
        "w1": conv_w(ks[0], ndf, 3),
        "w2": conv_w(ks[1], ndf * 2, ndf),
        "g2": jnp.ones((ndf * 2,), jnp.float32),
        "b2": jnp.zeros((ndf * 2,), jnp.float32),
        "w3": conv_w(ks[2], ndf * 4, ndf * 2),
        "g3": jnp.ones((ndf * 4,), jnp.float32),
        "b3": jnp.zeros((ndf * 4,), jnp.float32),
        "w4": conv_w(ks[3], ndf * 8, ndf * 4),
        "g4": jnp.ones((ndf * 8,), jnp.float32),
        "b4": jnp.zeros((ndf * 8,), jnp.float32),
        "w5": conv_w(ks[4], 1, ndf * 8),
    }


# ---------------------------------------------------------------------------
# Pure-JAX f32 reference (lax.conv) for a correctness check
# ---------------------------------------------------------------------------

def reference_forward(x_nchw, params):
    def conv(x, w, stride, pad):
        return jax.lax.conv_general_dilated(
            x, w, (stride, stride), ((pad, pad), (pad, pad)),
            dimension_numbers=("NCHW", "OIHW", "NCHW"))

    def lrelu(x):
        return jnp.maximum(x, 0.2 * x)

    def bn(x, g, b):
        mean = jnp.mean(x, axis=(0, 2, 3), keepdims=True)
        var = jnp.mean((x - mean) ** 2, axis=(0, 2, 3), keepdims=True)
        return ((x - mean) * jax.lax.rsqrt(var + 1e-5)
                * g.reshape(1, -1, 1, 1) + b.reshape(1, -1, 1, 1))

    x = lrelu(conv(x_nchw, params["w1"], 2, 1))
    for i in (2, 3, 4):
        x = lrelu(bn(conv(x, params[f"w{i}"], 2, 1),
                     params[f"g{i}"], params[f"b{i}"]))
    x = conv(x, params["w5"], 1, 0)
    return jax.nn.sigmoid(x)


if __name__ == "__main__":
    key = jax.random.PRNGKey(0)
    k_x, k_p = jax.random.split(key)

    ndf = 8                                   # DISCRIMINATOR_FEATURE_MAP_SIZE
    batch = 2
    # DCGAN discriminator architecture requires 3x64x64 inputs.
    x = jax.random.normal(k_x, (batch, 3, 64, 64), jnp.float32)
    params = init_params(k_p, ndf)

    fwd = jax.jit(discriminator_forward)
    out = jax.block_until_ready(fwd(x, params))

    ref = jax.block_until_ready(jax.jit(reference_forward)(x, params))
    assert out.shape == (batch, 1, 1, 1), out.shape
    # bf16 GEMM inputs / activations vs f32 reference -> looser tolerance.
    assert jnp.allclose(out, ref, atol=2e-2, rtol=2e-2), (out, ref)

    print("KERNEL_OK")
</pallas_src>

<mosaic_0001>
module attributes {stable_mosaic.version = 11 : i64} {
  func.func @_conv_lrelu_kernel(%arg0: i32, %arg1: memref<512x128xbf16, #tpu.memory_space<vmem>>, %arg2: memref<128x128xbf16, #tpu.memory_space<vmem>>, %arg3: memref<512x128xbf16, #tpu.memory_space<vmem>>) attributes {dimension_semantics = [#tpu.dimension_semantics<parallel>], iteration_bounds = array<i64: 4>, scalar_prefetch = 0 : i64, scratch_operands = 0 : i64, tpu.core_type = #tpu.core_type<tc>, window_params = [{transform_indices = @transform_0, window_bounds = array<i64: 512, 128>}, {pipeline_mode = #tpu.pipeline_mode<synchronous>, transform_indices = @transform_1, window_bounds = array<i64: 128, 128>}, {transform_indices = @transform_2, window_bounds = array<i64: 512, 128>}]} {
    %c0 = arith.constant 0 : index
    %c0_0 = arith.constant 0 : index
    %0 = vector.load %arg1[%c0, %c0_0] : memref<512x128xbf16, #tpu.memory_space<vmem>>, vector<512x128xbf16>
    %c0_1 = arith.constant 0 : index
    %c0_2 = arith.constant 0 : index
    %1 = vector.load %arg2[%c0_1, %c0_2] : memref<128x128xbf16, #tpu.memory_space<vmem>>, vector<128x128xbf16>
    %cst = arith.constant dense<0.000000e+00> : vector<512x128xf32>
    %2 = tpu.matmul %0, %1, %cst {dimension_numbers = #tpu.dot_dimension_numbers<[1], [0], [0], [1], [0, 0, 1, 1], [], []>} : vector<512x128xbf16>, vector<128x128xbf16>, vector<512x128xf32> -> vector<512x128xf32>
    %cst_3 = arith.constant 2.000000e-01 : f32
    %3 = vector.broadcast %cst_3 : f32 to vector<512x128xf32>
    %4 = arith.mulf %3, %2 : vector<512x128xf32>
    %5 = arith.maximumf %2, %4 : vector<512x128xf32>
    %6 = arith.truncf %5 : vector<512x128xf32> to vector<512x128xbf16>
    %c0_4 = arith.constant 0 : index
    %c0_5 = arith.constant 0 : index
    %7 = vector.load %arg3[%c0_4, %c0_5] : memref<512x128xbf16, #tpu.memory_space<vmem>>, vector<512x128xbf16>
    tpu.vector_store %arg3[%c0_4, %c0_5], %6 {strides = array<i32>} : memref<512x128xbf16, #tpu.memory_space<vmem>>, vector<512x128xbf16>,
    return
  }
  func.func @transform_0(%arg0: i32) -> (i32, i32) {
    %c0_i32 = arith.constant 0 : i32
    %c0_i32_0 = arith.constant 0 : i32
    return %arg0, %c0_i32 : i32, i32
  }
  func.func @transform_1(%arg0: i32) -> (i32, i32) {
    %c0_i32 = arith.constant 0 : i32
    %c0_i32_0 = arith.constant 0 : i32
    %c0_i32_1 = arith.constant 0 : i32
    return %c0_i32, %c0_i32_0 : i32, i32
  }
  func.func @transform_2(%arg0: i32) -> (i32, i32) {
    %c0_i32 = arith.constant 0 : i32
    %c0_i32_0 = arith.constant 0 : i32
    return %arg0, %c0_i32 : i32, i32
  }
}

module attributes {stable_mosaic.version = 11 : i64} {
  func.func @_conv_bn_lrelu_kernel(%arg0: i32, %arg1: memref<512x128xbf16, #tpu.memory_space<vmem>>, %arg2: memref<128x128xbf16, #tpu.memory_space<vmem>>, %arg3: memref<1x128xf32, #tpu.memory_space<vmem>>, %arg4: memref<1x128xf32, #tpu.memory_space<vmem>>, %arg5: memref<512x128xbf16, #tpu.memory_space<vmem>>) attributes {dimension_semantics = [#tpu.dimension_semantics<arbitrary>], iteration_bounds = array<i64: 1>, scalar_prefetch = 0 : i64, scratch_operands = 0 : i64, tpu.core_type = #tpu.core_type<tc>, window_params = [{pipeline_mode = #tpu.pipeline_mode<synchronous>, transform_indices = @transform_0, window_bounds = array<i64: 512, 128>}, {pipeline_mode = #tpu.pipeline_mode<synchronous>, transform_indices = @transform_1, window_bounds = array<i64: 128, 128>}, {pipeline_mode = #tpu.pipeline_mode<synchronous>, transform_indices = @transform_2, window_bounds = array<i64: 1, 128>}, {pipeline_mode = #tpu.pipeline_mode<synchronous>, transform_indices = @transform_3, window_bounds = array<i64: 1, 128>}, {pipeline_mode = #tpu.pipeline_mode<synchronous>, transform_indices = @transform_4, window_bounds = array<i64: 512, 128>}]} {
    %c0 = arith.constant 0 : index
    %c0_0 = arith.constant 0 : index
    %0 = vector.load %arg1[%c0, %c0_0] : memref<512x128xbf16, #tpu.memory_space<vmem>>, vector<512x128xbf16>
    %c0_1 = arith.constant 0 : index
    %c0_2 = arith.constant 0 : index
    %1 = vector.load %arg2[%c0_1, %c0_2] : memref<128x128xbf16, #tpu.memory_space<vmem>>, vector<128x128xbf16>
    %cst = arith.constant dense<0.000000e+00> : vector<512x128xf32>
    %2 = tpu.matmul %0, %1, %cst {dimension_numbers = #tpu.dot_dimension_numbers<[1], [0], [0], [1], [0, 0, 1, 1], [], []>} : vector<512x128xbf16>, vector<128x128xbf16>, vector<512x128xf32> -> vector<512x128xf32>
    %cst_3 = arith.constant dense<0.000000e+00> : vector<128xf32>
    %3 = vector.multi_reduction <add>, %2, %cst_3 [0] : vector<512x128xf32> to vector<128xf32>
    %4 = vector.shape_cast %3 : vector<128xf32> to vector<1x128xf32>
    %cst_4 = arith.constant 0.001953125 : f32
    %5 = vector.broadcast %cst_4 : f32 to vector<1x128xf32>
    %6 = arith.mulf %4, %5 : vector<1x128xf32>
    %7 = vector.broadcast %6 : vector<1x128xf32> to vector<512x128xf32>
    %8 = arith.subf %2, %7 : vector<512x128xf32>
    %9 = arith.mulf %8, %8 : vector<512x128xf32>
    %cst_5 = arith.constant dense<0.000000e+00> : vector<128xf32>
    %10 = vector.multi_reduction <add>, %9, %cst_5 [0] : vector<512x128xf32> to vector<128xf32>
    %11 = vector.shape_cast %10 : vector<128xf32> to vector<1x128xf32>
    %cst_6 = arith.constant 0.001953125 : f32
    %12 = vector.broadcast %cst_6 : f32 to vector<1x128xf32>
    %13 = arith.mulf %11, %12 : vector<1x128xf32>
    %cst_7 = arith.constant 9.99999974E-6 : f32
    %14 = vector.broadcast %cst_7 : f32 to vector<1x128xf32>
    %15 = arith.addf %13, %14 : vector<1x128xf32>
    %16 = math.rsqrt %15 : vector<1x128xf32>
    %17 = vector.broadcast %16 : vector<1x128xf32> to vector<512x128xf32>
    %18 = arith.mulf %8, %17 : vector<512x128xf32>
    %c0_8 = arith.constant 0 : index
    %c0_9 = arith.constant 0 : index
    %19 = vector.load %arg3[%c0_8, %c0_9] : memref<1x128xf32, #tpu.memory_space<vmem>>, vector<1x128xf32>
    %20 = vector.broadcast %19 : vector<1x128xf32> to vector<512x128xf32>
    %21 = arith.mulf %18, %20 : vector<512x128xf32>
    %c0_10 = arith.constant 0 : index
    %c0_11 = arith.constant 0 : index
    %22 = vector.load %arg4[%c0_10, %c0_11] : memref<1x128xf32, #tpu.memory_space<vmem>>, vector<1x128xf32>
    %23 = vector.broadcast %22 : vector<1x128xf32> to vector<512x128xf32>
    %24 = arith.addf %21, %23 : vector<512x128xf32>
    %cst_12 = arith.constant 2.000000e-01 : f32
    %25 = vector.broadcast %cst_12 : f32 to vector<512x128xf32>
    %26 = arith.mulf %25, %24 : vector<512x128xf32>
    %27 = arith.maximumf %24, %26 : vector<512x128xf32>
    %28 = arith.truncf %27 : vector<512x128xf32> to vector<512x128xbf16>
    %c0_13 = arith.constant 0 : index
    %c0_14 = arith.constant 0 : index
    %29 = vector.load %arg5[%c0_13, %c0_14] : memref<512x128xbf16, #tpu.memory_space<vmem>>, vector<512x128xbf16>
    tpu.vector_store %arg5[%c0_13, %c0_14], %28 {strides = array<i32>} : memref<512x128xbf16, #tpu.memory_space<vmem>>, vector<512x128xbf16>,
    return
  }
  func.func @transform_0(%arg0: i32) -> (i32, i32) {
    %c0_i32 = arith.constant 0 : i32
    %c0_i32_0 = arith.constant 0 : i32
    %c0_i32_1 = arith.constant 0 : i32
    return %c0_i32, %c0_i32_0 : i32, i32
  }
  func.func @transform_1(%arg0: i32) -> (i32, i32) {
    %c0_i32 = arith.constant 0 : i32
    %c0_i32_0 = arith.constant 0 : i32
    %c0_i32_1 = arith.constant 0 : i32
    return %c0_i32, %c0_i32_0 : i32, i32
  }
  func.func @transform_2(%arg0: i32) -> (i32, i32) {
    %c0_i32 = arith.constant 0 : i32
    %c0_i32_0 = arith.constant 0 : i32
    %c0_i32_1 = arith.constant 0 : i32
    return %c0_i32, %c0_i32_0 : i32, i32
  }
  func.func @transform_3(%arg0: i32) -> (i32, i32) {
    %c0_i32 = arith.constant 0 : i32
    %c0_i32_0 = arith.constant 0 : i32
    %c0_i32_1 = arith.constant 0 : i32
    return %c0_i32, %c0_i32_0 : i32, i32
  }
  func.func @transform_4(%arg0: i32) -> (i32, i32) {
    %c0_i32 = arith.constant 0 : i32
    %c0_i32_0 = arith.constant 0 : i32
    %c0_i32_1 = arith.constant 0 : i32
    return %c0_i32, %c0_i32_0 : i32, i32
  }
}

module attributes {stable_mosaic.version = 11 : i64} {
  func.func @_conv_bn_lrelu_kernel(%arg0: i32, %arg1: memref<128x256xbf16, #tpu.memory_space<vmem>>, %arg2: memref<256x128xbf16, #tpu.memory_space<vmem>>, %arg3: memref<1x128xf32, #tpu.memory_space<vmem>>, %arg4: memref<1x128xf32, #tpu.memory_space<vmem>>, %arg5: memref<128x128xbf16, #tpu.memory_space<vmem>>) attributes {dimension_semantics = [#tpu.dimension_semantics<arbitrary>], iteration_bounds = array<i64: 1>, scalar_prefetch = 0 : i64, scratch_operands = 0 : i64, tpu.core_type = #tpu.core_type<tc>, window_params = [{pipeline_mode = #tpu.pipeline_mode<synchronous>, transform_indices = @transform_0, window_bounds = array<i64: 128, 256>}, {pipeline_mode = #tpu.pipeline_mode<synchronous>, transform_indices = @transform_1, window_bounds = array<i64: 256, 128>}, {pipeline_mode = #tpu.pipeline_mode<synchronous>, transform_indices = @transform_2, window_bounds = array<i64: 1, 128>}, {pipeline_mode = #tpu.pipeline_mode<synchronous>, transform_indices = @transform_3, window_bounds = array<i64: 1, 128>}, {pipeline_mode = #tpu.pipeline_mode<synchronous>, transform_indices = @transform_4, window_bounds = array<i64: 128, 128>}]} {
    %c0 = arith.constant 0 : index
    %c0_0 = arith.constant 0 : index
    %0 = vector.load %arg1[%c0, %c0_0] : memref<128x256xbf16, #tpu.memory_space<vmem>>, vector<128x256xbf16>
    %c0_1 = arith.constant 0 : index
    %c0_2 = arith.constant 0 : index
    %1 = vector.load %arg2[%c0_1, %c0_2] : memref<256x128xbf16, #tpu.memory_space<vmem>>, vector<256x128xbf16>
    %cst = arith.constant dense<0.000000e+00> : vector<128x128xf32>
    %2 = tpu.matmul %0, %1, %cst {dimension_numbers = #tpu.dot_dimension_numbers<[1], [0], [0], [1], [0, 0, 1, 1], [], []>} : vector<128x256xbf16>, vector<256x128xbf16>, vector<128x128xf32> -> vector<128x128xf32>
    %cst_3 = arith.constant dense<0.000000e+00> : vector<128xf32>
    %3 = vector.multi_reduction <add>, %2, %cst_3 [0] : vector<128x128xf32> to vector<128xf32>
    %4 = vector.shape_cast %3 : vector<128xf32> to vector<1x128xf32>
    %cst_4 = arith.constant 7.812500e-03 : f32
    %5 = vector.broadcast %cst_4 : f32 to vector<1x128xf32>
    %6 = arith.mulf %4, %5 : vector<1x128xf32>
    %7 = vector.broadcast %6 : vector<1x128xf32> to vector<128x128xf32>
    %8 = arith.subf %2, %7 : vector<128x128xf32>
    %9 = arith.mulf %8, %8 : vector<128x128xf32>
    %cst_5 = arith.constant dense<0.000000e+00> : vector<128xf32>
    %10 = vector.multi_reduction <add>, %9, %cst_5 [0] : vector<128x128xf32> to vector<128xf32>
    %11 = vector.shape_cast %10 : vector<128xf32> to vector<1x128xf32>
    %cst_6 = arith.constant 7.812500e-03 : f32
    %12 = vector.broadcast %cst_6 : f32 to vector<1x128xf32>
    %13 = arith.mulf %11, %12 : vector<1x128xf32>
    %cst_7 = arith.constant 9.99999974E-6 : f32
    %14 = vector.broadcast %cst_7 : f32 to vector<1x128xf32>
    %15 = arith.addf %13, %14 : vector<1x128xf32>
    %16 = math.rsqrt %15 : vector<1x128xf32>
    %17 = vector.broadcast %16 : vector<1x128xf32> to vector<128x128xf32>
    %18 = arith.mulf %8, %17 : vector<128x128xf32>
    %c0_8 = arith.constant 0 : index
    %c0_9 = arith.constant 0 : index
    %19 = vector.load %arg3[%c0_8, %c0_9] : memref<1x128xf32, #tpu.memory_space<vmem>>, vector<1x128xf32>
    %20 = vector.broadcast %19 : vector<1x128xf32> to vector<128x128xf32>
    %21 = arith.mulf %18, %20 : vector<128x128xf32>
    %c0_10 = arith.constant 0 : index
    %c0_11 = arith.constant 0 : index
    %22 = vector.load %arg4[%c0_10, %c0_11] : memref<1x128xf32, #tpu.memory_space<vmem>>, vector<1x128xf32>
    %23 = vector.broadcast %22 : vector<1x128xf32> to vector<128x128xf32>
    %24 = arith.addf %21, %23 : vector<128x128xf32>
    %cst_12 = arith.constant 2.000000e-01 : f32
    %25 = vector.broadcast %cst_12 : f32 to vector<128x128xf32>
    %26 = arith.mulf %25, %24 : vector<128x128xf32>
    %27 = arith.maximumf %24, %26 : vector<128x128xf32>
    %28 = arith.truncf %27 : vector<128x128xf32> to vector<128x128xbf16>
    %c0_13 = arith.constant 0 : index
    %c0_14 = arith.constant 0 : index
    %29 = vector.load %arg5[%c0_13, %c0_14] : memref<128x128xbf16, #tpu.memory_space<vmem>>, vector<128x128xbf16>
    tpu.vector_store %arg5[%c0_13, %c0_14], %28 {strides = array<i32>} : memref<128x128xbf16, #tpu.memory_space<vmem>>, vector<128x128xbf16>,
    return
  }
  func.func @transform_0(%arg0: i32) -> (i32, i32) {
    %c0_i32 = arith.constant 0 : i32
    %c0_i32_0 = arith.constant 0 : i32
    %c0_i32_1 = arith.constant 0 : i32
    return %c0_i32, %c0_i32_0 : i32, i32
  }
  func.func @transform_1(%arg0: i32) -> (i32, i32) {
    %c0_i32 = arith.constant 0 : i32
    %c0_i32_0 = arith.constant 0 : i32
    %c0_i32_1 = arith.constant 0 : i32
    return %c0_i32, %c0_i32_0 : i32, i32
  }
  func.func @transform_2(%arg0: i32) -> (i32, i32) {
    %c0_i32 = arith.constant 0 : i32
    %c0_i32_0 = arith.constant 0 : i32
    %c0_i32_1 = arith.constant 0 : i32
    return %c0_i32, %c0_i32_0 : i32, i32
  }
  func.func @transform_3(%arg0: i32) -> (i32, i32) {
    %c0_i32 = arith.constant 0 : i32
    %c0_i32_0 = arith.constant 0 : i32
    %c0_i32_1 = arith.constant 0 : i32
    return %c0_i32, %c0_i32_0 : i32, i32
  }
  func.func @transform_4(%arg0: i32) -> (i32, i32) {
    %c0_i32 = arith.constant 0 : i32
    %c0_i32_0 = arith.constant 0 : i32
    %c0_i32_1 = arith.constant 0 : i32
    return %c0_i32, %c0_i32_0 : i32, i32
  }
}

module attributes {stable_mosaic.version = 11 : i64} {
  func.func @_conv_bn_lrelu_kernel(%arg0: i32, %arg1: memref<32x512xbf16, #tpu.memory_space<vmem>>, %arg2: memref<512x128xbf16, #tpu.memory_space<vmem>>, %arg3: memref<1x128xf32, #tpu.memory_space<vmem>>, %arg4: memref<1x128xf32, #tpu.memory_space<vmem>>, %arg5: memref<32x128xbf16, #tpu.memory_space<vmem>>) attributes {dimension_semantics = [#tpu.dimension_semantics<arbitrary>], iteration_bounds = array<i64: 1>, scalar_prefetch = 0 : i64, scratch_operands = 0 : i64, tpu.core_type = #tpu.core_type<tc>, window_params = [{pipeline_mode = #tpu.pipeline_mode<synchronous>, transform_indices = @transform_0, window_bounds = array<i64: 32, 512>}, {pipeline_mode = #tpu.pipeline_mode<synchronous>, transform_indices = @transform_1, window_bounds = array<i64: 512, 128>}, {pipeline_mode = #tpu.pipeline_mode<synchronous>, transform_indices = @transform_2, window_bounds = array<i64: 1, 128>}, {pipeline_mode = #tpu.pipeline_mode<synchronous>, transform_indices = @transform_3, window_bounds = array<i64: 1, 128>}, {pipeline_mode = #tpu.pipeline_mode<synchronous>, transform_indices = @transform_4, window_bounds = array<i64: 32, 128>}]} {
    %c0 = arith.constant 0 : index
    %c0_0 = arith.constant 0 : index
    %0 = vector.load %arg1[%c0, %c0_0] : memref<32x512xbf16, #tpu.memory_space<vmem>>, vector<32x512xbf16>
    %c0_1 = arith.constant 0 : index
    %c0_2 = arith.constant 0 : index
    %1 = vector.load %arg2[%c0_1, %c0_2] : memref<512x128xbf16, #tpu.memory_space<vmem>>, vector<512x128xbf16>
    %cst = arith.constant dense<0.000000e+00> : vector<32x128xf32>
    %2 = tpu.matmul %0, %1, %cst {dimension_numbers = #tpu.dot_dimension_numbers<[1], [0], [0], [1], [0, 0, 1, 1], [], []>} : vector<32x512xbf16>, vector<512x128xbf16>, vector<32x128xf32> -> vector<32x128xf32>
    %cst_3 = arith.constant dense<0.000000e+00> : vector<128xf32>
    %3 = vector.multi_reduction <add>, %2, %cst_3 [0] : vector<32x128xf32> to vector<128xf32>
    %4 = vector.shape_cast %3 : vector<128xf32> to vector<1x128xf32>
    %cst_4 = arith.constant 3.125000e-02 : f32
    %5 = vector.broadcast %cst_4 : f32 to vector<1x128xf32>
    %6 = arith.mulf %4, %5 : vector<1x128xf32>
    %7 = vector.broadcast %6 : vector<1x128xf32> to vector<32x128xf32>
    %8 = arith.subf %2, %7 : vector<32x128xf32>
    %9 = arith.mulf %8, %8 : vector<32x128xf32>
    %cst_5 = arith.constant dense<0.000000e+00> : vector<128xf32>
    %10 = vector.multi_reduction <add>, %9, %cst_5 [0] : vector<32x128xf32> to vector<128xf32>
    %11 = vector.shape_cast %10 : vector<128xf32> to vector<1x128xf32>
    %cst_6 = arith.constant 3.125000e-02 : f32
    %12 = vector.broadcast %cst_6 : f32 to vector<1x128xf32>
    %13 = arith.mulf %11, %12 : vector<1x128xf32>
    %cst_7 = arith.constant 9.99999974E-6 : f32
    %14 = vector.broadcast %cst_7 : f32 to vector<1x128xf32>
    %15 = arith.addf %13, %14 : vector<1x128xf32>
    %16 = math.rsqrt %15 : vector<1x128xf32>
    %17 = vector.broadcast %16 : vector<1x128xf32> to vector<32x128xf32>
    %18 = arith.mulf %8, %17 : vector<32x128xf32>
    %c0_8 = arith.constant 0 : index
    %c0_9 = arith.constant 0 : index
    %19 = vector.load %arg3[%c0_8, %c0_9] : memref<1x128xf32, #tpu.memory_space<vmem>>, vector<1x128xf32>
    %20 = vector.broadcast %19 : vector<1x128xf32> to vector<32x128xf32>
    %21 = arith.mulf %18, %20 : vector<32x128xf32>
    %c0_10 = arith.constant 0 : index
    %c0_11 = arith.constant 0 : index
    %22 = vector.load %arg4[%c0_10, %c0_11] : memref<1x128xf32, #tpu.memory_space<vmem>>, vector<1x128xf32>
    %23 = vector.broadcast %22 : vector<1x128xf32> to vector<32x128xf32>
    %24 = arith.addf %21, %23 : vector<32x128xf32>
    %cst_12 = arith.constant 2.000000e-01 : f32
    %25 = vector.broadcast %cst_12 : f32 to vector<32x128xf32>
    %26 = arith.mulf %25, %24 : vector<32x128xf32>
    %27 = arith.maximumf %24, %26 : vector<32x128xf32>
    %28 = arith.truncf %27 : vector<32x128xf32> to vector<32x128xbf16>
    %c0_13 = arith.constant 0 : index
    %c0_14 = arith.constant 0 : index
    %29 = vector.load %arg5[%c0_13, %c0_14] : memref<32x128xbf16, #tpu.memory_space<vmem>>, vector<32x128xbf16>
    tpu.vector_store %arg5[%c0_13, %c0_14], %28 {strides = array<i32>} : memref<32x128xbf16, #tpu.memory_space<vmem>>, vector<32x128xbf16>,
    return
  }
  func.func @transform_0(%arg0: i32) -> (i32, i32) {
    %c0_i32 = arith.constant 0 : i32
    %c0_i32_0 = arith.constant 0 : i32
    %c0_i32_1 = arith.constant 0 : i32
    return %c0_i32, %c0_i32_0 : i32, i32
  }
  func.func @transform_1(%arg0: i32) -> (i32, i32) {
    %c0_i32 = arith.constant 0 : i32
    %c0_i32_0 = arith.constant 0 : i32
    %c0_i32_1 = arith.constant 0 : i32
    return %c0_i32, %c0_i32_0 : i32, i32
  }
  func.func @transform_2(%arg0: i32) -> (i32, i32) {
    %c0_i32 = arith.constant 0 : i32
    %c0_i32_0 = arith.constant 0 : i32
    %c0_i32_1 = arith.constant 0 : i32
    return %c0_i32, %c0_i32_0 : i32, i32
  }
  func.func @transform_3(%arg0: i32) -> (i32, i32) {
    %c0_i32 = arith.constant 0 : i32
    %c0_i32_0 = arith.constant 0 : i32
    %c0_i32_1 = arith.constant 0 : i32
    return %c0_i32, %c0_i32_0 : i32, i32
  }
  func.func @transform_4(%arg0: i32) -> (i32, i32) {
    %c0_i32 = arith.constant 0 : i32
    %c0_i32_0 = arith.constant 0 : i32
    %c0_i32_1 = arith.constant 0 : i32
    return %c0_i32, %c0_i32_0 : i32, i32
  }
}

module attributes {stable_mosaic.version = 11 : i64} {
  func.func @_conv_sigmoid_kernel(%arg0: i32, %arg1: memref<16x1024xbf16, #tpu.memory_space<vmem>>, %arg2: memref<1024x128xbf16, #tpu.memory_space<vmem>>, %arg3: memref<16x128xf32, #tpu.memory_space<vmem>>) attributes {dimension_semantics = [#tpu.dimension_semantics<arbitrary>], iteration_bounds = array<i64: 1>, scalar_prefetch = 0 : i64, scratch_operands = 0 : i64, tpu.core_type = #tpu.core_type<tc>, window_params = [{pipeline_mode = #tpu.pipeline_mode<synchronous>, transform_indices = @transform_0, window_bounds = array<i64: 16, 1024>}, {pipeline_mode = #tpu.pipeline_mode<synchronous>, transform_indices = @transform_1, window_bounds = array<i64: 1024, 128>}, {pipeline_mode = #tpu.pipeline_mode<synchronous>, transform_indices = @transform_2, window_bounds = array<i64: 16, 128>}]} {
    %c0 = arith.constant 0 : index
    %c0_0 = arith.constant 0 : index
    %0 = vector.load %arg1[%c0, %c0_0] : memref<16x1024xbf16, #tpu.memory_space<vmem>>, vector<16x1024xbf16>
    %c0_1 = arith.constant 0 : index
    %c0_2 = arith.constant 0 : index
    %1 = vector.load %arg2[%c0_1, %c0_2] : memref<1024x128xbf16, #tpu.memory_space<vmem>>, vector<1024x128xbf16>
    %cst = arith.constant dense<0.000000e+00> : vector<16x128xf32>
    %2 = tpu.matmul %0, %1, %cst {dimension_numbers = #tpu.dot_dimension_numbers<[1], [0], [0], [1], [0, 0, 1, 1], [], []>} : vector<16x1024xbf16>, vector<1024x128xbf16>, vector<16x128xf32> -> vector<16x128xf32>
    %cst_3 = arith.constant 0.000000e+00 : f32
    %3 = vector.broadcast %cst_3 : f32 to vector<16x128xf32>
    %4 = arith.subf %3, %2 : vector<16x128xf32>
    %5 = math.exp %4 : vector<16x128xf32>
    %cst_4 = arith.constant 1.000000e+00 : f32
    %6 = vector.broadcast %cst_4 : f32 to vector<16x128xf32>
    %7 = arith.addf %6, %5 : vector<16x128xf32>
    %cst_5 = arith.constant 1.000000e+00 : f32
    %8 = vector.broadcast %cst_5 : f32 to vector<16x128xf32>
    %9 = arith.divf %8, %7 : vector<16x128xf32>
    %c0_6 = arith.constant 0 : index
    %c0_7 = arith.constant 0 : index
    %10 = vector.load %arg3[%c0_6, %c0_7] : memref<16x128xf32, #tpu.memory_space<vmem>>, vector<16x128xf32>
    tpu.vector_store %arg3[%c0_6, %c0_7], %9 {strides = array<i32>} : memref<16x128xf32, #tpu.memory_space<vmem>>, vector<16x128xf32>,
    return
  }
  func.func @transform_0(%arg0: i32) -> (i32, i32) {
    %c0_i32 = arith.constant 0 : i32
    %c0_i32_0 = arith.constant 0 : i32
    %c0_i32_1 = arith.constant 0 : i32
    return %c0_i32, %c0_i32_0 : i32, i32
  }
  func.func @transform_1(%arg0: i32) -> (i32, i32) {
    %c0_i32 = arith.constant 0 : i32
    %c0_i32_0 = arith.constant 0 : i32
    %c0_i32_1 = arith.constant 0 : i32
    return %c0_i32, %c0_i32_0 : i32, i32
  }
  func.func @transform_2(%arg0: i32) -> (i32, i32) {
    %c0_i32 = arith.constant 0 : i32
    %c0_i32_0 = arith.constant 0 : i32
    %c0_i32_1 = arith.constant 0 : i32
    return %c0_i32, %c0_i32_0 : i32, i32
  }
}

</mosaic_0001>

<bundles_post_ra>
// kernel: discriminator_forward.5
= control target key start
LH: loop header
LB: loop body
LE: loop exit
PB: predicated region body
PF: predicated region fallthrough
CT: control target
= control target key end

     0   :  { %s1838_s9 = smov 0   ;;  %s1954_s0 = inlined_call_operand.vmem [shape: bf16[2048,128], index: 0, kind: input, shape index: {}]   ;;  %s1955_s1 = inlined_call_operand.vmem [shape: bf16[128,128], index: 1, kind: input, shape index: {}]   ;;  %s1956_s2 = inlined_call_operand.vmem [shape: bf16[2048,128], index: 2, kind: output, shape index: {}]  }
   0x1 LB: > { %s1261_s10 = sadd.s32 4294967295, %s1821_s9   ;;  %p1265_p0 = scmp.ge.s32.totalorder %s1821_s9, 1  ;;  %s1821_s9 = sphi %s1838_s9, %s12_s9  }
   0x2   : > { %p113_p1 = scmp.lt.s32.totalorder %s1821_s9, 5 }
   0x4   : > { %p114_p2 = pnand %p1265_p0, %p113_p1 }
   0x5   : > { %v1775_v0 = vld [vmem:[%s1955_s1] sm:$0xff] (!%p114_p2)   ;;  %s1266_s13 = sshll.u32 (!%p114_p2), %s1261_s10, 6  ;;  %v1776_v1 = vld [vmem:[%s1955_s1 + $0x8] sm:$0xff] (!%p114_p2)   ;;  %v1777_v2 = vld [vmem:[%s1955_s1 + $0x10] sm:$0xff] (!%p114_p2)  }
   0x6   : > { %117 = sbr.rel (%p114_p2) target bundleno = 317 (0x13d), region = 28  ;;  %p136_p3 = scmp.lt.s32.totalorder (!%p114_p2), %s1266_s13, 255  ;;  %1671 = vmatprep.subr.bf16.mxu0 (!%p114_p2), %v1775_v0  ;;  %1751 = vmatprep.subr.bf16.mxu1 (!%p114_p2), %v1775_v0  ;;  %v1778_v3 = vld [vmem:[%s1955_s1 + $0x18] sm:$0xff] (!%p114_p2)   ;;  %v1779_v6 = vld [vmem:[%s1955_s1 + $0x20] sm:$0xff] (!%p114_p2)   ;;  %v1780_v7 = vld [vmem:[%s1955_s1 + $0x28] sm:$0xff] (!%p114_p2)  }
   0x7   : > { %1672 = vmatpush3.bf16.msra.mxu0 (!%p114_p2), %v1775_v0  ;;  %1759 = vmatpush3.bf16.msra.mxu1 (!%p114_p2), %v1775_v0  ;;  %v1781_v8 = vld [vmem:[%s1955_s1 + $0x30] sm:$0xff] (!%p114_p2)   ;;  %v1782_v9 = vld [vmem:[%s1955_s1 + $0x38] sm:$0xff] (!%p114_p2)  }
   0x8   : > { %1673 = vmatprep.subr.bf16.mxu0 (!%p114_p2), %v1776_v1  ;;  %1752 = vmatprep.subr.bf16.mxu1 (!%p114_p2), %v1776_v1 }
   0xb   : > { %1674 = vmatpush3.bf16.msra.mxu0 (!%p114_p2), %v1776_v1  ;;  %1760 = vmatpush3.bf16.msra.mxu1 (!%p114_p2), %v1776_v1 }
   0xc   : > { %1675 = vmatprep.subr.bf16.mxu0 (!%p114_p2), %v1777_v2  ;;  %1753 = vmatprep.subr.bf16.mxu1 (!%p114_p2), %v1777_v2 }
   0xd   : > { %s1958_s13 = smov (!%p136_p3, %s1266_s13), 255 }
   0xe   : > { %s1267_s18 = sshll.u32 %s1958_s13, 2 }
   0xf   : > { %s1863_s21 = scalar_lea.vmem %s1954_s0, %s1267_s18  ;;  %1676 = vmatpush3.bf16.msra.mxu0 %v1777_v2  ;;  %1761 = vmatpush3.bf16.msra.mxu1 %v1777_v2  ;;  %s1917_s6 = scalar_lea.vmem %s1956_s2, %s1267_s18 }
  0x10   : > { %v1783_v4 = vld [vmem:[%s1863_s21] sm:$0xff]   ;;  %1677 = vmatprep.subr.bf16.mxu0 %v1778_v3  ;;  %1754 = vmatprep.subr.bf16.mxu1 %v1778_v3  ;;  %v1785_v10 = vld [vmem:[%s1863_s21 + $0x8] sm:$0xff]   ;;  %v1787_v12 = vld [vmem:[%s1863_s21 + $0x10] sm:$0xff]  }
  0x11   : > { %v1784_v5 = vld [vmem:[%s1863_s21 + $0x80] sm:$0xff]   ;;  %1687 = vmatprep.mubr.bf16.mxu0 %v1783_v4  ;;  %v1786_v11 = vld [vmem:[%s1863_s21 + $0x88] sm:$0xff]   ;;  %v1788_v13 = vld [vmem:[%s1863_s21 + $0x90] sm:$0xff]  }
  0x12   : > { %1719 = vmatprep.mubr.bf16.mxu1 %v1784_v5  ;;  %v1789_v14 = vld [vmem:[%s1863_s21 + $0x18] sm:$0xff]   ;;  %v1791_v16 = vld [vmem:[%s1863_s21 + $0x20] sm:$0xff]   ;;  %v1793_v18 = vld [vmem:[%s1863_s21 + $0x28] sm:$0xff]  }
  0x13   : > { %1678 = vmatpush3.bf16.msra.mxu0 %v1778_v3  ;;  %1762 = vmatpush3.bf16.msra.mxu1 %v1778_v3  ;;  %v1790_v15 = vld [vmem:[%s1863_s21 + $0x98] sm:$0xff]   ;;  %v1792_v17 = vld [vmem:[%s1863_s21 + $0xa0] sm:$0xff]   ;;  %v1794_v19 = vld [vmem:[%s1863_s21 + $0xa8] sm:$0xff]  }
  0x14   : > { %1679 = vmatprep.subr.bf16.mxu0 %v1779_v6  ;;  %1755 = vmatprep.subr.bf16.mxu1 %v1779_v6  ;;  %v1795_v20 = vld [vmem:[%s1863_s21 + $0x30] sm:$0xff]   ;;  %v1797_v22 = vld [vmem:[%s1863_s21 + $0x38] sm:$0xff]   ;;  %v1799_v24 = vld [vmem:[%s1863_s21 + $0x40] sm:$0xff]  }
  0x15   : > { %v1796_v21 = vld [vmem:[%s1863_s21 + $0xb0] sm:$0xff]   ;;  %v1798_v23 = vld [vmem:[%s1863_s21 + $0xb8] sm:$0xff]   ;;  %v1800_v25 = vld [vmem:[%s1863_s21 + $0xc0] sm:$0xff]  }
  0x16   : > { %v1801_v26 = vld [vmem:[%s1863_s21 + $0x48] sm:$0xff]   ;;  %v1803_v28 = vld [vmem:[%s1863_s21 + $0x50] sm:$0xff]   ;;  %v1805_v30 = vld [vmem:[%s1863_s21 + $0x58] sm:$0xff]  }
  0x17   : > { %1680 = vmatpush3.bf16.msra.mxu0 %v1779_v6  ;;  %1763 = vmatpush3.bf16.msra.mxu1 %v1779_v6  ;;  %v1802_v27 = vld [vmem:[%s1863_s21 + $0xc8] sm:$0xff]   ;;  %v1804_v29 = vld [vmem:[%s1863_s21 + $0xd0] sm:$0xff]   ;;  %v1806_v31 = vld [vmem:[%s1863_s21 + $0xd8] sm:$0xff]  }
  0x18   : > { %1681 = vmatprep.subr.bf16.mxu0 %v1780_v7  ;;  %1756 = vmatprep.subr.bf16.mxu1 %v1780_v7  ;;  %v1807_v32 = vld [vmem:[%s1863_s21 + $0x60] sm:$0xff]   ;;  %v1809_v34 = vld [vmem:[%s1863_s21 + $0x68] sm:$0xff]   ;;  %v1811_v36 = vld [vmem:[%s1863_s21 + $0x70] sm:$0xff]  }
  0x19   : > { %v1808_v33 = vld [vmem:[%s1863_s21 + $0xe0] sm:$0xff]   ;;  %v1810_v35 = vld [vmem:[%s1863_s21 + $0xe8] sm:$0xff]   ;;  %v1812_v37 = vld [vmem:[%s1863_s21 + $0xf0] sm:$0xff]  }
  0x1a   : > { %v1813_v38 = vld [vmem:[%s1863_s21 + $0x78] sm:$0xff]  }
  0x1b   : > { %1682 = vmatpush3.bf16.msra.mxu0 %v1780_v7  ;;  %1764 = vmatpush3.bf16.msra.mxu1 %v1780_v7  ;;  %v1814_v39 = vld [vmem:[%s1863_s21 + $0xf8] sm:$0xff]  }
  0x1c   : > { %1683 = vmatprep.subr.bf16.mxu0 %v1781_v8  ;;  %1757 = vmatprep.subr.bf16.mxu1 %v1781_v8 }
  0x1f   : > { %1684 = vmatpush3.bf16.msra.mxu0 %v1781_v8  ;;  %1765 = vmatpush3.bf16.msra.mxu1 %v1781_v8 }
  0x20   : > { %1685 = vmatprep.subr.bf16.mxu0 %v1782_v9  ;;  %1758 = vmatprep.subr.bf16.mxu1 %v1782_v9 }
  0x23   : > { %1686 = vmatpush3.bf16.msra.mxu0 %v1782_v9  ;;  %1766 = vmatpush3.bf16.msra.mxu1 %v1782_v9 }
  0x26   : > { %1688 = vmatmul.mubr.bf16.vlgmr.msra.gmra.mrb[0].mxu0 %v1785_v10  ;;  %1720 = vmatmul.mubr.bf16.vlgmr.msra.gmra.mrb[0].mxu1 %v1786_v11 }
  0x27   : > { %1691 = vmatprep.mubr.bf16.mxu0 %v1787_v12  ;;  %1723 = vmatprep.mubr.bf16.mxu1 %v1788_v13 }
  0x2e   : > { %1692 = vmatmul.mubr.bf16.gmra.mrb[4].mxu0 %v1789_v14  ;;  %1724 = vmatmul.mubr.bf16.gmra.mrb[4].mxu1 %v1790_v15 }
  0x2f   : > { %1695 = vmatprep.mubr.bf16.mxu0 %v1791_v16  ;;  %1727 = vmatprep.mubr.bf16.mxu1 %v1792_v17 }
  0x36   : > { %1696 = vmatmul.mubr.bf16.gmra.mrb[8].mxu0 %v1793_v18  ;;  %1728 = vmatmul.mubr.bf16.gmra.mrb[8].mxu1 %v1794_v19 }
  0x37   : > { %1699 = vmatprep.mubr.bf16.mxu0 %v1795_v20  ;;  %1731 = vmatprep.mubr.bf16.mxu1 %v1796_v21 }
  0x3e   : > { %1700 = vmatmul.mubr.bf16.gmra.mrb[12].mxu0 %v1797_v22  ;;  %1732 = vmatmul.mubr.bf16.gmra.mrb[12].mxu1 %v1798_v23 }
  0x3f   : > { %1703 = vmatprep.mubr.bf16.mxu0 %v1799_v24  ;;  %1735 = vmatprep.mubr.bf16.mxu1 %v1800_v25 }
  0x46   : > { %1704 = vmatmul.mubr.bf16.gmra.mrb[16].mxu0 %v1801_v26  ;;  %1736 = vmatmul.mubr.bf16.gmra.mrb[16].mxu1 %v1802_v27 }
  0x47   : > { %1707 = vmatprep.mubr.bf16.mxu0 %v1803_v28  ;;  %1739 = vmatprep.mubr.bf16.mxu1 %v1804_v29 }
  0x4e   : > { %1708 = vmatmul.mubr.bf16.gmra.mrb[20].mxu0 %v1805_v30  ;;  %1740 = vmatmul.mubr.bf16.gmra.mrb[20].mxu1 %v1806_v31 }
  0x4f   : > { %1711 = vmatprep.mubr.bf16.mxu0 %v1807_v32  ;;  %1743 = vmatprep.mubr.bf16.mxu1 %v1808_v33 }
  0x56   : > { %1712 = vmatmul.mubr.bf16.gmra.mrb[24].mxu0 %v1809_v34  ;;  %1744 = vmatmul.mubr.bf16.gmra.mrb[24].mxu1 %v1810_v35 }
  0x57   : > { %1715 = vmatprep.mubr.bf16.mxu0 %v1811_v36  ;;  %1747 = vmatprep.mubr.bf16.mxu1 %v1812_v37 }
  0x5e   : > { %1716 = vmatmul.mubr.bf16.gmra.mrb[28].mxu0 %v1813_v38  ;;  %1748 = vmatmul.mubr.bf16.gmra.mrb[28].mxu1 %v1814_v39 }
  0xf9   : > { %v1689_v40 = vpop.f32.mrb[0].mxu0  ;;  %v1721_v41 = vpop.f32.mrb[0].mxu1 }
  0xfa   : > { %v759_v42 = vmul.f32 0.2, %v1689_v40  ;;  %v791_v43 = vmul.f32 0.2, %v1721_v41  ;;  %v502_v44 = vpop.f32.mrb[1].mxu0  ;;  %v630_v45 = vpop.f32.mrb[1].mxu1 }
  0xfb   : > { %v757_v46 = vmul.f32 0.2, %v502_v44  ;;  %v789_v47 = vmul.f32 0.2, %v630_v45  ;;  %v1690_v48 = vpop.f32.mrb[2].mxu0  ;;  %v1722_v49 = vpop.f32.mrb[2].mxu1 }
  0xfc   : > { %v760_v50 = vmul.f32 0.2, %v1690_v48  ;;  %v792_v51 = vmul.f32 0.2, %v1722_v49  ;;  %v505_v52 = vpop.f32.mrb[3].mxu0  ;;  %v633_v53 = vpop.f32.mrb[3].mxu1  ;;  %v823_v56 = vmax.f32 %v1689_v40, %v759_v42  ;;  %v855_v57 = vmax.f32 %v1721_v41, %v791_v43 }
  0xfd   : > { %v758_v54 = vmul.f32 0.2, %v505_v52  ;;  %v790_v55 = vmul.f32 0.2, %v633_v53  ;;  %v821_v60 = vmax.f32 %v502_v44, %v757_v46  ;;  %v853_v61 = vmax.f32 %v630_v45, %v789_v47 }
  0xfe   : > { %v824_v58 = vmax.f32 %v1690_v48, %v760_v50  ;;  %v856_v59 = vmax.f32 %v1722_v49, %v792_v51 }
  0xff   : > { %v822_v62 = vmax.f32 %v505_v52, %v758_v54  ;;  %v854_v63 = vmax.f32 %v633_v53, %v790_v55 }
 0x100   : > { %v1448_v0 = vpack.c.bf16 %v824_v58, %v823_v56  ;;  %v1528_v1 = vpack.c.bf16 %v856_v59, %v855_v57 }
 0x101   : > { %v1443_v2 = vpack.c.bf16 %v822_v62, %v821_v60  ;;  %v1523_v3 = vpack.c.bf16 %v854_v63, %v853_v61  ;;  %v1693_v4 = vpop.f32.mrb[4].mxu0  ;;  %v1725_v5 = vpop.f32.mrb[4].mxu1 }
 0x102   : > { %1600 = vst [vmem:[%s1917_s6 + $0x8] sm:$0xff] %v1448_v0   ;;  %1616 = vst [vmem:[%s1917_s6 + $0x88] sm:$0xff] %v1528_v1   ;;  %v763_v6 = vmul.f32 0.2, %v1693_v4  ;;  %v795_v7 = vmul.f32 0.2, %v1725_v5 }
 0x103   : > { %v518_v8 = vpop.f32.mrb[5].mxu0  ;;  %v646_v9 = vpop.f32.mrb[5].mxu1  ;;  %1444 = vst [vmem:[%s1917_s6] sm:$0xff] %v1443_v2   ;;  %1615 = vst [vmem:[%s1917_s6 + $0x80] sm:$0xff] %v1523_v3  }
 0x104   : > { %v761_v10 = vmul.f32 0.2, %v518_v8  ;;  %v793_v11 = vmul.f32 0.2, %v646_v9  ;;  %v1694_v12 = vpop.f32.mrb[6].mxu0  ;;  %v1726_v13 = vpop.f32.mrb[6].mxu1  ;;  %v827_v20 = vmax.f32 %v1693_v4, %v763_v6  ;;  %v859_v21 = vmax.f32 %v1725_v5, %v795_v7 }
 0x105   : > { %v764_v14 = vmul.f32 0.2, %v1694_v12  ;;  %v796_v15 = vmul.f32 0.2, %v1726_v13  ;;  %v521_v16 = vpop.f32.mrb[7].mxu0  ;;  %v649_v17 = vpop.f32.mrb[7].mxu1 }
 0x106   : > { %v762_v18 = vmul.f32 0.2, %v521_v16  ;;  %v794_v19 = vmul.f32 0.2, %v649_v17  ;;  %v825_v24 = vmax.f32 %v518_v8, %v761_v10  ;;  %v857_v25 = vmax.f32 %v646_v9, %v793_v11 }
 0x107   : > { %v828_v22 = vmax.f32 %v1694_v12, %v764_v14  ;;  %v860_v23 = vmax.f32 %v1726_v13, %v796_v15 }
 0x108   : > { %v826_v26 = vmax.f32 %v521_v16, %v762_v18  ;;  %v858_v27 = vmax.f32 %v649_v17, %v794_v19 }
 0x109   : > { %v1458_v28 = vpack.c.bf16 %v828_v22, %v827_v20  ;;  %v1538_v29 = vpack.c.bf16 %v860_v23, %v859_v21  ;;  %v1697_v32 = vpop.f32.mrb[8].mxu0  ;;  %v1729_v33 = vpop.f32.mrb[8].mxu1 }
 0x10a   : > { %v1453_v30 = vpack.c.bf16 %v826_v26, %v825_v24  ;;  %v1533_v31 = vpack.c.bf16 %v858_v27, %v857_v25  ;;  %v767_v34 = vmul.f32 0.2, %v1697_v32  ;;  %v799_v35 = vmul.f32 0.2, %v1729_v33  ;;  %v534_v36 = vpop.f32.mrb[9].mxu0  ;;  %v662_v37 = vpop.f32.mrb[9].mxu1 }
 0x10b   : > { %1602 = vst [vmem:[%s1917_s6 + $0x18] sm:$0xff] %v1458_v28   ;;  %1618 = vst [vmem:[%s1917_s6 + $0x98] sm:$0xff] %v1538_v29   ;;  %v765_v38 = vmul.f32 0.2, %v534_v36  ;;  %v797_v39 = vmul.f32 0.2, %v662_v37 }
 0x10c   : > { %1601 = vst [vmem:[%s1917_s6 + $0x10] sm:$0xff] %v1453_v30   ;;  %1617 = vst [vmem:[%s1917_s6 + $0x90] sm:$0xff] %v1533_v31   ;;  %v1698_v40 = vpop.f32.mrb[10].mxu0  ;;  %v1730_v41 = vpop.f32.mrb[10].mxu1  ;;  %v831_v48 = vmax.f32 %v1697_v32, %v767_v34  ;;  %v863_v49 = vmax.f32 %v1729_v33, %v799_v35 }
 0x10d   : > { %v768_v42 = vmul.f32 0.2, %v1698_v40  ;;  %v800_v43 = vmul.f32 0.2, %v1730_v41  ;;  %v537_v44 = vpop.f32.mrb[11].mxu0  ;;  %v665_v45 = vpop.f32.mrb[11].mxu1  ;;  %v829_v52 = vmax.f32 %v534_v36, %v765_v38  ;;  %v861_v53 = vmax.f32 %v662_v37, %v797_v39 }
 0x10e   : > { %v766_v46 = vmul.f32 0.2, %v537_v44  ;;  %v798_v47 = vmul.f32 0.2, %v665_v45 }
 0x10f   : > { %v832_v50 = vmax.f32 %v1698_v40, %v768_v42  ;;  %v864_v51 = vmax.f32 %v1730_v41, %v800_v43 }
 0x110   : > { %v830_v54 = vmax.f32 %v537_v44, %v766_v46  ;;  %v862_v55 = vmax.f32 %v665_v45, %v798_v47 }
 0x111   : > { %v1468_v56 = vpack.c.bf16 %v832_v50, %v831_v48  ;;  %v1548_v57 = vpack.c.bf16 %v864_v51, %v863_v49  ;;  %v1701_v60 = vpop.f32.mrb[12].mxu0  ;;  %v1733_v61 = vpop.f32.mrb[12].mxu1 }
 0x112   : > { %v1463_v58 = vpack.c.bf16 %v830_v54, %v829_v52  ;;  %v1543_v59 = vpack.c.bf16 %v862_v55, %v861_v53  ;;  %v771_v62 = vmul.f32 0.2, %v1701_v60  ;;  %v803_v63 = vmul.f32 0.2, %v1733_v61  ;;  %v550_v0 = vpop.f32.mrb[13].mxu0  ;;  %v678_v1 = vpop.f32.mrb[13].mxu1 }
 0x113   : > { %1604 = vst [vmem:[%s1917_s6 + $0x28] sm:$0xff] %v1468_v56   ;;  %1620 = vst [vmem:[%s1917_s6 + $0xa8] sm:$0xff] %v1548_v57   ;;  %v769_v2 = vmul.f32 0.2, %v550_v0  ;;  %v801_v3 = vmul.f32 0.2, %v678_v1 }
 0x114   : > { %1603 = vst [vmem:[%s1917_s6 + $0x20] sm:$0xff] %v1463_v58   ;;  %1619 = vst [vmem:[%s1917_s6 + $0xa0] sm:$0xff] %v1543_v59   ;;  %v1702_v4 = vpop.f32.mrb[14].mxu0  ;;  %v1734_v5 = vpop.f32.mrb[14].mxu1  ;;  %v835_v12 = vmax.f32 %v1701_v60, %v771_v62  ;;  %v867_v13 = vmax.f32 %v1733_v61, %v803_v63 }
 0x115   : > { %v772_v6 = vmul.f32 0.2, %v1702_v4  ;;  %v804_v7 = vmul.f32 0.2, %v1734_v5  ;;  %v553_v8 = vpop.f32.mrb[15].mxu0  ;;  %v681_v9 = vpop.f32.mrb[15].mxu1  ;;  %v833_v16 = vmax.f32 %v550_v0, %v769_v2  ;;  %v865_v17 = vmax.f32 %v678_v1, %v801_v3 }
 0x116   : > { %v770_v10 = vmul.f32 0.2, %v553_v8  ;;  %v802_v11 = vmul.f32 0.2, %v681_v9 }
 0x117   : > { %v836_v14 = vmax.f32 %v1702_v4, %v772_v6  ;;  %v868_v15 = vmax.f32 %v1734_v5, %v804_v7 }
 0x118   : > { %v834_v18 = vmax.f32 %v553_v8, %v770_v10  ;;  %v866_v19 = vmax.f32 %v681_v9, %v802_v11 }
 0x119   : > { %v1478_v20 = vpack.c.bf16 %v836_v14, %v835_v12  ;;  %v1558_v21 = vpack.c.bf16 %v868_v15, %v867_v13  ;;  %v1705_v24 = vpop.f32.mrb[16].mxu0  ;;  %v1737_v25 = vpop.f32.mrb[16].mxu1 }
 0x11a   : > { %v1473_v22 = vpack.c.bf16 %v834_v18, %v833_v16  ;;  %v1553_v23 = vpack.c.bf16 %v866_v19, %v865_v17  ;;  %v775_v26 = vmul.f32 0.2, %v1705_v24  ;;  %v807_v27 = vmul.f32 0.2, %v1737_v25  ;;  %v566_v28 = vpop.f32.mrb[17].mxu0  ;;  %v694_v29 = vpop.f32.mrb[17].mxu1 }
 0x11b   : > { %1606 = vst [vmem:[%s1917_s6 + $0x38] sm:$0xff] %v1478_v20   ;;  %1622 = vst [vmem:[%s1917_s6 + $0xb8] sm:$0xff] %v1558_v21   ;;  %v773_v30 = vmul.f32 0.2, %v566_v28  ;;  %v805_v31 = vmul.f32 0.2, %v694_v29 }
 0x11c   : > { %1605 = vst [vmem:[%s1917_s6 + $0x30] sm:$0xff] %v1473_v22   ;;  %1621 = vst [vmem:[%s1917_s6 + $0xb0] sm:$0xff] %v1553_v23   ;;  %v1706_v32 = vpop.f32.mrb[18].mxu0  ;;  %v1738_v33 = vpop.f32.mrb[18].mxu1  ;;  %v839_v40 = vmax.f32 %v1705_v24, %v775_v26  ;;  %v871_v41 = vmax.f32 %v1737_v25, %v807_v27 }
 0x11d   : > { %v776_v34 = vmul.f32 0.2, %v1706_v32  ;;  %v808_v35 = vmul.f32 0.2, %v1738_v33  ;;  %v569_v36 = vpop.f32.mrb[19].mxu0  ;;  %v697_v37 = vpop.f32.mrb[19].mxu1  ;;  %v837_v44 = vmax.f32 %v566_v28, %v773_v30  ;;  %v869_v45 = vmax.f32 %v694_v29, %v805_v31 }
 0x11e   : > { %v774_v38 = vmul.f32 0.2, %v569_v36  ;;  %v806_v39 = vmul.f32 0.2, %v697_v37 }
 0x11f   : > { %v840_v42 = vmax.f32 %v1706_v32, %v776_v34  ;;  %v872_v43 = vmax.f32 %v1738_v33, %v808_v35 }
 0x120   : > { %v838_v46 = vmax.f32 %v569_v36, %v774_v38  ;;  %v870_v47 = vmax.f32 %v697_v37, %v806_v39 }
 0x121   : > { %v1488_v48 = vpack.c.bf16 %v840_v42, %v839_v40  ;;  %v1568_v49 = vpack.c.bf16 %v872_v43, %v871_v41  ;;  %v1709_v52 = vpop.f32.mrb[20].mxu0  ;;  %v1741_v53 = vpop.f32.mrb[20].mxu1 }
 0x122   : > { %v1483_v50 = vpack.c.bf16 %v838_v46, %v837_v44  ;;  %v1563_v51 = vpack.c.bf16 %v870_v47, %v869_v45  ;;  %v779_v54 = vmul.f32 0.2, %v1709_v52  ;;  %v811_v55 = vmul.f32 0.2, %v1741_v53  ;;  %v582_v56 = vpop.f32.mrb[21].mxu0  ;;  %v710_v57 = vpop.f32.mrb[21].mxu1 }
 0x123   : > { %1608 = vst [vmem:[%s1917_s6 + $0x48] sm:$0xff] %v1488_v48   ;;  %1624 = vst [vmem:[%s1917_s6 + $0xc8] sm:$0xff] %v1568_v49   ;;  %v777_v58 = vmul.f32 0.2, %v582_v56  ;;  %v809_v59 = vmul.f32 0.2, %v710_v57 }
 0x124   : > { %1607 = vst [vmem:[%s1917_s6 + $0x40] sm:$0xff] %v1483_v50   ;;  %1623 = vst [vmem:[%s1917_s6 + $0xc0] sm:$0xff] %v1563_v51   ;;  %v1710_v60 = vpop.f32.mrb[22].mxu0  ;;  %v1742_v61 = vpop.f32.mrb[22].mxu1  ;;  %v843_v4 = vmax.f32 %v1709_v52, %v779_v54  ;;  %v875_v5 = vmax.f32 %v1741_v53, %v811_v55 }
 0x125   : > { %v780_v62 = vmul.f32 0.2, %v1710_v60  ;;  %v812_v63 = vmul.f32 0.2, %v1742_v61  ;;  %v585_v0 = vpop.f32.mrb[23].mxu0  ;;  %v713_v1 = vpop.f32.mrb[23].mxu1  ;;  %v841_v8 = vmax.f32 %v582_v56, %v777_v58  ;;  %v873_v9 = vmax.f32 %v710_v57, %v809_v59 }
 0x126   : > { %v778_v2 = vmul.f32 0.2, %v585_v0  ;;  %v810_v3 = vmul.f32 0.2, %v713_v1 }
 0x127   : > { %v844_v6 = vmax.f32 %v1710_v60, %v780_v62  ;;  %v876_v7 = vmax.f32 %v1742_v61, %v812_v63 }
 0x128   : > { %v842_v10 = vmax.f32 %v585_v0, %v778_v2  ;;  %v874_v11 = vmax.f32 %v713_v1, %v810_v3 }
 0x129   : > { %v1498_v12 = vpack.c.bf16 %v844_v6, %v843_v4  ;;  %v1578_v13 = vpack.c.bf16 %v876_v7, %v875_v5  ;;  %v1713_v16 = vpop.f32.mrb[24].mxu0  ;;  %v1745_v17 = vpop.f32.mrb[24].mxu1 }
 0x12a   : > { %v1493_v14 = vpack.c.bf16 %v842_v10, %v841_v8  ;;  %v1573_v15 = vpack.c.bf16 %v874_v11, %v873_v9  ;;  %v783_v18 = vmul.f32 0.2, %v1713_v16  ;;  %v815_v19 = vmul.f32 0.2, %v1745_v17  ;;  %v598_v20 = vpop.f32.mrb[25].mxu0  ;;  %v726_v21 = vpop.f32.mrb[25].mxu1 }
 0x12b   : > { %1610 = vst [vmem:[%s1917_s6 + $0x58] sm:$0xff] %v1498_v12   ;;  %1626 = vst [vmem:[%s1917_s6 + $0xd8] sm:$0xff] %v1578_v13   ;;  %v781_v22 = vmul.f32 0.2, %v598_v20  ;;  %v813_v23 = vmul.f32 0.2, %v726_v21 }
 0x12c   : > { %1609 = vst [vmem:[%s1917_s6 + $0x50] sm:$0xff] %v1493_v14   ;;  %1625 = vst [vmem:[%s1917_s6 + $0xd0] sm:$0xff] %v1573_v15   ;;  %v1714_v24 = vpop.f32.mrb[26].mxu0  ;;  %v1746_v25 = vpop.f32.mrb[26].mxu1  ;;  %v847_v32 = vmax.f32 %v1713_v16, %v783_v18  ;;  %v879_v33 = vmax.f32 %v1745_v17, %v815_v19 }
 0x12d   : > { %v784_v26 = vmul.f32 0.2, %v1714_v24  ;;  %v816_v27 = vmul.f32 0.2, %v1746_v25  ;;  %v601_v28 = vpop.f32.mrb[27].mxu0  ;;  %v729_v29 = vpop.f32.mrb[27].mxu1  ;;  %v845_v36 = vmax.f32 %v598_v20, %v781_v22  ;;  %v877_v37 = vmax.f32 %v726_v21, %v813_v23 }
 0x12e   : > { %v782_v30 = vmul.f32 0.2, %v601_v28  ;;  %v814_v31 = vmul.f32 0.2, %v729_v29 }
 0x12f   : > { %v848_v34 = vmax.f32 %v1714_v24, %v784_v26  ;;  %v880_v35 = vmax.f32 %v1746_v25, %v816_v27 }
 0x130   : > { %v846_v38 = vmax.f32 %v601_v28, %v782_v30  ;;  %v878_v39 = vmax.f32 %v729_v29, %v814_v31 }
 0x131   : > { %v1508_v40 = vpack.c.bf16 %v848_v34, %v847_v32  ;;  %v1588_v41 = vpack.c.bf16 %v880_v35, %v879_v33  ;;  %v1717_v44 = vpop.f32.mrb[28].mxu0  ;;  %v1749_v45 = vpop.f32.mrb[28].mxu1 }
 0x132   : > { %v1503_v42 = vpack.c.bf16 %v846_v38, %v845_v36  ;;  %v1583_v43 = vpack.c.bf16 %v878_v39, %v877_v37  ;;  %v787_v46 = vmul.f32 0.2, %v1717_v44  ;;  %v819_v47 = vmul.f32 0.2, %v1749_v45  ;;  %v614_v48 = vpop.f32.mrb[29].mxu0  ;;  %v742_v49 = vpop.f32.mrb[29].mxu1 }
 0x133   : > { %1612 = vst [vmem:[%s1917_s6 + $0x68] sm:$0xff] %v1508_v40   ;;  %1628 = vst [vmem:[%s1917_s6 + $0xe8] sm:$0xff] %v1588_v41   ;;  %v785_v50 = vmul.f32 0.2, %v614_v48  ;;  %v817_v51 = vmul.f32 0.2, %v742_v49 }
 0x134   : > { %1611 = vst [vmem:[%s1917_s6 + $0x60] sm:$0xff] %v1503_v42   ;;  %1627 = vst [vmem:[%s1917_s6 + $0xe0] sm:$0xff] %v1583_v43   ;;  %v1718_v52 = vpop.f32.mrb[30].mxu0  ;;  %v1750_v53 = vpop.f32.mrb[30].mxu1  ;;  %v851_v60 = vmax.f32 %v1717_v44, %v787_v46  ;;  %v883_v61 = vmax.f32 %v1749_v45, %v819_v47 }
 0x135   : > { %v788_v54 = vmul.f32 0.2, %v1718_v52  ;;  %v820_v55 = vmul.f32 0.2, %v1750_v53  ;;  %v617_v56 = vpop.f32.mrb[31].mxu0  ;;  %v745_v57 = vpop.f32.mrb[31].mxu1  ;;  %v849_v0 = vmax.f32 %v614_v48, %v785_v50  ;;  %v881_v1 = vmax.f32 %v742_v49, %v817_v51 }
 0x136   : > { %v786_v58 = vmul.f32 0.2, %v617_v56  ;;  %v818_v59 = vmul.f32 0.2, %v745_v57 }
 0x137   : > { %v852_v62 = vmax.f32 %v1718_v52, %v788_v54  ;;  %v884_v63 = vmax.f32 %v1750_v53, %v820_v55 }
 0x138   : > { %v850_v2 = vmax.f32 %v617_v56, %v786_v58  ;;  %v882_v3 = vmax.f32 %v745_v57, %v818_v59 }
 0x139   : > { %v1518_v4 = vpack.c.bf16 %v852_v62, %v851_v60  ;;  %v1598_v5 = vpack.c.bf16 %v884_v63, %v883_v61 }
 0x13a   : > { %v1513_v6 = vpack.c.bf16 %v850_v2, %v849_v0  ;;  %v1593_v7 = vpack.c.bf16 %v882_v3, %v881_v1 }
 0x13b   : > { %1614 = vst [vmem:[%s1917_s6 + $0x78] sm:$0xff] %v1518_v4   ;;  %1630 = vst [vmem:[%s1917_s6 + $0xf8] sm:$0xff] %v1598_v5  }
 0x13c   : > { %1613 = vst [vmem:[%s1917_s6 + $0x70] sm:$0xff] %v1513_v6   ;;  %1629 = vst [vmem:[%s1917_s6 + $0xf0] sm:$0xff] %v1593_v7  }
 0x13d PF: > { %s12_s9 = sadd.s32 1, %s1821_s9  }
 0x13e   : > { %p9_p4 = scmp.ge.s32.totalorder %s12_s9, 6  }
 0x140   :  { %11 = sbr.rel (!%p9_p4) target bundleno = 1 (0x1), region = 58 }

// kernel: discriminator_forward.6
= control target key start
LH: loop header
LB: loop body
LE: loop exit
PB: predicated region body
PF: predicated region fallthrough
CT: control target
= control target key end

     0   :  { %s4058_s1 = inlined_call_operand.vmem [shape: bf16[128,128], index: 1, kind: input, shape index: {}]   ;;  %s4059_s0 = inlined_call_operand.vmem [shape: bf16[512,128], index: 0, kind: input, shape index: {}]   ;;  %s4060_s2 = inlined_call_operand.vmem [shape: f32[1,128], index: 2, kind: input, shape index: {}]   ;;  %s4061_s3 = inlined_call_operand.vmem [shape: f32[1,128], index: 3, kind: input, shape index: {}]   ;;  %s4062_s4 = inlined_call_operand.vmem [shape: bf16[512,128], index: 4, kind: output, shape index: {}]  }
   0x1   :  { %v2052_v0 = vld [vmem:[%s4058_s1] sm:$0xff]   ;;  %v2053_v1 = vld [vmem:[%s4058_s1 + $0x8] sm:$0xff]   ;;  %v2054_v2 = vld [vmem:[%s4058_s1 + $0x10] sm:$0xff]  }
   0x2   :  { %1956 = vmatprep.subr.bf16.mxu0 %v2052_v0  ;;  %2036 = vmatprep.subr.bf16.mxu1 %v2052_v0  ;;  %v2055_v3 = vld [vmem:[%s4058_s1 + $0x18] sm:$0xff]   ;;  %v2060_v4 = vld [vmem:[%s4059_s0] sm:$0xff]   ;;  %v2057_v6 = vld [vmem:[%s4058_s1 + $0x28] sm:$0xff]  }
   0x3   :  { %1957 = vmatpush3.bf16.msra.mxu0 %v2052_v0  ;;  %2044 = vmatpush3.bf16.msra.mxu1 %v2052_v0  ;;  %v2056_v5 = vld [vmem:[%s4058_s1 + $0x20] sm:$0xff]   ;;  %v2058_v7 = vld [vmem:[%s4058_s1 + $0x30] sm:$0xff]   ;;  %v2059_v8 = vld [vmem:[%s4058_s1 + $0x38] sm:$0xff]  }
   0x4   :  { %1958 = vmatprep.subr.bf16.mxu0 %v2053_v1  ;;  %2037 = vmatprep.subr.bf16.mxu1 %v2053_v1  ;;  %v2076_v9 = vld [vmem:[%s4059_s0 + $0x80] sm:$0xff]   ;;  %v2061_v10 = vld [vmem:[%s4059_s0 + $0x8] sm:$0xff]   ;;  %v2062_v11 = vld [vmem:[%s4059_s0 + $0x10] sm:$0xff]  }
   0x5   :  { %1972 = vmatprep.mubr.bf16.mxu0 %v2060_v4  ;;  %2004 = vmatprep.mubr.bf16.mxu1 %v2076_v9  ;;  %v2077_v12 = vld [vmem:[%s4059_s0 + $0x88] sm:$0xff]   ;;  %v2078_v13 = vld [vmem:[%s4059_s0 + $0x90] sm:$0xff]   ;;  %v2063_v14 = vld [vmem:[%s4059_s0 + $0x18] sm:$0xff]  }
   0x6   :  { %v2064_v15 = vld [vmem:[%s4059_s0 + $0x20] sm:$0xff]   ;;  %v2079_v16 = vld [vmem:[%s4059_s0 + $0x98] sm:$0xff]   ;;  %v2065_v18 = vld [vmem:[%s4059_s0 + $0x28] sm:$0xff]  }
   0x7   :  { %1959 = vmatpush3.bf16.msra.mxu0 %v2053_v1  ;;  %2045 = vmatpush3.bf16.msra.mxu1 %v2053_v1  ;;  %v2080_v17 = vld [vmem:[%s4059_s0 + $0xa0] sm:$0xff]   ;;  %v2081_v19 = vld [vmem:[%s4059_s0 + $0xa8] sm:$0xff]   ;;  %v2066_v20 = vld [vmem:[%s4059_s0 + $0x30] sm:$0xff]  }
   0x8   :  { %1960 = vmatprep.subr.bf16.mxu0 %v2054_v2  ;;  %2038 = vmatprep.subr.bf16.mxu1 %v2054_v2  ;;  %v2082_v21 = vld [vmem:[%s4059_s0 + $0xb0] sm:$0xff]   ;;  %v2067_v22 = vld [vmem:[%s4059_s0 + $0x38] sm:$0xff]   ;;  %v2068_v24 = vld [vmem:[%s4059_s0 + $0x40] sm:$0xff]  }
   0x9   :  { %v2083_v23 = vld [vmem:[%s4059_s0 + $0xb8] sm:$0xff]   ;;  %v2084_v25 = vld [vmem:[%s4059_s0 + $0xc0] sm:$0xff]   ;;  %v2069_v26 = vld [vmem:[%s4059_s0 + $0x48] sm:$0xff]  }
   0xa   :  { %v2085_v27 = vld [vmem:[%s4059_s0 + $0xc8] sm:$0xff]   ;;  %v2070_v28 = vld [vmem:[%s4059_s0 + $0x50] sm:$0xff]   ;;  %v2071_v30 = vld [vmem:[%s4059_s0 + $0x58] sm:$0xff]  }
   0xb   :  { %1961 = vmatpush3.bf16.msra.mxu0 %v2054_v2  ;;  %2046 = vmatpush3.bf16.msra.mxu1 %v2054_v2  ;;  %v2086_v29 = vld [vmem:[%s4059_s0 + $0xd0] sm:$0xff]   ;;  %v2087_v31 = vld [vmem:[%s4059_s0 + $0xd8] sm:$0xff]   ;;  %v2072_v32 = vld [vmem:[%s4059_s0 + $0x60] sm:$0xff]  }
   0xc   :  { %1962 = vmatprep.subr.bf16.mxu0 %v2055_v3  ;;  %2039 = vmatprep.subr.bf16.mxu1 %v2055_v3  ;;  %v2088_v33 = vld [vmem:[%s4059_s0 + $0xe0] sm:$0xff]   ;;  %v2073_v34 = vld [vmem:[%s4059_s0 + $0x68] sm:$0xff]   ;;  %v2074_v36 = vld [vmem:[%s4059_s0 + $0x70] sm:$0xff]  }
   0xd   :  { %v2089_v35 = vld [vmem:[%s4059_s0 + $0xe8] sm:$0xff]   ;;  %v2090_v37 = vld [vmem:[%s4059_s0 + $0xf0] sm:$0xff]   ;;  %v2075_v38 = vld [vmem:[%s4059_s0 + $0x78] sm:$0xff]  }
   0xe   :  { %v2091_v39 = vld [vmem:[%s4059_s0 + $0xf8] sm:$0xff]  }
   0xf   :  { %1963 = vmatpush3.bf16.msra.mxu0 %v2055_v3  ;;  %2047 = vmatpush3.bf16.msra.mxu1 %v2055_v3 }
  0x10   :  { %1964 = vmatprep.subr.bf16.mxu0 %v2056_v5  ;;  %2040 = vmatprep.subr.bf16.mxu1 %v2056_v5 }
  0x13   :  { %1965 = vmatpush3.bf16.msra.mxu0 %v2056_v5  ;;  %2048 = vmatpush3.bf16.msra.mxu1 %v2056_v5 }
  0x14   :  { %1966 = vmatprep.subr.bf16.mxu0 %v2057_v6  ;;  %2041 = vmatprep.subr.bf16.mxu1 %v2057_v6 }
  0x17   :  { %1967 = vmatpush3.bf16.msra.mxu0 %v2057_v6  ;;  %2049 = vmatpush3.bf16.msra.mxu1 %v2057_v6 }
  0x18   :  { %1968 = vmatprep.subr.bf16.mxu0 %v2058_v7  ;;  %2042 = vmatprep.subr.bf16.mxu1 %v2058_v7 }
  0x1b   :  { %1969 = vmatpush3.bf16.msra.mxu0 %v2058_v7  ;;  %2050 = vmatpush3.bf16.msra.mxu1 %v2058_v7 }
  0x1c   :  { %1970 = vmatprep.subr.bf16.mxu0 %v2059_v8  ;;  %2043 = vmatprep.subr.bf16.mxu1 %v2059_v8 }
  0x1f   :  { %1971 = vmatpush3.bf16.msra.mxu0 %v2059_v8  ;;  %2051 = vmatpush3.bf16.msra.mxu1 %v2059_v8 }
  0x22   :  { %1973 = vmatmul.mubr.bf16.vlgmr.msra.gmra.mrb[0].mxu0 %v2061_v10  ;;  %2005 = vmatmul.mubr.bf16.vlgmr.msra.gmra.mrb[0].mxu1 %v2077_v12 }
  0x23   :  { %1976 = vmatprep.mubr.bf16.mxu0 %v2062_v11  ;;  %2008 = vmatprep.mubr.bf16.mxu1 %v2078_v13 }
  0x2a   :  { %1977 = vmatmul.mubr.bf16.gmra.mrb[4].mxu0 %v2063_v14  ;;  %2009 = vmatmul.mubr.bf16.gmra.mrb[4].mxu1 %v2079_v16 }
  0x2b   :  { %1980 = vmatprep.mubr.bf16.mxu0 %v2064_v15  ;;  %2012 = vmatprep.mubr.bf16.mxu1 %v2080_v17 }
  0x32   :  { %1981 = vmatmul.mubr.bf16.gmra.mrb[8].mxu0 %v2065_v18  ;;  %2013 = vmatmul.mubr.bf16.gmra.mrb[8].mxu1 %v2081_v19 }
  0x33   :  { %1984 = vmatprep.mubr.bf16.mxu0 %v2066_v20  ;;  %2016 = vmatprep.mubr.bf16.mxu1 %v2082_v21 }
  0x3a   :  { %1985 = vmatmul.mubr.bf16.gmra.mrb[12].mxu0 %v2067_v22  ;;  %2017 = vmatmul.mubr.bf16.gmra.mrb[12].mxu1 %v2083_v23 }
  0x3b   :  { %1988 = vmatprep.mubr.bf16.mxu0 %v2068_v24  ;;  %2020 = vmatprep.mubr.bf16.mxu1 %v2084_v25 }
  0x42   :  { %1989 = vmatmul.mubr.bf16.gmra.mrb[16].mxu0 %v2069_v26  ;;  %2021 = vmatmul.mubr.bf16.gmra.mrb[16].mxu1 %v2085_v27 }
  0x43   :  { %1992 = vmatprep.mubr.bf16.mxu0 %v2070_v28  ;;  %2024 = vmatprep.mubr.bf16.mxu1 %v2086_v29 }
  0x4a   :  { %1993 = vmatmul.mubr.bf16.gmra.mrb[20].mxu0 %v2071_v30  ;;  %2025 = vmatmul.mubr.bf16.gmra.mrb[20].mxu1 %v2087_v31 }
  0x4b   :  { %1996 = vmatprep.mubr.bf16.mxu0 %v2072_v32  ;;  %2028 = vmatprep.mubr.bf16.mxu1 %v2088_v33 }
  0x52   :  { %1997 = vmatmul.mubr.bf16.gmra.mrb[24].mxu0 %v2073_v34  ;;  %2029 = vmatmul.mubr.bf16.gmra.mrb[24].mxu1 %v2089_v35 }
  0x53   :  { %2000 = vmatprep.mubr.bf16.mxu0 %v2074_v36  ;;  %2032 = vmatprep.mubr.bf16.mxu1 %v2090_v37 }
  0x5a   :  { %2001 = vmatmul.mubr.bf16.gmra.mrb[28].mxu0 %v2075_v38  ;;  %2033 = vmatmul.mubr.bf16.gmra.mrb[28].mxu1 %v2091_v39 }
  0xf5   :  { %v2239_v40 = vpop.f32.mrb[0].mxu0  ;;  %v2241_v41 = vpop.f32.mrb[0].mxu1 }
  0xf6   :  { %v2243_v42 = vpop.f32.mrb[1].mxu0  ;;  %v2245_v43 = vpop.f32.mrb[1].mxu1 }
  0xf7   :  { %v2247_v44 = vpop.f32.mrb[2].mxu0  ;;  %v2249_v45 = vpop.f32.mrb[2].mxu1 }
  0xf8   :  { %v2251_v46 = vpop.f32.mrb[3].mxu0  ;;  %v2253_v47 = vpop.f32.mrb[3].mxu1 }
  0xf9   :  { %v627_v48 = vadd.f32 %v2251_v46, %v2243_v42 }
  0xfb   :  { %v628_v49 = vadd.f32 %v2239_v40, %v627_v48 }
  0xfd   :  { %v2258_v50 = vpop.f32.mrb[4].mxu0  ;;  %v629_v51 = vadd.f32 %v2247_v44, %v628_v49  ;;  %v2261_v52 = vpop.f32.mrb[4].mxu1 }
  0xfe   :  { %v2263_v53 = vpop.f32.mrb[5].mxu0  ;;  %v2265_v54 = vpop.f32.mrb[5].mxu1 }
  0xff   :  { %v630_v55 = vadd.f32 %v629_v51, %v2263_v53  ;;  %v2268_v56 = vpop.f32.mrb[6].mxu0  ;;  %v2270_v57 = vpop.f32.mrb[6].mxu1 }
 0x100   :  { %v2272_v58 = vpop.f32.mrb[7].mxu0  ;;  %v2274_v59 = vpop.f32.mrb[7].mxu1 }
 0x101   :  { %v631_v60 = vadd.f32 %v630_v55, %v2272_v58 }
 0x103   :  { %v632_v61 = vadd.f32 %v2258_v50, %v631_v60 }
 0x105   :  { %v2278_v62 = vpop.f32.mrb[8].mxu0  ;;  %v633_v63 = vadd.f32 %v2268_v56, %v632_v61  ;;  %v2281_v0 = vpop.f32.mrb[8].mxu1 }
 0x106   :  { %v2283_v1 = vpop.f32.mrb[9].mxu0  ;;  %v2285_v2 = vpop.f32.mrb[9].mxu1 }
 0x107   :  { %v634_v3 = vadd.f32 %v633_v63, %v2283_v1  ;;  %v2288_v4 = vpop.f32.mrb[10].mxu0  ;;  %v2290_v5 = vpop.f32.mrb[10].mxu1 }
 0x108   :  { %v2292_v6 = vpop.f32.mrb[11].mxu0  ;;  %v2294_v7 = vpop.f32.mrb[11].mxu1 }
 0x109   :  { %v635_v8 = vadd.f32 %v634_v3, %v2292_v6 }
 0x10b   :  { %v636_v9 = vadd.f32 %v2278_v62, %v635_v8 }
 0x10d   :  { %v2298_v10 = vpop.f32.mrb[12].mxu0  ;;  %v637_v11 = vadd.f32 %v2288_v4, %v636_v9  ;;  %v2301_v12 = vpop.f32.mrb[12].mxu1 }
 0x10e   :  { %v2303_v13 = vpop.f32.mrb[13].mxu0  ;;  %v2305_v14 = vpop.f32.mrb[13].mxu1 }
 0x10f   :  { %v638_v15 = vadd.f32 %v637_v11, %v2303_v13  ;;  %v2308_v16 = vpop.f32.mrb[14].mxu0  ;;  %v2310_v17 = vpop.f32.mrb[14].mxu1 }
 0x110   :  { %v2312_v18 = vpop.f32.mrb[15].mxu0  ;;  %v2314_v19 = vpop.f32.mrb[15].mxu1 }
 0x111   :  { %v639_v20 = vadd.f32 %v638_v15, %v2312_v18 }
 0x113   :  { %v640_v21 = vadd.f32 %v2298_v10, %v639_v20 }
 0x115   :  { %v2318_v22 = vpop.f32.mrb[16].mxu0  ;;  %v641_v23 = vadd.f32 %v2308_v16, %v640_v21  ;;  %v2321_v24 = vpop.f32.mrb[16].mxu1 }
 0x116   :  { %4165 = vst [vmem:[#allocation2_spill] sm:$0xff] %v2318_v22  ;;  %v2323_v25 = vpop.f32.mrb[17].mxu0  ;;  %v2325_v26 = vpop.f32.mrb[17].mxu1 }
 0x117   :  { %v642_v27 = vadd.f32 %v641_v23, %v2323_v25  ;;  %v2328_v28 = vpop.f32.mrb[18].mxu0  ;;  %v2330_v29 = vpop.f32.mrb[18].mxu1 }
 0x118   :  { %4166 = vst [vmem:[#allocation3_spill] sm:$0xff] %v2328_v28  ;;  %v2332_v30 = vpop.f32.mrb[19].mxu0  ;;  %v2334_v31 = vpop.f32.mrb[19].mxu1 }
 0x119   :  { %v643_v32 = vadd.f32 %v642_v27, %v2332_v30 }
 0x11b   :  { %v644_v33 = vadd.f32 %v2318_v22, %v643_v32 }
 0x11d   :  { %v2338_v34 = vpop.f32.mrb[20].mxu0  ;;  %v645_v35 = vadd.f32 %v2328_v28, %v644_v33  ;;  %v2341_v36 = vpop.f32.mrb[20].mxu1 }
 0x11e   :  { %4167 = vst [vmem:[#allocation4_spill] sm:$0xff] %v2338_v34  ;;  %4168 = vst [vmem:[#allocation5_spill] sm:$0xff] %v2341_v36  ;;  %v2343_v37 = vpop.f32.mrb[21].mxu0  ;;  %v2345_v38 = vpop.f32.mrb[21].mxu1 }
 0x11f   :  { %4169 = vst [vmem:[#allocation6_spill] sm:$0xff] %v2343_v37  ;;  %v646_v39 = vadd.f32 %v645_v35, %v2343_v37  ;;  %v2348_v48 = vpop.f32.mrb[22].mxu0  ;;  %v2350_v49 = vpop.f32.mrb[22].mxu1 }
 0x120   :  { %4170 = vst [vmem:[#allocation7_spill] sm:$0xff] %v2348_v48  ;;  %4171 = vst [vmem:[#allocation8_spill] sm:$0xff] %v2350_v49  ;;  %v2352_v51 = vpop.f32.mrb[23].mxu0  ;;  %v2354_v55 = vpop.f32.mrb[23].mxu1 }
 0x121   :  { %4172 = vst [vmem:[#allocation9_spill] sm:$0xff] %v2352_v51  ;;  %4173 = vst [vmem:[#allocation10_spill] sm:$0xff] %v2354_v55  ;;  %v647_v60 = vadd.f32 %v646_v39, %v2352_v51 }
 0x123   :  { %v648_v61 = vadd.f32 %v2338_v34, %v647_v60 }
 0x125   :  { %v2358_v63 = vpop.f32.mrb[24].mxu0  ;;  %v649_v3 = vadd.f32 %v2348_v48, %v648_v61  ;;  %v2361_v8 = vpop.f32.mrb[24].mxu1 }
 0x126   :  { %4174 = vst [vmem:[#allocation11_spill] sm:$0xff] %v2358_v63  ;;  %v2363_v9 = vpop.f32.mrb[25].mxu0  ;;  %v2365_v11 = vpop.f32.mrb[25].mxu1 }
 0x127   :  { %4175 = vst [vmem:[#allocation12_spill] sm:$0xff] %v2363_v9  ;;  %4176 = vst [vmem:[#allocation13_spill] sm:$0xff] %v2365_v11  ;;  %v650_v15 = vadd.f32 %v649_v3, %v2363_v9  ;;  %v2368_v20 = vpop.f32.mrb[26].mxu0  ;;  %v2370_v21 = vpop.f32.mrb[26].mxu1 }
 0x128   :  { %4177 = vst [vmem:[#allocation14_spill] sm:$0xff] %v2368_v20  ;;  %v2372_v23 = vpop.f32.mrb[27].mxu0  ;;  %v2374_v27 = vpop.f32.mrb[27].mxu1 }
 0x129   :  { %4178 = vst [vmem:[#allocation15_spill] sm:$0xff] %v2372_v23  ;;  %v651_v32 = vadd.f32 %v650_v15, %v2372_v23 }
 0x12b   :  { %v652_v33 = vadd.f32 %v2358_v63, %v651_v32 }
 0x12d   :  { %v2378_v35 = vpop.f32.mrb[28].mxu0  ;;  %v653_v39 = vadd.f32 %v2368_v20, %v652_v33  ;;  %v2381_v60 = vpop.f32.mrb[28].mxu1 }
 0x12e   :  { %v2383_v61 = vpop.f32.mrb[29].mxu0  ;;  %v2385_v3 = vpop.f32.mrb[29].mxu1 }
 0x12f   :  { %4179 = vst [vmem:[#allocation16_spill] sm:$0xff] %v2383_v61  ;;  %v654_v9 = vadd.f32 %v653_v39, %v2383_v61  ;;  %v2388_v48 = vpop.f32.mrb[30].mxu0  ;;  %v2390_v34 = vpop.f32.mrb[30].mxu1 }
 0x130   :  { %v2392_v51 = vpop.f32.mrb[31].mxu0  ;;  %v2394_v15 = vpop.f32.mrb[31].mxu1 }
 0x131   :  { %v655_v32 = vadd.f32 %v654_v9, %v2392_v51 }
 0x133   :  { %v656_v33 = vadd.f32 %v2378_v35, %v655_v32 }
 0x135   :  { %v657_v20 = vadd.f32 %v2388_v48, %v656_v33 }
 0x137   :  { %v658_v63 = vadd.f32 %v657_v20, %v2245_v43 }
 0x139   :  { %v659_v23 = vadd.f32 %v658_v63, %v2253_v47 }
 0x13b   :  { %v660_v39 = vadd.f32 %v2241_v41, %v659_v23 }
 0x13d   :  { %v661_v61 = vadd.f32 %v2249_v45, %v660_v39 }
 0x13f   :  { %v662_v37 = vadd.f32 %v661_v61, %v2265_v54 }
 0x141   :  { %v663_v28 = vadd.f32 %v662_v37, %v2274_v59 }
 0x143   :  { %v664_v22 = vadd.f32 %v2261_v52, %v663_v28 }
 0x145   :  { %v665_v9 = vadd.f32 %v2270_v57, %v664_v22 }
 0x147   :  { %v666_v32 = vadd.f32 %v665_v9, %v2285_v2 }
 0x149   :  { %v667_v33 = vadd.f32 %v666_v32, %v2294_v7 }
 0x14b   :  { %v668_v20 = vadd.f32 %v2281_v0, %v667_v33 }
 0x14d   :  { %v669_v63 = vadd.f32 %v2290_v5, %v668_v20 }
 0x14f   :  { %v670_v23 = vadd.f32 %v669_v63, %v2305_v14 }
 0x151   :  { %v671_v39 = vadd.f32 %v670_v23, %v2314_v19 }
 0x153   :  { %v672_v61 = vadd.f32 %v2301_v12, %v671_v39 }
 0x155   :  { %v673_v37 = vadd.f32 %v2310_v17, %v672_v61 }
 0x157   :  { %v674_v28 = vadd.f32 %v673_v37, %v2325_v26 }
 0x159   :  { %v675_v22 = vadd.f32 %v674_v28, %v2334_v31 }
 0x15b   :  { %v676_v9 = vadd.f32 %v2321_v24, %v675_v22 }
 0x15d   :  { %v677_v32 = vadd.f32 %v2330_v29, %v676_v9 }
 0x15f   :  { %v678_v33 = vadd.f32 %v677_v32, %v2345_v38 }
 0x161   :  { %v679_v20 = vadd.f32 %v678_v33, %v2354_v55 }
 0x163   :  { %v680_v63 = vadd.f32 %v2341_v36, %v679_v20 }
 0x165   :  { %v681_v23 = vadd.f32 %v2350_v49, %v680_v63 }
 0x167   :  { %v682_v39 = vadd.f32 %v681_v23, %v2365_v11 }
 0x169   :  { %v683_v61 = vadd.f32 %v682_v39, %v2374_v27 }
 0x16b   :  { %v684_v37 = vadd.f32 %v2361_v8, %v683_v61 }
 0x16d   :  { %v685_v28 = vadd.f32 %v2370_v21, %v684_v37 }
 0x16f   :  { %v686_v22 = vadd.f32 %v685_v28, %v2385_v3  ;;  %v4186_v28 = vld [vmem:[#allocation3_spill] sm:$0xff] }
 0x171   :  { %v687_v9 = vadd.f32 %v686_v22, %v2394_v15  ;;  %v4187_v22 = vld [vmem:[#allocation6_spill] sm:$0xff] }
 0x173   :  { %v688_v32 = vadd.f32 %v2381_v60, %v687_v9  ;;  %v4188_v9 = vld [vmem:[#allocation9_spill] sm:$0xff] }
 0x175   :  { %v689_v33 = vadd.f32 %v2390_v34, %v688_v32  ;;  %v4190_v32 = vld [vmem:[#allocation4_spill] sm:$0xff] }
 0x177   :  { %v690_v55 = vrot.slane %v689_v33, 4 }
 0x179   :  { %v691_v20 = vadd.f32 %v690_v55, %v689_v33  ;;  %v4192_v33 = vld [vmem:[#allocation7_spill] sm:$0xff] }
 0x17b   :  { %v692_v36 = vrot.slane %v691_v20, 2 }
 0x17d   :  { %v693_v63 = vadd.f32 %v692_v36, %v691_v20 }
 0x17f   :  { %v694_v49 = vrot.slane %v693_v63, 1 }
 0x181   :  { %v695_v23 = vadd.f32 %v694_v49, %v693_v63  ;;  %v4185_v49 = vld [vmem:[#allocation2_spill] sm:$0xff]  ;;  %v4193_v63 = vld [vmem:[#allocation12_spill] sm:$0xff] }
 0x183   :  { %v2431_v11 = vmul.f32 0.001953125, %v695_v23 }
 0x185   :  { %v2435_v39 = vsub.f32 %v2243_v42, %v2431_v11  ;;  %v2439_v61 = vsub.f32 %v2251_v46, %v2431_v11  ;;  %v2443_v37 = vsub.f32 %v2239_v40, %v2431_v11  ;;  %v2447_v55 = vsub.f32 %v2247_v44, %v2431_v11 }
 0x186   :  { %v2451_v36 = vsub.f32 %v2263_v53, %v2431_v11  ;;  %v2455_v42 = vsub.f32 %v2272_v58, %v2431_v11  ;;  %v2459_v46 = vsub.f32 %v2258_v50, %v2431_v11  ;;  %v2463_v40 = vsub.f32 %v2268_v56, %v2431_v11 }
 0x187   :  { %4180 = vst [vmem:[#allocation17_spill] sm:$0xff] %v2435_v39  ;;  %4181 = vst [vmem:[#allocation18_spill] sm:$0xff] %v2439_v61  ;;  %v2467_v44 = vsub.f32 %v2283_v1, %v2431_v11  ;;  %v2471_v53 = vsub.f32 %v2292_v6, %v2431_v11  ;;  %v2475_v58 = vsub.f32 %v2278_v62, %v2431_v11 }
 0x188   :  { %4182 = vst [vmem:[#allocation19_spill] sm:$0xff] %v2443_v37  ;;  %v2479_v50 = vsub.f32 %v2288_v4, %v2431_v11  ;;  %v2483_v56 = vsub.f32 %v2303_v13, %v2431_v11  ;;  %v2487_v1 = vsub.f32 %v2312_v18, %v2431_v11  ;;  %v2491_v6 = vsub.f32 %v2298_v10, %v2431_v11 }
 0x189   :  { %v2495_v62 = vsub.f32 %v2308_v16, %v2431_v11  ;;  %v2499_v4 = vsub.f32 %v2323_v25, %v2431_v11  ;;  %v2503_v13 = vsub.f32 %v2332_v30, %v2431_v11  ;;  %v2507_v18 = vsub.f32 %v4185_v49, %v2431_v11  ;;  %v4194_v49 = vld [vmem:[#allocation15_spill] sm:$0xff] }
 0x18a   :  { %v2511_v10 = vsub.f32 %v4186_v28, %v2431_v11  ;;  %v2515_v16 = vsub.f32 %v4187_v22, %v2431_v11  ;;  %v2519_v25 = vsub.f32 %v4188_v9, %v2431_v11  ;;  %v2523_v30 = vsub.f32 %v4190_v32, %v2431_v11  ;;  %v4195_v22 = vld [vmem:[#allocation11_spill] sm:$0xff] }
 0x18b   :  { %4183 = vst [vmem:[#allocation20_spill] sm:$0xff] %v2499_v4  ;;  %4184 = vst [vmem:[#allocation21_spill] sm:$0xff] %v2503_v13  ;;  %v2527_v20 = vsub.f32 %v4192_v33, %v2431_v11  ;;  %v2531_v23 = vsub.f32 %v4193_v63, %v2431_v11  ;;  %v2535_v28 = vsub.f32 %v4194_v49, %v2431_v11 }
 0x18c   :  { %4189 = vst [vmem:[#allocation2_spill] sm:$0xff] %v2519_v25  ;;  %4191 = vst [vmem:[#allocation3_spill] sm:$0xff] %v2523_v30  ;;  %v2539_v9 = vsub.f32 %v4195_v22, %v2431_v11  ;;  %v4196_v25 = vld [vmem:[#allocation14_spill] sm:$0xff]  ;;  %v4197_v30 = vld [vmem:[#allocation16_spill] sm:$0xff]  ;;  %v2551_v63 = vsub.f32 %v2392_v51, %v2431_v11  ;;  %v2555_v49 = vsub.f32 %v2378_v35, %v2431_v11 }
 0x18d   :  { %v2543_v32 = vsub.f32 %v4196_v25, %v2431_v11  ;;  %v2547_v33 = vsub.f32 %v4197_v30, %v2431_v11  ;;  %v2559_v22 = vsub.f32 %v2388_v48, %v2431_v11  ;;  %v2563_v25 = vsub.f32 %v2245_v43, %v2431_v11 }
 0x18e   :  { %v2567_v30 = vsub.f32 %v2253_v47, %v2431_v11  ;;  %v2571_v51 = vsub.f32 %v2241_v41, %v2431_v11  ;;  %v2575_v35 = vsub.f32 %v2249_v45, %v2431_v11  ;;  %v2579_v48 = vsub.f32 %v2265_v54, %v2431_v11 }
 0x18f   :  { %v2583_v43 = vsub.f32 %v2274_v59, %v2431_v11  ;;  %v2587_v47 = vsub.f32 %v2261_v52, %v2431_v11  ;;  %v2591_v41 = vsub.f32 %v2270_v57, %v2431_v11  ;;  %v2595_v45 = vsub.f32 %v2285_v2, %v2431_v11 }
 0x190   :  { %v2599_v54 = vsub.f32 %v2294_v7, %v2431_v11  ;;  %v2603_v59 = vsub.f32 %v2281_v0, %v2431_v11  ;;  %v2607_v52 = vsub.f32 %v2290_v5, %v2431_v11  ;;  %v2611_v57 = vsub.f32 %v2305_v14, %v2431_v11 }
 0x191   :  { %v2615_v2 = vsub.f32 %v2314_v19, %v2431_v11  ;;  %v2619_v7 = vsub.f32 %v2301_v12, %v2431_v11  ;;  %v2623_v0 = vsub.f32 %v2310_v17, %v2431_v11  ;;  %v2627_v5 = vsub.f32 %v2325_v26, %v2431_v11 }
 0x192   :  { %4198 = vst [vmem:[#allocation6_spill] sm:$0xff] %v2603_v59  ;;  %4199 = vst [vmem:[#allocation9_spill] sm:$0xff] %v2607_v52  ;;  %v2631_v14 = vsub.f32 %v2334_v31, %v2431_v11  ;;  %v2635_v19 = vsub.f32 %v2321_v24, %v2431_v11  ;;  %v2639_v12 = vsub.f32 %v2330_v29, %v2431_v11 }
 0x193   :  { %4200 = vst [vmem:[#allocation4_spill] sm:$0xff] %v2611_v57  ;;  %4201 = vst [vmem:[#allocation7_spill] sm:$0xff] %v2615_v2  ;;  %v2643_v17 = vsub.f32 %v2345_v38, %v2431_v11  ;;  %v2663_v38 = vsub.f32 %v2374_v27, %v2431_v11  ;;  %v2683_v27 = vsub.f32 %v2381_v60, %v2431_v11 }
 0x194   :  { %4202 = vst [vmem:[#allocation12_spill] sm:$0xff] %v2623_v0  ;;  %4203 = vst [vmem:[#allocation15_spill] sm:$0xff] %v2627_v5  ;;  %v4206_v0 = vld [vmem:[#allocation10_spill] sm:$0xff]  ;;  %v4207_v5 = vld [vmem:[#allocation5_spill] sm:$0xff]  ;;  %v765_v60 = vmul.f32 %v2451_v36, %v2451_v36 }
 0x195   :  { %4204 = vst [vmem:[#allocation11_spill] sm:$0xff] %v2631_v14  ;;  %4205 = vst [vmem:[#allocation14_spill] sm:$0xff] %v2635_v19  ;;  %v2647_v26 = vsub.f32 %v4206_v0, %v2431_v11  ;;  %v2651_v31 = vsub.f32 %v4207_v5, %v2431_v11  ;;  %v4208_v14 = vld [vmem:[#allocation8_spill] sm:$0xff]  ;;  %v4210_v19 = vld [vmem:[#allocation13_spill] sm:$0xff]  ;;  %v2667_v0 = vsub.f32 %v2361_v8, %v2431_v11 }
 0x196   :  { %v2655_v24 = vsub.f32 %v4208_v14, %v2431_v11  ;;  %v2659_v29 = vsub.f32 %v4210_v19, %v2431_v11  ;;  %4212 = vst [vmem:[#allocation5_spill] sm:$0xff] %v2663_v38  ;;  %v2671_v5 = vsub.f32 %v2370_v21, %v2431_v11  ;;  %v2675_v14 = vsub.f32 %v2385_v3, %v2431_v11 }
 0x197   :  { %4213 = vst [vmem:[#allocation8_spill] sm:$0xff] %v2667_v0  ;;  %v2679_v19 = vsub.f32 %v2394_v15, %v2431_v11  ;;  %4217 = vst [vmem:[#allocation24_spill] sm:$0xff] %v2683_v27  ;;  %v2687_v8 = vsub.f32 %v2390_v34, %v2431_v11  ;;  %v761_v21 = vmul.f32 %v2435_v39, %v2435_v39 }
 0x198   :  { %4209 = vst [vmem:[#allocation16_spill] sm:$0xff] %v2655_v24  ;;  %4211 = vst [vmem:[#allocation10_spill] sm:$0xff] %v2659_v29  ;;  %v763_v3 = vmul.f32 %v2443_v37, %v2443_v37  ;;  %v764_v15 = vmul.f32 %v2447_v55, %v2447_v55  ;;  %v766_v34 = vmul.f32 %v2455_v42, %v2455_v42 }
 0x199   :  { %4214 = vst [vmem:[#allocation13_spill] sm:$0xff] %v2671_v5  ;;  %4215 = vst [vmem:[#allocation22_spill] sm:$0xff] %v2675_v14  ;;  %v762_v5 = vmul.f32 %v2439_v61, %v2439_v61  ;;  %v767_v39 = vmul.f32 %v2459_v46, %v2459_v46  ;;  %v768_v37 = vmul.f32 %v2463_v40, %v2463_v40 }
 0x19a   :  { %4216 = vst [vmem:[#allocation23_spill] sm:$0xff] %v2679_v19 }
 0x19b   :  { %v825_v14 = vadd.f32 %v762_v5, %v761_v21  ;;  %v769_v21 = vmul.f32 %v2467_v44, %v2467_v44 }
 0x19d   :  { %v826_v19 = vadd.f32 %v825_v14, %v763_v3  ;;  %v770_v3 = vmul.f32 %v2471_v53, %v2471_v53 }
 0x19f   :  { %v827_v27 = vadd.f32 %v826_v19, %v764_v15  ;;  %v771_v15 = vmul.f32 %v2475_v58, %v2475_v58 }
 0x1a1   :  { %v828_v11 = vadd.f32 %v827_v27, %v765_v60  ;;  %v772_v60 = vmul.f32 %v2479_v50, %v2479_v50 }
 0x1a3   :  { %v829_v61 = vadd.f32 %v828_v11, %v766_v34  ;;  %v773_v11 = vmul.f32 %v2483_v56, %v2483_v56 }
 0x1a5   :  { %v830_v5 = vadd.f32 %v829_v61, %v767_v39  ;;  %v774_v61 = vmul.f32 %v2487_v1, %v2487_v1 }
 0x1a7   :  { %v831_v14 = vadd.f32 %v830_v5, %v768_v37  ;;  %v775_v5 = vmul.f32 %v2491_v6, %v2491_v6 }
 0x1a9   :  { %v832_v19 = vadd.f32 %v831_v14, %v769_v21  ;;  %v776_v14 = vmul.f32 %v2495_v62, %v2495_v62 }
 0x1ab   :  { %v833_v27 = vadd.f32 %v832_v19, %v770_v3  ;;  %v777_v19 = vmul.f32 %v2499_v4, %v2499_v4 }
 0x1ad   :  { %v834_v34 = vadd.f32 %v833_v27, %v771_v15  ;;  %v778_v27 = vmul.f32 %v2503_v13, %v2503_v13 }
 0x1af   :  { %v835_v39 = vadd.f32 %v834_v34, %v772_v60  ;;  %v779_v34 = vmul.f32 %v2507_v18, %v2507_v18 }
 0x1b1   :  { %v836_v37 = vadd.f32 %v835_v39, %v773_v11  ;;  %v780_v39 = vmul.f32 %v2511_v10, %v2511_v10 }
 0x1b3   :  { %v837_v21 = vadd.f32 %v836_v37, %v774_v61  ;;  %v781_v37 = vmul.f32 %v2515_v16, %v2515_v16 }
 0x1b5   :  { %v838_v3 = vadd.f32 %v837_v21, %v775_v5  ;;  %v4218_v21 = vld [vmem:[#allocation2_spill] sm:$0xff] }
 0x1b6   :  { %v782_v4 = vmul.f32 %v4218_v21, %v4218_v21 }
 0x1b7   :  { %v839_v15 = vadd.f32 %v838_v3, %v776_v14  ;;  %v4219_v3 = vld [vmem:[#allocation3_spill] sm:$0xff] }
 0x1b8   :  { %v783_v13 = vmul.f32 %v4219_v3, %v4219_v3 }
 0x1b9   :  { %v840_v60 = vadd.f32 %v839_v15, %v777_v19  ;;  %v784_v15 = vmul.f32 %v2527_v20, %v2527_v20 }
 0x1bb   :  { %v841_v11 = vadd.f32 %v840_v60, %v778_v27  ;;  %v785_v60 = vmul.f32 %v2531_v23, %v2531_v23 }
 0x1bd   :  { %v842_v61 = vadd.f32 %v841_v11, %v779_v34  ;;  %v786_v11 = vmul.f32 %v2535_v28, %v2535_v28 }
 0x1bf   :  { %v843_v5 = vadd.f32 %v842_v61, %v780_v39  ;;  %v787_v61 = vmul.f32 %v2539_v9, %v2539_v9 }
 0x1c1   :  { %v844_v14 = vadd.f32 %v843_v5, %v781_v37  ;;  %v788_v5 = vmul.f32 %v2543_v32, %v2543_v32 }
 0x1c3   :  { %v845_v19 = vadd.f32 %v844_v14, %v782_v4  ;;  %v789_v14 = vmul.f32 %v2547_v33, %v2547_v33 }
 0x1c5   :  { %v846_v27 = vadd.f32 %v845_v19, %v783_v13  ;;  %v790_v19 = vmul.f32 %v2551_v63, %v2551_v63 }
 0x1c7   :  { %v847_v34 = vadd.f32 %v846_v27, %v784_v15  ;;  %v791_v27 = vmul.f32 %v2555_v49, %v2555_v49 }
 0x1c9   :  { %v848_v39 = vadd.f32 %v847_v34, %v785_v60  ;;  %v792_v34 = vmul.f32 %v2559_v22, %v2559_v22 }
 0x1cb   :  { %v849_v37 = vadd.f32 %v848_v39, %v786_v11  ;;  %v793_v39 = vmul.f32 %v2563_v25, %v2563_v25 }
 0x1cd   :  { %v850_v4 = vadd.f32 %v849_v37, %v787_v61  ;;  %v794_v37 = vmul.f32 %v2567_v30, %v2567_v30 }
 0x1cf   :  { %v851_v13 = vadd.f32 %v850_v4, %v788_v5  ;;  %v795_v4 = vmul.f32 %v2571_v51, %v2571_v51 }
 0x1d1   :  { %v852_v15 = vadd.f32 %v851_v13, %v789_v14  ;;  %v796_v13 = vmul.f32 %v2575_v35, %v2575_v35 }
 0x1d3   :  { %v853_v60 = vadd.f32 %v852_v15, %v790_v19  ;;  %v797_v15 = vmul.f32 %v2579_v48, %v2579_v48 }
 0x1d5   :  { %v854_v11 = vadd.f32 %v853_v60, %v791_v27  ;;  %v798_v60 = vmul.f32 %v2583_v43, %v2583_v43 }
 0x1d7   :  { %v855_v61 = vadd.f32 %v854_v11, %v792_v34  ;;  %v799_v11 = vmul.f32 %v2587_v47, %v2587_v47 }
 0x1d9   :  { %v856_v5 = vadd.f32 %v855_v61, %v793_v39  ;;  %v800_v61 = vmul.f32 %v2591_v41, %v2591_v41 }
 0x1db   :  { %v857_v14 = vadd.f32 %v856_v5, %v794_v37  ;;  %v801_v5 = vmul.f32 %v2595_v45, %v2595_v45 }
 0x1dd   :  { %v858_v19 = vadd.f32 %v857_v14, %v795_v4  ;;  %v802_v14 = vmul.f32 %v2599_v54, %v2599_v54 }
 0x1df   :  { %v859_v27 = vadd.f32 %v858_v19, %v796_v13  ;;  %v803_v19 = vmul.f32 %v2603_v59, %v2603_v59 }
 0x1e1   :  { %v860_v34 = vadd.f32 %v859_v27, %v797_v15  ;;  %v804_v27 = vmul.f32 %v2607_v52, %v2607_v52 }
 0x1e3   :  { %v861_v39 = vadd.f32 %v860_v34, %v798_v60  ;;  %v805_v34 = vmul.f32 %v2611_v57, %v2611_v57 }
 0x1e5   :  { %v862_v37 = vadd.f32 %v861_v39, %v799_v11  ;;  %v806_v39 = vmul.f32 %v2615_v2, %v2615_v2 }
 0x1e7   :  { %v863_v4 = vadd.f32 %v862_v37, %v800_v61  ;;  %v807_v37 = vmul.f32 %v2619_v7, %v2619_v7 }
 0x1e9   :  { %v864_v13 = vadd.f32 %v863_v4, %v801_v5  ;;  %v4220_v4 = vld [vmem:[#allocation12_spill] sm:$0xff] }
 0x1ea   :  { %v808_v59 = vmul.f32 %v4220_v4, %v4220_v4 }
 0x1eb   :  { %v865_v15 = vadd.f32 %v864_v13, %v802_v14  ;;  %v4221_v13 = vld [vmem:[#allocation15_spill] sm:$0xff] }
 0x1ec   :  { %v809_v52 = vmul.f32 %v4221_v13, %v4221_v13 }
 0x1ed   :  { %v866_v60 = vadd.f32 %v865_v15, %v803_v19  ;;  %v4222_v15 = vld [vmem:[#allocation11_spill] sm:$0xff] }
 0x1ee   :  { %v810_v57 = vmul.f32 %v4222_v15, %v4222_v15 }
 0x1ef   :  { %v867_v11 = vadd.f32 %v866_v60, %v804_v27  ;;  %v4223_v60 = vld [vmem:[#allocation14_spill] sm:$0xff] }
 0x1f0   :  { %v811_v2 = vmul.f32 %v4223_v60, %v4223_v60 }
 0x1f1   :  { %v868_v61 = vadd.f32 %v867_v11, %v805_v34  ;;  %v812_v11 = vmul.f32 %v2639_v12, %v2639_v12 }
 0x1f3   :  { %v869_v5 = vadd.f32 %v868_v61, %v806_v39  ;;  %v813_v61 = vmul.f32 %v2643_v17, %v2643_v17 }
 0x1f5   :  { %v870_v14 = vadd.f32 %v869_v5, %v807_v37  ;;  %v814_v5 = vmul.f32 %v2647_v26, %v2647_v26 }
 0x1f7   :  { %v871_v19 = vadd.f32 %v870_v14, %v808_v59  ;;  %v815_v14 = vmul.f32 %v2651_v31, %v2651_v31 }
 0x1f9   :  { %v872_v27 = vadd.f32 %v871_v19, %v809_v52  ;;  %v816_v19 = vmul.f32 %v2655_v24, %v2655_v24 }
 0x1fb   :  { %v873_v34 = vadd.f32 %v872_v27, %v810_v57  ;;  %v817_v27 = vmul.f32 %v2659_v29, %v2659_v29 }
 0x1fd   :  { %v874_v39 = vadd.f32 %v873_v34, %v811_v2  ;;  %v818_v34 = vmul.f32 %v2663_v38, %v2663_v38 }
 0x1ff   :  { %v875_v37 = vadd.f32 %v874_v39, %v812_v11  ;;  %v819_v39 = vmul.f32 %v2667_v0, %v2667_v0 }
 0x201   :  { %v876_v59 = vadd.f32 %v875_v37, %v813_v61  ;;  %v4224_v37 = vld [vmem:[#allocation13_spill] sm:$0xff] }
 0x202   :  { %v820_v15 = vmul.f32 %v4224_v37, %v4224_v37 }
 0x203   :  { %v877_v52 = vadd.f32 %v876_v59, %v814_v5  ;;  %v4225_v59 = vld [vmem:[#allocation22_spill] sm:$0xff] }
 0x204   :  { %v821_v13 = vmul.f32 %v4225_v59, %v4225_v59 }
 0x205   :  { %v878_v57 = vadd.f32 %v877_v52, %v815_v14  ;;  %v4226_v52 = vld [vmem:[#allocation23_spill] sm:$0xff] }
 0x206   :  { %v822_v29 = vmul.f32 %v4226_v52, %v4226_v52 }
 0x207   :  { %v879_v2 = vadd.f32 %v878_v57, %v816_v19  ;;  %v4227_v57 = vld [vmem:[#allocation24_spill] sm:$0xff] }
 0x208   :  { %v823_v38 = vmul.f32 %v4227_v57, %v4227_v57 }
 0x209   :  { %v880_v11 = vadd.f32 %v879_v2, %v817_v27  ;;  %v824_v2 = vmul.f32 %v2687_v8, %v2687_v8 }
 0x20b   :  { %v881_v61 = vadd.f32 %v880_v11, %v818_v34 }
 0x20d   :  { %v882_v5 = vadd.f32 %v881_v61, %v819_v39 }
 0x20f   :  { %v883_v14 = vadd.f32 %v882_v5, %v820_v15 }
 0x211   :  { %v884_v19 = vadd.f32 %v883_v14, %v821_v13  ;;  %v4228_v13 = vld [vmem:[#allocation17_spill] sm:$0xff] }
 0x213   :  { %v885_v27 = vadd.f32 %v884_v19, %v822_v29  ;;  %v4229_v29 = vld [vmem:[#allocation18_spill] sm:$0xff] }
 0x215   :  { %v886_v34 = vadd.f32 %v885_v27, %v823_v38  ;;  %v4230_v38 = vld [vmem:[#allocation19_spill] sm:$0xff] }
 0x217   :  { %v887_v11 = vadd.f32 %v886_v34, %v824_v2  ;;  %v4231_v34 = vld [vmem:[#allocation20_spill] sm:$0xff] }
 0x219   :  { %v888_v0 = vrot.slane %v887_v11, 4 }
 0x21b   :  { %v889_v37 = vadd.f32 %v888_v0, %v887_v11  ;;  %v4232_v11 = vld [vmem:[#allocation21_spill] sm:$0xff] }
 0x21d   :  { %v890_v39 = vrot.slane %v889_v37, 2 }
 0x21f   :  { %v891_v61 = vadd.f32 %v890_v39, %v889_v37 }
 0x221   :  { %v892_v24 = vrot.slane %v891_v61, 1 }
 0x223   :  { %v893_v59 = vadd.f32 %v892_v24, %v891_v61 }
 0x225   :  { %v894_v15 = vmul.f32 0.001953125, %v893_v59 }
 0x227   :  { %v895_v5 = vadd.f32 1e-05, %v894_v15  ;;  %v4233_v15 = vld [vmem:[#allocation6_spill] sm:$0xff] }
 0x229   :  { %2092 = vrsqrt.f32 %v895_v5  ;;  %v4234_v5 = vld [vmem:[#allocation9_spill] sm:$0xff] }
 0x233   :  { %v2817_v52 = vpop.eup %2092 }
 0x234   :  { %v2821_v14 = vmul.f32 %v2817_v52, %v4228_v13  ;;  %v2825_v19 = vmul.f32 %v2817_v52, %v4229_v29  ;;  %v2829_v0 = vmul.f32 %v2817_v52, %v4230_v38  ;;  %v2833_v24 = vmul.f32 %v2817_v52, %v2447_v55  ;;  %v4235_v13 = vld [vmem:[#allocation4_spill] sm:$0xff]  ;;  %v4236_v29 = vld [vmem:[#allocation7_spill] sm:$0xff] }
 0x235   :  { %v2837_v37 = vmul.f32 %v2817_v52, %v2451_v36  ;;  %v2841_v59 = vmul.f32 %v2817_v52, %v2455_v42  ;;  %v2845_v27 = vmul.f32 %v2817_v52, %v2459_v46  ;;  %v2849_v2 = vmul.f32 %v2817_v52, %v2463_v40 }
 0x236   :  { %v2853_v55 = vmul.f32 %v2817_v52, %v2467_v44  ;;  %v2857_v36 = vmul.f32 %v2817_v52, %v2471_v53  ;;  %v2861_v42 = vmul.f32 %v2817_v52, %v2475_v58  ;;  %v2865_v46 = vmul.f32 %v2817_v52, %v2479_v50 }
 0x237   :  { %v2869_v40 = vmul.f32 %v2817_v52, %v2483_v56  ;;  %v2873_v44 = vmul.f32 %v2817_v52, %v2487_v1  ;;  %v2877_v53 = vmul.f32 %v2817_v52, %v2491_v6  ;;  %v2881_v58 = vmul.f32 %v2817_v52, %v2495_v62 }
 0x238   :  { %v2885_v50 = vmul.f32 %v2817_v52, %v4231_v34  ;;  %v2889_v56 = vmul.f32 %v2817_v52, %v4232_v11  ;;  %v2893_v1 = vmul.f32 %v2817_v52, %v2507_v18  ;;  %v2897_v6 = vmul.f32 %v2817_v52, %v2511_v10 }
 0x239   :  { %v2901_v62 = vmul.f32 %v2817_v52, %v2515_v16  ;;  %v2905_v39 = vmul.f32 %v2817_v52, %v4218_v21  ;;  %v2909_v61 = vmul.f32 %v2817_v52, %v4219_v3  ;;  %v2913_v18 = vmul.f32 %v2817_v52, %v2527_v20 }
 0x23a   :  { %v2917_v10 = vmul.f32 %v2817_v52, %v2531_v23  ;;  %v2921_v16 = vmul.f32 %v2817_v52, %v2535_v28  ;;  %v2925_v21 = vmul.f32 %v2817_v52, %v2539_v9  ;;  %v2929_v3 = vmul.f32 %v2817_v52, %v2543_v32 }
 0x23b   :  { %v2933_v20 = vmul.f32 %v2817_v52, %v2547_v33  ;;  %v2937_v23 = vmul.f32 %v2817_v52, %v2551_v63  ;;  %v2941_v28 = vmul.f32 %v2817_v52, %v2555_v49  ;;  %v2945_v9 = vmul.f32 %v2817_v52, %v2559_v22 }
 0x23c   :  { %v2949_v32 = vmul.f32 %v2817_v52, %v2563_v25  ;;  %v2953_v33 = vmul.f32 %v2817_v52, %v2567_v30  ;;  %v2957_v63 = vmul.f32 %v2817_v52, %v2571_v51  ;;  %v2961_v49 = vmul.f32 %v2817_v52, %v2575_v35 }
 0x23d   :  { %v2965_v22 = vmul.f32 %v2817_v52, %v2579_v48  ;;  %v2969_v25 = vmul.f32 %v2817_v52, %v2583_v43  ;;  %v2973_v30 = vmul.f32 %v2817_v52, %v2587_v47  ;;  %v2977_v51 = vmul.f32 %v2817_v52, %v2591_v41 }
 0x23e   :  { %v2981_v35 = vmul.f32 %v2817_v52, %v2595_v45  ;;  %v2985_v48 = vmul.f32 %v2817_v52, %v2599_v54  ;;  %v2989_v43 = vmul.f32 %v2817_v52, %v4233_v15  ;;  %v2993_v47 = vmul.f32 %v2817_v52, %v4234_v5  ;;  %v4241_v5 = vld [vmem:[#allocation16_spill] sm:$0xff] }
 0x23f   :  { %v2997_v41 = vmul.f32 %v2817_v52, %v4235_v13  ;;  %v3001_v45 = vmul.f32 %v2817_v52, %v4236_v29  ;;  %v3005_v54 = vmul.f32 %v2817_v52, %v2619_v7  ;;  %v3009_v38 = vmul.f32 %v2817_v52, %v4220_v4  ;;  %v4243_v13 = vld [vmem:[#allocation10_spill] sm:$0xff]  ;;  %v4244_v29 = vld [vmem:[#allocation5_spill] sm:$0xff] }
 0x240   :  { %v3013_v34 = vmul.f32 %v2817_v52, %v4223_v60  ;;  %v3017_v11 = vmul.f32 %v2817_v52, %v2639_v12  ;;  %v3021_v15 = vmul.f32 %v2817_v52, %v2643_v17  ;;  %v3025_v7 = vmul.f32 %v2817_v52, %v2647_v26  ;;  %v3038_v12 = vld [vmem:[%s4060_s2] ss:$0 sm:$0xff] }
 0x241   :  { %v3029_v4 = vmul.f32 %v2817_v52, %v2651_v31  ;;  %v3033_v60 = vmul.f32 %v2817_v52, %v4241_v5  ;;  %v3042_v17 = vmul.f32 %v2817_v52, %v4243_v13  ;;  %v3046_v26 = vmul.f32 %v2817_v52, %v4244_v29 }
 0x242   :  { %4237 = vst [vmem:[#allocation2_spill] sm:$0xff] %v3017_v11  ;;  %4238 = vst [vmem:[#allocation3_spill] sm:$0xff] %v3021_v15  ;;  %v4251_v11 = vld [vmem:[#allocation23_spill] sm:$0xff]  ;;  %v3066_v29 = vmul.f32 %v2817_v52, %v4227_v57  ;;  %v3086_v57 = vmul.f32 %v3038_v12, %v2829_v0  ;;  %v3110_v0 = vmul.f32 %v3038_v12, %v2853_v55 }
 0x243   :  { %4239 = vst [vmem:[#allocation12_spill] sm:$0xff] %v3025_v7  ;;  %4240 = vst [vmem:[#allocation14_spill] sm:$0xff] %v3029_v4  ;;  %v4246_v7 = vld [vmem:[#allocation8_spill] sm:$0xff]  ;;  %v4248_v4 = vld [vmem:[#allocation13_spill] sm:$0xff]  ;;  %v3062_v13 = vmul.f32 %v2817_v52, %v4251_v11  ;;  %v3082_v11 = vmul.f32 %v3038_v12, %v2825_v19  ;;  %v3106_v19 = vmul.f32 %v3038_v12, %v2849_v2 }
 0x244   :  { %4242 = vst [vmem:[#allocation24_spill] sm:$0xff] %v3033_v60  ;;  %4245 = vst [vmem:[#allocation17_spill] sm:$0xff] %v3046_v26  ;;  %v3050_v31 = vmul.f32 %v2817_v52, %v4246_v7  ;;  %v3054_v5 = vmul.f32 %v2817_v52, %v4248_v4  ;;  %v4250_v60 = vld [vmem:[#allocation22_spill] sm:$0xff]  ;;  %v3070_v7 = vmul.f32 %v2817_v52, %v2687_v8 }
 0x245   :  { %v3058_v15 = vmul.f32 %v2817_v52, %v4250_v60  ;;  %v3078_v60 = vmul.f32 %v3038_v12, %v2821_v14  ;;  %v3090_v8 = vmul.f32 %v3038_v12, %v2833_v24  ;;  %v3102_v14 = vmul.f32 %v3038_v12, %v2845_v27 }
 0x246   :  { %4247 = vst [vmem:[#allocation18_spill] sm:$0xff] %v3050_v31  ;;  %4249 = vst [vmem:[#allocation19_spill] sm:$0xff] %v3054_v5  ;;  %v4252_v31 = vld [vmem:[#allocation15_spill] sm:$0xff]  ;;  %v3114_v24 = vmul.f32 %v3038_v12, %v2857_v36  ;;  %v3126_v27 = vmul.f32 %v3038_v12, %v2869_v40  ;;  %v3130_v2 = vmul.f32 %v3038_v12, %v2873_v44 }
 0x247   :  { %v945_v4 = vmul.f32 %v2817_v52, %v4252_v31  ;;  %v4253_v5 = vld [vmem:[#allocation11_spill] sm:$0xff]  ;;  %v3094_v31 = vmul.f32 %v3038_v12, %v2837_v37  ;;  %v3118_v37 = vmul.f32 %v3038_v12, %v2861_v42  ;;  %v3134_v55 = vmul.f32 %v3038_v12, %v2877_v53 }
 0x248   :  { %v946_v26 = vmul.f32 %v2817_v52, %v4253_v5  ;;  %v3098_v52 = vmul.f32 %v3038_v12, %v2841_v59  ;;  %v3122_v59 = vmul.f32 %v3038_v12, %v2865_v46  ;;  %v3138_v36 = vmul.f32 %v3038_v12, %v2881_v58 }
 0x249   :  { %v3142_v42 = vmul.f32 %v3038_v12, %v2885_v50  ;;  %v3146_v46 = vmul.f32 %v3038_v12, %v2889_v56  ;;  %v3150_v40 = vmul.f32 %v3038_v12, %v2893_v1  ;;  %v3154_v44 = vmul.f32 %v3038_v12, %v2897_v6 }
 0x24a   :  { %v3158_v53 = vmul.f32 %v3038_v12, %v2901_v62  ;;  %v3162_v58 = vmul.f32 %v3038_v12, %v2905_v39  ;;  %v3166_v50 = vmul.f32 %v3038_v12, %v2909_v61  ;;  %v3170_v56 = vmul.f32 %v3038_v12, %v2913_v18 }
 0x24b   :  { %v3174_v1 = vmul.f32 %v3038_v12, %v2917_v10  ;;  %v3178_v6 = vmul.f32 %v3038_v12, %v2921_v16  ;;  %v3182_v62 = vmul.f32 %v3038_v12, %v2925_v21  ;;  %v3186_v39 = vmul.f32 %v3038_v12, %v2929_v3 }
 0x24c   :  { %v3190_v61 = vmul.f32 %v3038_v12, %v2933_v20  ;;  %v3194_v18 = vmul.f32 %v3038_v12, %v2937_v23  ;;  %v3198_v10 = vmul.f32 %v3038_v12, %v2941_v28  ;;  %v3202_v16 = vmul.f32 %v3038_v12, %v2945_v9 }
 0x24d   :  { %v3206_v21 = vmul.f32 %v3038_v12, %v2949_v32  ;;  %v3210_v3 = vmul.f32 %v3038_v12, %v2953_v33  ;;  %v3214_v20 = vmul.f32 %v3038_v12, %v2957_v63  ;;  %v3218_v23 = vmul.f32 %v3038_v12, %v2961_v49 }
 0x24e   :  { %v3222_v28 = vmul.f32 %v3038_v12, %v2965_v22  ;;  %v3226_v9 = vmul.f32 %v3038_v12, %v2969_v25  ;;  %v3230_v32 = vmul.f32 %v3038_v12, %v2973_v30  ;;  %v3234_v33 = vmul.f32 %v3038_v12, %v2977_v51 }
 0x24f   :  { %v3238_v63 = vmul.f32 %v3038_v12, %v2981_v35  ;;  %v3242_v49 = vmul.f32 %v3038_v12, %v2985_v48  ;;  %v3246_v22 = vmul.f32 %v3038_v12, %v2989_v43  ;;  %v3250_v25 = vmul.f32 %v3038_v12, %v2993_v47 }
 0x250   :  { %v3254_v30 = vmul.f32 %v3038_v12, %v2997_v41  ;;  %v3258_v51 = vmul.f32 %v3038_v12, %v3001_v45  ;;  %v3262_v35 = vmul.f32 %v3038_v12, %v3005_v54  ;;  %v3266_v48 = vmul.f32 %v3038_v12, %v3009_v38  ;;  %v4258_v45 = vld [vmem:[#allocation2_spill] sm:$0xff]  ;;  %v4260_v54 = vld [vmem:[#allocation3_spill] sm:$0xff]  ;;  %v4262_v38 = vld [vmem:[#allocation12_spill] sm:$0xff] }
 0x251   :  { %v3269_v43 = vmul.f32 %v3038_v12, %v945_v4  ;;  %v3272_v47 = vmul.f32 %v3038_v12, %v946_v26  ;;  %v3276_v41 = vmul.f32 %v3038_v12, %v3013_v34  ;;  %v3280_v5 = vmul.f32 %v3038_v12, %v4258_v45  ;;  %v3293_v26 = vld [vmem:[%s4061_s3] ss:$0 sm:$0xff] }
 0x252   :  { %4254 = vst [vmem:[#allocation20_spill] sm:$0xff] %v3262_v35  ;;  %4255 = vst [vmem:[#allocation21_spill] sm:$0xff] %v3266_v48  ;;  %v3284_v35 = vmul.f32 %v3038_v12, %v4260_v54  ;;  %v3288_v48 = vmul.f32 %v3038_v12, %v4262_v38  ;;  %v4264_v4 = vld [vmem:[#allocation14_spill] sm:$0xff]  ;;  %v3305_v54 = vmul.f32 %v3038_v12, %v3042_v17 }
 0x253   :  { %4256 = vst [vmem:[#allocation6_spill] sm:$0xff] %v3272_v47  ;;  %4257 = vst [vmem:[#allocation9_spill] sm:$0xff] %v3276_v41  ;;  %v3297_v34 = vmul.f32 %v3038_v12, %v4264_v4  ;;  %v4265_v41 = vld [vmem:[#allocation24_spill] sm:$0xff]  ;;  %v4268_v47 = vld [vmem:[#allocation19_spill] sm:$0xff]  ;;  %v3325_v17 = vmul.f32 %v3038_v12, %v3062_v13  ;;  %v3345_v13 = vadd.f32 %v3293_v26, %v3086_v57 }
 0x254   :  { %4259 = vst [vmem:[#allocation4_spill] sm:$0xff] %v3280_v5  ;;  %4261 = vst [vmem:[#allocation7_spill] sm:$0xff] %v3284_v35  ;;  %v3301_v45 = vmul.f32 %v3038_v12, %v4265_v41  ;;  %v4266_v35 = vld [vmem:[#allocation17_spill] sm:$0xff]  ;;  %v3317_v4 = vmul.f32 %v3038_v12, %v4268_v47  ;;  %v3321_v41 = vmul.f32 %v3038_v12, %v3058_v15 }
 0x255   :  { %4263 = vst [vmem:[#allocation16_spill] sm:$0xff] %v3288_v48  ;;  %v3309_v38 = vmul.f32 %v3038_v12, %v4266_v35  ;;  %v4267_v48 = vld [vmem:[#allocation18_spill] sm:$0xff]  ;;  %v3329_v35 = vmul.f32 %v3038_v12, %v3066_v29  ;;  %v3337_v47 = vadd.f32 %v3293_v26, %v3078_v60  ;;  %v3341_v15 = vadd.f32 %v3293_v26, %v3082_v11 }
 0x256   :  { %v3313_v5 = vmul.f32 %v3038_v12, %v4267_v48  ;;  %v3333_v48 = vmul.f32 %v3038_v12, %v3070_v7  ;;  %4271 = vst [vmem:[#allocation8_spill] sm:$0xff] %v3345_v13  ;;  %v3349_v29 = vadd.f32 %v3293_v26, %v3090_v8  ;;  %v3353_v12 = vadd.f32 %v3293_v26, %v3094_v31 }
 0x257   :  { %4269 = vst [vmem:[#allocation10_spill] sm:$0xff] %v3337_v47  ;;  %4270 = vst [vmem:[#allocation5_spill] sm:$0xff] %v3341_v15  ;;  %v3357_v7 = vadd.f32 %v3293_v26, %v3098_v52  ;;  %v3361_v60 = vadd.f32 %v3293_v26, %v3102_v14  ;;  %v3365_v11 = vadd.f32 %v3293_v26, %v3106_v19 }
 0x258   :  { %4272 = vst [vmem:[#allocation13_spill] sm:$0xff] %v3349_v29  ;;  %4273 = vst [vmem:[#allocation22_spill] sm:$0xff] %v3353_v12  ;;  %v3369_v57 = vadd.f32 %v3293_v26, %v3110_v0  ;;  %v3373_v8 = vadd.f32 %v3293_v26, %v3114_v24  ;;  %v3377_v31 = vadd.f32 %v3293_v26, %v3118_v37 }
 0x259   :  { %4274 = vst [vmem:[#allocation23_spill] sm:$0xff] %v3357_v7  ;;  %4275 = vst [vmem:[#allocation15_spill] sm:$0xff] %v3361_v60  ;;  %v3381_v52 = vadd.f32 %v3293_v26, %v3122_v59  ;;  %v3385_v14 = vadd.f32 %v3293_v26, %v3126_v27  ;;  %v3389_v19 = vadd.f32 %v3293_v26, %v3130_v2 }
 0x25a   :  { %4276 = vst [vmem:[#allocation11_spill] sm:$0xff] %v3365_v11  ;;  %4277 = vst [vmem:[#allocation2_spill] sm:$0xff] %v3369_v57  ;;  %v3393_v0 = vadd.f32 %v3293_v26, %v3134_v55  ;;  %v3397_v24 = vadd.f32 %v3293_v26, %v3138_v36  ;;  %v3401_v37 = vadd.f32 %v3293_v26, %v3142_v42 }
 0x25b   :  { %4278 = vst [vmem:[#allocation3_spill] sm:$0xff] %v3373_v8  ;;  %4279 = vst [vmem:[#allocation12_spill] sm:$0xff] %v3377_v31  ;;  %v3405_v59 = vadd.f32 %v3293_v26, %v3146_v46  ;;  %v3409_v27 = vadd.f32 %v3293_v26, %v3150_v40  ;;  %v3413_v2 = vadd.f32 %v3293_v26, %v3154_v44 }
 0x25c   :  { %4280 = vst [vmem:[#allocation14_spill] sm:$0xff] %v3381_v52  ;;  %4281 = vst [vmem:[#allocation24_spill] sm:$0xff] %v3385_v14  ;;  %v3417_v55 = vadd.f32 %v3293_v26, %v3158_v53  ;;  %v3421_v36 = vadd.f32 %v3293_v26, %v3162_v58  ;;  %v3425_v42 = vadd.f32 %v3293_v26, %v3166_v50 }
 0x25d   :  { %4282 = vst [vmem:[#allocation17_spill] sm:$0xff] %v3389_v19  ;;  %4283 = vst [vmem:[#allocation18_spill] sm:$0xff] %v3393_v0  ;;  %v3429_v46 = vadd.f32 %v3293_v26, %v3170_v56  ;;  %v3433_v40 = vadd.f32 %v3293_v26, %v3174_v1  ;;  %v3437_v44 = vadd.f32 %v3293_v26, %v3178_v6 }
 0x25e   :  { %4284 = vst [vmem:[#allocation19_spill] sm:$0xff] %v3397_v24  ;;  %4285 = vst [vmem:[#allocation25_spill] sm:$0xff] %v3401_v37  ;;  %v3441_v53 = vadd.f32 %v3293_v26, %v3182_v62  ;;  %v3445_v58 = vadd.f32 %v3293_v26, %v3186_v39  ;;  %v3449_v50 = vadd.f32 %v3293_v26, %v3190_v61 }
 0x25f   :  { %4286 = vst [vmem:[#allocation26_spill] sm:$0xff] %v3405_v59  ;;  %4287 = vst [vmem:[#allocation27_spill] sm:$0xff] %v3417_v55  ;;  %v3453_v56 = vadd.f32 %v3293_v26, %v3194_v18  ;;  %v3457_v1 = vadd.f32 %v3293_v26, %v3198_v10  ;;  %v3461_v6 = vadd.f32 %v3293_v26, %v3202_v16 }
 0x260   :  { %4288 = vst [vmem:[#allocation28_spill] sm:$0xff] %v3429_v46  ;;  %4289 = vst [vmem:[#allocation29_spill] sm:$0xff] %v3441_v53  ;;  %v3465_v62 = vadd.f32 %v3293_v26, %v3206_v21  ;;  %v3469_v39 = vadd.f32 %v3293_v26, %v3210_v3  ;;  %v3473_v61 = vadd.f32 %v3293_v26, %v3214_v20 }
 0x261   :  { %4290 = vst [vmem:[#allocation30_spill] sm:$0xff] %v3453_v56  ;;  %v3477_v18 = vadd.f32 %v3293_v26, %v3218_v23  ;;  %v3481_v10 = vadd.f32 %v3293_v26, %v3222_v28  ;;  %v3485_v16 = vadd.f32 %v3293_v26, %v3226_v9  ;;  %v3489_v21 = vadd.f32 %v3293_v26, %v3230_v32 }
 0x262   :  { %4291 = vst [vmem:[#allocation31_spill] sm:$0xff] %v3465_v62  ;;  %v3493_v3 = vadd.f32 %v3293_v26, %v3234_v33  ;;  %v3497_v20 = vadd.f32 %v3293_v26, %v3238_v63  ;;  %v3501_v23 = vadd.f32 %v3293_v26, %v3242_v49  ;;  %v3505_v28 = vadd.f32 %v3293_v26, %v3246_v22  ;;  %v4300_v63 = vld [vmem:[#allocation20_spill] sm:$0xff] }
 0x263   :  { %4292 = vst [vmem:[#allocation32_spill] sm:$0xff] %v3477_v18  ;;  %4293 = vst [vmem:[#allocation33_spill] sm:$0xff] %v3485_v16  ;;  %v3509_v9 = vadd.f32 %v3293_v26, %v3250_v25  ;;  %v3513_v32 = vadd.f32 %v3293_v26, %v3254_v30  ;;  %v3517_v33 = vadd.f32 %v3293_v26, %v3258_v51 }
 0x264   :  { %4294 = vst [vmem:[#allocation34_spill] sm:$0xff] %v3489_v21  ;;  %4295 = vst [vmem:[#allocation35_spill] sm:$0xff] %v3497_v20  ;;  %v3521_v49 = vadd.f32 %v3293_v26, %v4300_v63  ;;  %v3529_v25 = vadd.f32 %v3293_v26, %v3269_v43 }
 0x265   :  { %4296 = vst [vmem:[#allocation36_spill] sm:$0xff] %v3501_v23  ;;  %4297 = vst [vmem:[#allocation37_spill] sm:$0xff] %v3509_v9  ;;  %v4302_v23 = vld [vmem:[#allocation21_spill] sm:$0xff]  ;;  %v4304_v9 = vld [vmem:[#allocation6_spill] sm:$0xff] }
 0x266   :  { %4298 = vst [vmem:[#allocation38_spill] sm:$0xff] %v3513_v32  ;;  %4299 = vst [vmem:[#allocation39_spill] sm:$0xff] %v3517_v33  ;;  %v3525_v22 = vadd.f32 %v3293_v26, %v4302_v23  ;;  %v3533_v30 = vadd.f32 %v3293_v26, %v4304_v9  ;;  %v4306_v32 = vld [vmem:[#allocation9_spill] sm:$0xff]  ;;  %v4308_v33 = vld [vmem:[#allocation4_spill] sm:$0xff]  ;;  %v3553_v9 = vadd.f32 %v3293_v26, %v3297_v34 }
 0x267   :  { %4301 = vst [vmem:[#allocation20_spill] sm:$0xff] %v3521_v49  ;;  %v3537_v51 = vadd.f32 %v3293_v26, %v4306_v32  ;;  %v3541_v63 = vadd.f32 %v3293_v26, %v4308_v33  ;;  %v4309_v49 = vld [vmem:[#allocation7_spill] sm:$0xff]  ;;  %v3557_v32 = vadd.f32 %v3293_v26, %v3301_v45  ;;  %v3561_v33 = vadd.f32 %v3293_v26, %v3305_v54 }
 0x268   :  { %4303 = vst [vmem:[#allocation21_spill] sm:$0xff] %v3525_v22  ;;  %4305 = vst [vmem:[#allocation6_spill] sm:$0xff] %v3533_v30  ;;  %v3545_v23 = vadd.f32 %v3293_v26, %v4309_v49  ;;  %v4311_v22 = vld [vmem:[#allocation16_spill] sm:$0xff]  ;;  %v3565_v49 = vadd.f32 %v3293_v26, %v3309_v38  ;;  %v3573_v34 = vadd.f32 %v3293_v26, %v3317_v4  ;;  %v3594_v4 = vmul.f32 0.2, %v3345_v13 }
 0x269   :  { %4307 = vst [vmem:[#allocation9_spill] sm:$0xff] %v3537_v51  ;;  %v3549_v43 = vadd.f32 %v3293_v26, %v4311_v22  ;;  %4313 = vst [vmem:[#allocation16_spill] sm:$0xff] %v3553_v9  ;;  %v3569_v22 = vadd.f32 %v3293_v26, %v3313_v5  ;;  %v3577_v45 = vadd.f32 %v3293_v26, %v3321_v41  ;;  %v3591_v5 = vmul.f32 0.2, %v3341_v15 }
 0x26a   :  { %4310 = vst [vmem:[#allocation4_spill] sm:$0xff] %v3545_v23  ;;  %4314 = vst [vmem:[#allocation40_spill] sm:$0xff] %v3557_v32  ;;  %v3581_v54 = vadd.f32 %v3293_v26, %v3325_v17  ;;  %v3585_v38 = vadd.f32 %v3293_v26, %v3329_v35  ;;  %v3598_v41 = vadd.f32 %v3293_v26, %v3333_v48  ;;  %v3601_v17 = vmul.f32 0.2, %v3349_v29 }
 0x26b   :  { %4312 = vst [vmem:[#allocation7_spill] sm:$0xff] %v3549_v43  ;;  %4315 = vst [vmem:[#allocation41_spill] sm:$0xff] %v3561_v33  ;;  %v3607_v35 = vmul.f32 0.2, %v3357_v7  ;;  %v3621_v48 = vmul.f32 0.2, %v3373_v8 }
 0x26c   :  { %4316 = vst [vmem:[#allocation42_spill] sm:$0xff] %v3565_v49  ;;  %4317 = vst [vmem:[#allocation43_spill] sm:$0xff] %v3569_v22  ;;  %v3588_v49 = vmul.f32 0.2, %v3337_v47  ;;  %v3627_v22 = vmul.f32 0.2, %v3381_v52 }
 0x26d   :  { %4318 = vst [vmem:[#allocation44_spill] sm:$0xff] %v3573_v34  ;;  %4319 = vst [vmem:[#allocation45_spill] sm:$0xff] %v3577_v45  ;;  %v3613_v45 = vmul.f32 0.2, %v3365_v11  ;;  %v3616_v34 = vmul.f32 0.2, %v3369_v57 }
 0x26e   :  { %4320 = vst [vmem:[#allocation46_spill] sm:$0xff] %v3581_v54  ;;  %4321 = vst [vmem:[#allocation47_spill] sm:$0xff] %v3585_v38  ;;  %v3604_v54 = vmul.f32 0.2, %v3353_v12  ;;  %v3610_v38 = vmul.f32 0.2, %v3361_v60 }
 0x26f   :  { %4322 = vst [vmem:[#allocation48_spill] sm:$0xff] %v3588_v49  ;;  %4323 = vst [vmem:[#allocation49_spill] sm:$0xff] %v3591_v5  ;;  %v3632_v32 = vmul.f32 0.2, %v3385_v14  ;;  %v3635_v9 = vmul.f32 0.2, %v3389_v19 }
 0x270   :  { %4324 = vst [vmem:[#allocation50_spill] sm:$0xff] %v3594_v4  ;;  %4325 = vst [vmem:[#allocation51_spill] sm:$0xff] %v3598_v41  ;;  %v3624_v41 = vmul.f32 0.2, %v3377_v31  ;;  %v3638_v26 = vmul.f32 0.2, %v3393_v0 }
 0x271   :  { %4326 = vst [vmem:[#allocation52_spill] sm:$0xff] %v3601_v17  ;;  %4327 = vst [vmem:[#allocation53_spill] sm:$0xff] %v3604_v54  ;;  %v3643_v47 = vmul.f32 0.2, %v3397_v24  ;;  %v3646_v43 = vmul.f32 0.2, %v3401_v37 }
 0x272   :  { %4328 = vst [vmem:[#allocation54_spill] sm:$0xff] %v3607_v35  ;;  %4329 = vst [vmem:[#allocation55_spill] sm:$0xff] %v3610_v38  ;;  %v3649_v33 = vmul.f32 0.2, %v3405_v59  ;;  %v3654_v15 = vmul.f32 0.2, %v3409_v27 }
 0x273   :  { %4330 = vst [vmem:[#allocation56_spill] sm:$0xff] %v3613_v45  ;;  %4331 = vst [vmem:[#allocation57_spill] sm:$0xff] %v3616_v34  ;;  %v3657_v23 = vmul.f32 0.2, %v3413_v2  ;;  %v3660_v49 = vmul.f32 0.2, %v3417_v55 }
 0x274   :  { %4332 = vst [vmem:[#allocation58_spill] sm:$0xff] %v3621_v48  ;;  %4333 = vst [vmem:[#allocation59_spill] sm:$0xff] %v3624_v41  ;;  %v3665_v13 = vmul.f32 0.2, %v3421_v36  ;;  %v3668_v59 = vmul.f32 0.2, %v3425_v42 }
 0x275   :  { %4334 = vst [vmem:[#allocation60_spill] sm:$0xff] %v3627_v22  ;;  %4335 = vst [vmem:[#allocation61_spill] sm:$0xff] %v3632_v32  ;;  %v3671_v5 = vmul.f32 0.2, %v3429_v46  ;;  %v3676_v29 = vmul.f32 0.2, %v3433_v40 }
 0x276   :  { %4336 = vst [vmem:[#allocation62_spill] sm:$0xff] %v3635_v9  ;;  %4337 = vst [vmem:[#allocation63_spill] sm:$0xff] %v3638_v26  ;;  %v3679_v55 = vmul.f32 0.2, %v3437_v44  ;;  %v3682_v4 = vmul.f32 0.2, %v3441_v53 }
 0x277   :  { %4338 = vst [vmem:[#allocation64_spill] sm:$0xff] %v3643_v47  ;;  %4339 = vst [vmem:[#allocation65_spill] sm:$0xff] %v3646_v43  ;;  %v3687_v12 = vmul.f32 0.2, %v3445_v58  ;;  %v3690_v46 = vmul.f32 0.2, %v3449_v50  ;;  %v1185_v43 = vmax.f32 %v3409_v27, %v3654_v15  ;;  %v1191_v15 = vmax.f32 %v3433_v40, %v3676_v29 }
 0x278   :  { %v3693_v17 = vmul.f32 0.2, %v3453_v56  ;;  %v3698_v7 = vmul.f32 0.2, %v3457_v1  ;;  %v3701_v53 = vmul.f32 0.2, %v3461_v6  ;;  %v1192_v27 = vmax.f32 %v3437_v44, %v3679_v55 }
 0x279   :  { %v3704_v54 = vmul.f32 0.2, %v3465_v62  ;;  %v3709_v60 = vmul.f32 0.2, %v3469_v39  ;;  %v3712_v56 = vmul.f32 0.2, %v3473_v61 }
 0x27a   :  { %v3715_v35 = vmul.f32 0.2, %v3477_v18  ;;  %v3720_v11 = vmul.f32 0.2, %v3481_v10  ;;  %v3723_v62 = vmul.f32 0.2, %v3485_v16  ;;  %v1198_v29 = vmax.f32 %v3461_v6, %v3701_v53 }
 0x27b   :  { %v3726_v38 = vmul.f32 0.2, %v3489_v21  ;;  %v3731_v57 = vmul.f32 0.2, %v3493_v3  ;;  %v3734_v18 = vmul.f32 0.2, %v3497_v20  ;;  %v1200_v40 = vmax.f32 %v3469_v39, %v3709_v60 }
 0x27c   :  { %4340 = vst [vmem:[#allocation66_spill] sm:$0xff] %v3715_v35  ;;  %v4343_v35 = vld [vmem:[#allocation36_spill] sm:$0xff]  ;;  %v3742_v8 = vmul.f32 0.2, %v3505_v28  ;;  %v4345_v21 = vld [vmem:[#allocation37_spill] sm:$0xff]  ;;  %v4346_v16 = vld [vmem:[#allocation38_spill] sm:$0xff] }
 0x27d   :  { %4341 = vst [vmem:[#allocation67_spill] sm:$0xff] %v3726_v38  ;;  %4342 = vst [vmem:[#allocation68_spill] sm:$0xff] %v3734_v18  ;;  %v3737_v45 = vmul.f32 0.2, %v4343_v35  ;;  %v3745_v38 = vmul.f32 0.2, %v4345_v21 }
 0x27e   :  { %v3748_v34 = vmul.f32 0.2, %v4346_v16  ;;  %v4347_v31 = vld [vmem:[#allocation39_spill] sm:$0xff]  ;;  %v4348_v35 = vld [vmem:[#allocation20_spill] sm:$0xff]  ;;  %v4349_v18 = vld [vmem:[#allocation21_spill] sm:$0xff] }
 0x27f   :  { %4344 = vst [vmem:[#allocation69_spill] sm:$0xff] %v3737_v45  ;;  %v3753_v20 = vmul.f32 0.2, %v4347_v31  ;;  %v3756_v45 = vmul.f32 0.2, %v4348_v35  ;;  %v4355_v35 = vld [vmem:[#allocation7_spill] sm:$0xff] }
 0x280   :  { %v3759_v48 = vmul.f32 0.2, %v4349_v18  ;;  %v3764_v52 = vmul.f32 0.2, %v3529_v25  ;;  %v3767_v16 = vmul.f32 0.2, %v3533_v30 }
 0x281   :  { %v3770_v41 = vmul.f32 0.2, %v3537_v51  ;;  %v3775_v14 = vmul.f32 0.2, %v3541_v63  ;;  %v4353_v18 = vld [vmem:[#allocation4_spill] sm:$0xff]  ;;  %v4362_v0 = vld [vmem:[#allocation42_spill] sm:$0xff] }
 0x282   :  { %4350 = vst [vmem:[#allocation37_spill] sm:$0xff] %v3759_v48  ;;  %4351 = vst [vmem:[#allocation39_spill] sm:$0xff] %v3767_v16  ;;  %v3778_v48 = vmul.f32 0.2, %v4353_v18  ;;  %v3781_v22 = vmul.f32 0.2, %v4355_v35 }
 0x283   :  { %4352 = vst [vmem:[#allocation70_spill] sm:$0xff] %v3770_v41  ;;  %v4357_v19 = vld [vmem:[#allocation16_spill] sm:$0xff]  ;;  %v4360_v16 = vld [vmem:[#allocation41_spill] sm:$0xff]  ;;  %v3797_v18 = vmul.f32 0.2, %v4362_v0  ;;  %v4363_v35 = vld [vmem:[#allocation43_spill] sm:$0xff] }
 0x284   :  { %4354 = vst [vmem:[#allocation71_spill] sm:$0xff] %v3778_v48  ;;  %4356 = vst [vmem:[#allocation72_spill] sm:$0xff] %v3781_v22  ;;  %v3786_v30 = vmul.f32 0.2, %v4357_v19  ;;  %v4358_v51 = vld [vmem:[#allocation40_spill] sm:$0xff]  ;;  %v4365_v47 = vld [vmem:[#allocation26_spill] sm:$0xff] }
 0x285   :  { %v3789_v41 = vmul.f32 0.2, %v4358_v51  ;;  %v3792_v32 = vmul.f32 0.2, %v4360_v16  ;;  %v3800_v22 = vmul.f32 0.2, %v4363_v35  ;;  %v1184_v24 = vmax.f32 %v4365_v47, %v3649_v33 }
 0x286   :  { %v4364_v48 = vld [vmem:[#allocation44_spill] sm:$0xff]  ;;  %v4366_v51 = vld [vmem:[#allocation45_spill] sm:$0xff]  ;;  %v4367_v16 = vld [vmem:[#allocation46_spill] sm:$0xff] }
 0x287   :  { %4359 = vst [vmem:[#allocation73_spill] sm:$0xff] %v3789_v41  ;;  %4361 = vst [vmem:[#allocation74_spill] sm:$0xff] %v3792_v32  ;;  %v3803_v9 = vmul.f32 0.2, %v4364_v48  ;;  %v3808_v41 = vmul.f32 0.2, %v4366_v51  ;;  %v1186_v48 = vmax.f32 %v3413_v2, %v3657_v23  ;;  %v1188_v51 = vmax.f32 %v3421_v36, %v3665_v13 }
 0x288   :  { %v3811_v32 = vmul.f32 0.2, %v4367_v16  ;;  %v4368_v19 = vld [vmem:[#allocation47_spill] sm:$0xff]  ;;  %v1189_v16 = vmax.f32 %v3425_v42, %v3668_v59  ;;  %v4373_v2 = vld [vmem:[#allocation29_spill] sm:$0xff]  ;;  %v1195_v13 = vmax.f32 %v3449_v50, %v3690_v46  ;;  %v4374_v59 = vld [vmem:[#allocation30_spill] sm:$0xff]  ;;  %v1203_v50 = vmax.f32 %v3481_v10, %v3720_v11 }
 0x289   :  { %v3814_v26 = vmul.f32 0.2, %v4368_v19  ;;  %v4370_v37 = vld [vmem:[#allocation51_spill] sm:$0xff]  ;;  %v4372_v19 = vld [vmem:[#allocation28_spill] sm:$0xff]  ;;  %v1193_v23 = vmax.f32 %v4373_v2, %v3682_v4  ;;  %v1196_v36 = vmax.f32 %v4374_v59, %v3693_v17  ;;  %v4376_v44 = vld [vmem:[#allocation66_spill] sm:$0xff]  ;;  %v1210_v11 = vmax.f32 %v4345_v21, %v3745_v38 }
 0x28a   :  { %v3819_v35 = vmul.f32 0.2, %v4370_v37  ;;  %v4371_v47 = vld [vmem:[#allocation27_spill] sm:$0xff]  ;;  %v4377_v46 = vld [vmem:[#allocation32_spill] sm:$0xff]  ;;  %v4380_v53 = vld [vmem:[#allocation34_spill] sm:$0xff]  ;;  %v1212_v2 = vmax.f32 %v4347_v31, %v3753_v20 }
 0x28b   :  { %4369 = vst [vmem:[#allocation42_spill] sm:$0xff] %v3814_v26  ;;  %v1187_v33 = vmax.f32 %v4371_v47, %v3660_v49  ;;  %v1190_v26 = vmax.f32 %v4372_v19, %v3671_v5  ;;  %v1194_v49 = vmax.f32 %v3445_v58, %v3687_v12  ;;  %v1197_v19 = vmax.f32 %v3457_v1, %v3698_v7  ;;  %v4375_v55 = vld [vmem:[#allocation31_spill] sm:$0xff]  ;;  %v4378_v7 = vld [vmem:[#allocation33_spill] sm:$0xff]  ;;  %v4381_v4 = vld [vmem:[#allocation68_spill] sm:$0xff] }
 0x28c   :  { %v1199_v42 = vmax.f32 %v4375_v55, %v3704_v54  ;;  %v1201_v12 = vmax.f32 %v3473_v61, %v3712_v56  ;;  %v1202_v58 = vmax.f32 %v4377_v46, %v4376_v44  ;;  %v1204_v1 = vmax.f32 %v4378_v7, %v3723_v62  ;;  %v4379_v5 = vld [vmem:[#allocation67_spill] sm:$0xff]  ;;  %v4383_v17 = vld [vmem:[#allocation69_spill] sm:$0xff]  ;;  %v4384_v56 = vld [vmem:[#allocation36_spill] sm:$0xff] }
 0x28d   :  { %v1205_v6 = vmax.f32 %v4380_v53, %v4379_v5  ;;  %v1206_v54 = vmax.f32 %v3493_v3, %v3731_v57  ;;  %v4382_v60 = vld [vmem:[#allocation35_spill] sm:$0xff]  ;;  %v1208_v61 = vmax.f32 %v4384_v56, %v4383_v17  ;;  %v1209_v47 = vmax.f32 %v3505_v28, %v3742_v8  ;;  %v4385_v62 = vld [vmem:[#allocation38_spill] sm:$0xff]  ;;  %v4386_v57 = vld [vmem:[#allocation20_spill] sm:$0xff] }
 0x28e   :  { %v1207_v39 = vmax.f32 %v4382_v60, %v4381_v4  ;;  %v1211_v10 = vmax.f32 %v4385_v62, %v3748_v34  ;;  %v1213_v3 = vmax.f32 %v4386_v57, %v3756_v45  ;;  %v4387_v59 = vld [vmem:[#allocation37_spill] sm:$0xff]  ;;  %v1215_v46 = vmax.f32 %v3529_v25, %v3764_v52  ;;  %v4389_v7 = vld [vmem:[#allocation39_spill] sm:$0xff]  ;;  %v4390_v8 = vld [vmem:[#allocation6_spill] sm:$0xff] }
 0x28f   :  { %v4388_v55 = vld [vmem:[#allocation21_spill] sm:$0xff]  ;;  %v1216_v28 = vmax.f32 %v4390_v8, %v4389_v7  ;;  %v4391_v5 = vld [vmem:[#allocation70_spill] sm:$0xff]  ;;  %v1218_v34 = vmax.f32 %v3541_v63, %v3775_v14  ;;  %v4393_v53 = vld [vmem:[#allocation71_spill] sm:$0xff]  ;;  %v1224_v7 = vmax.f32 %v4362_v0, %v3797_v18 }
 0x290   :  { %v1214_v44 = vmax.f32 %v4388_v55, %v4387_v59  ;;  %v4392_v21 = vld [vmem:[#allocation9_spill] sm:$0xff]  ;;  %v4394_v31 = vld [vmem:[#allocation4_spill] sm:$0xff]  ;;  %v4396_v45 = vld [vmem:[#allocation7_spill] sm:$0xff] }
 0x291   :  { %v1217_v38 = vmax.f32 %v4392_v21, %v4391_v5  ;;  %v1219_v20 = vmax.f32 %v4394_v31, %v4393_v53  ;;  %v4395_v4 = vld [vmem:[#allocation72_spill] sm:$0xff]  ;;  %v4398_v62 = vld [vmem:[#allocation73_spill] sm:$0xff]  ;;  %v4400_v57 = vld [vmem:[#allocation74_spill] sm:$0xff] }
 0x292   :  { %v1220_v60 = vmax.f32 %v4396_v45, %v4395_v4  ;;  %v4397_v17 = vld [vmem:[#allocation16_spill] sm:$0xff]  ;;  %v4401_v59 = vld [vmem:[#allocation41_spill] sm:$0xff]  ;;  %v4402_v14 = vld [vmem:[#allocation43_spill] sm:$0xff] }
 0x293   :  { %v1221_v56 = vmax.f32 %v4397_v17, %v3786_v30  ;;  %v4399_v52 = vld [vmem:[#allocation40_spill] sm:$0xff]  ;;  %v1223_v55 = vmax.f32 %v4401_v59, %v4400_v57  ;;  %v1225_v63 = vmax.f32 %v4402_v14, %v3800_v22  ;;  %v4404_v21 = vld [vmem:[#allocation45_spill] sm:$0xff]  ;;  %v4405_v30 = vld [vmem:[#allocation46_spill] sm:$0xff] }
 0x294   :  { %v1222_v25 = vmax.f32 %v4399_v52, %v4398_v62  ;;  %v4403_v8 = vld [vmem:[#allocation44_spill] sm:$0xff]  ;;  %v1227_v53 = vmax.f32 %v4404_v21, %v3808_v41  ;;  %v1228_v31 = vmax.f32 %v4405_v30, %v3811_v32  ;;  %v4406_v4 = vld [vmem:[#allocation42_spill] sm:$0xff]  ;;  %v4407_v45 = vld [vmem:[#allocation47_spill] sm:$0xff]  ;;  %v1230_v62 = vmax.f32 %v4370_v37, %v3819_v35 }
 0x295   :  { %v1226_v5 = vmax.f32 %v4403_v8, %v3803_v9  ;;  %v1229_v17 = vmax.f32 %v4407_v45, %v4406_v4  ;;  %v4408_v52 = vld [vmem:[#allocation10_spill] sm:$0xff]  ;;  %v4409_v0 = vld [vmem:[#allocation48_spill] sm:$0xff]  ;;  %v4411_v57 = vld [vmem:[#allocation5_spill] sm:$0xff] }
 0x296   :  { %v4410_v18 = vmax.f32 %v4408_v52, %v4409_v0  ;;  %v4412_v22 = vld [vmem:[#allocation49_spill] sm:$0xff]  ;;  %v4414_v9 = vld [vmem:[#allocation8_spill] sm:$0xff]  ;;  %v4415_v8 = vld [vmem:[#allocation50_spill] sm:$0xff] }
 0x297   :  { %v4413_v59 = vmax.f32 %v4411_v57, %v4412_v22  ;;  %v4416_v21 = vmax.f32 %v4414_v9, %v4415_v8  ;;  %v4417_v41 = vld [vmem:[#allocation13_spill] sm:$0xff]  ;;  %v4418_v30 = vld [vmem:[#allocation52_spill] sm:$0xff]  ;;  %v4420_v45 = vld [vmem:[#allocation22_spill] sm:$0xff] }
 0x298   :  { %v4419_v32 = vmax.f32 %v4417_v41, %v4418_v30  ;;  %v4421_v35 = vld [vmem:[#allocation53_spill] sm:$0xff]  ;;  %v4423_v0 = vld [vmem:[#allocation23_spill] sm:$0xff]  ;;  %v4424_v52 = vld [vmem:[#allocation54_spill] sm:$0xff] }
 0x299   :  { %v1728_v14 = vpack.c.bf16 %v4413_v59, %v4410_v18  ;;  %v4422_v37 = vmax.f32 %v4420_v45, %v4421_v35  ;;  %v4425_v22 = vmax.f32 %v4423_v0, %v4424_v52  ;;  %v4426_v18 = vld [vmem:[#allocation15_spill] sm:$0xff]  ;;  %v4430_v30 = vld [vmem:[#allocation56_spill] sm:$0xff]  ;;  %v4433_v35 = vld [vmem:[#allocation57_spill] sm:$0xff] }
 0x29a   :  { %v1733_v4 = vpack.c.bf16 %v4419_v32, %v4416_v21  ;;  %v4427_v59 = vld [vmem:[#allocation55_spill] sm:$0xff]  ;;  %v4432_v32 = vld [vmem:[#allocation2_spill] sm:$0xff] }
 0x29b   :  { %v1738_v57 = vpack.c.bf16 %v4425_v22, %v4422_v37  ;;  %v4428_v8 = vmax.f32 %v4426_v18, %v4427_v59  ;;  %v4429_v9 = vld [vmem:[#allocation11_spill] sm:$0xff]  ;;  %v4434_v45 = vmax.f32 %v4432_v32, %v4433_v35  ;;  %v4436_v52 = vld [vmem:[#allocation58_spill] sm:$0xff]  ;;  %v4438_v18 = vld [vmem:[#allocation12_spill] sm:$0xff]  ;;  %1729 = vst [vmem:[%s4062_s4] sm:$0xff] %v1728_v14  }
 0x29c   :  { %v4431_v41 = vmax.f32 %v4429_v9, %v4430_v30  ;;  %v4435_v0 = vld [vmem:[#allocation3_spill] sm:$0xff]  ;;  %v4441_v30 = vld [vmem:[#allocation14_spill] sm:$0xff]  ;;  %1885 = vst [vmem:[%s4062_s4 + $0x8] sm:$0xff] %v1733_v4   ;;  %v4444_v35 = vld [vmem:[#allocation24_spill] sm:$0xff] }
 0x29d   :  { %v4437_v22 = vmax.f32 %v4435_v0, %v4436_v52  ;;  %v4439_v59 = vld [vmem:[#allocation59_spill] sm:$0xff]  ;;  %v4445_v0 = vld [vmem:[#allocation61_spill] sm:$0xff]  ;;  %v4454_v14 = vld [vmem:[#allocation64_spill] sm:$0xff]  ;;  %1886 = vst [vmem:[%s4062_s4 + $0x10] sm:$0xff] %v1738_v57  }
 0x29e   :  { %v1743_v21 = vpack.c.bf16 %v4431_v41, %v4428_v8  ;;  %v4440_v9 = vmax.f32 %v4438_v18, %v4439_v59  ;;  %v4442_v8 = vld [vmem:[#allocation60_spill] sm:$0xff]  ;;  %v4446_v52 = vmax.f32 %v4444_v35, %v4445_v0  ;;  %v4456_v35 = vld [vmem:[#allocation25_spill] sm:$0xff] }
 0x29f   :  { %v1748_v37 = vpack.c.bf16 %v4437_v22, %v4434_v45  ;;  %v4443_v41 = vmax.f32 %v4441_v30, %v4442_v8  ;;  %v4447_v22 = vld [vmem:[#allocation17_spill] sm:$0xff]  ;;  %v4448_v45 = vld [vmem:[#allocation62_spill] sm:$0xff]  ;;  %v4451_v30 = vld [vmem:[#allocation63_spill] sm:$0xff] }
 0x2a0   :  { %v4449_v18 = vmax.f32 %v4447_v22, %v4448_v45  ;;  %v4450_v8 = vld [vmem:[#allocation18_spill] sm:$0xff]  ;;  %v4457_v22 = vld [vmem:[#allocation65_spill] sm:$0xff]  ;;  %1887 = vst [vmem:[%s4062_s4 + $0x18] sm:$0xff] %v1743_v21  }
 0x2a1   :  { %v1753_v32 = vpack.c.bf16 %v4443_v41, %v4440_v9  ;;  %v4452_v9 = vmax.f32 %v4450_v8, %v4451_v30  ;;  %v4453_v41 = vld [vmem:[#allocation19_spill] sm:$0xff]  ;;  %v4458_v45 = vmax.f32 %v4456_v35, %v4457_v22  ;;  %1888 = vst [vmem:[%s4062_s4 + $0x20] sm:$0xff] %v1748_v37   ;;  %v1778_v8 = vpack.c.bf16 %v1188_v51, %v1187_v33 }
 0x2a2   :  { %v1758_v59 = vpack.c.bf16 %v4449_v18, %v4446_v52  ;;  %v4455_v4 = vmax.f32 %v4453_v41, %v4454_v14  ;;  %v1773_v52 = vpack.c.bf16 %v1186_v48, %v1185_v43  ;;  %v1783_v30 = vpack.c.bf16 %v1190_v26, %v1189_v16 }
 0x2a3   :  { %v1768_v18 = vpack.c.bf16 %v1184_v24, %v4458_v45  ;;  %1889 = vst [vmem:[%s4062_s4 + $0x28] sm:$0xff] %v1753_v32   ;;  %v1788_v24 = vpack.c.bf16 %v1192_v27, %v1191_v15  ;;  %v1793_v43 = vpack.c.bf16 %v1194_v49, %v1193_v23  ;;  %v1798_v51 = vpack.c.bf16 %v1196_v36, %v1195_v13 }
 0x2a4   :  { %v1763_v0 = vpack.c.bf16 %v4455_v4, %v4452_v9  ;;  %1890 = vst [vmem:[%s4062_s4 + $0x30] sm:$0xff] %v1758_v59   ;;  %1893 = vst [vmem:[%s4062_s4 + $0x48] sm:$0xff] %v1773_v52   ;;  %v1803_v16 = vpack.c.bf16 %v1198_v29, %v1197_v19  ;;  %v1808_v26 = vpack.c.bf16 %v1200_v40, %v1199_v42 }
 0x2a5   :  { %1892 = vst [vmem:[%s4062_s4 + $0x40] sm:$0xff] %v1768_v18   ;;  %v1813_v48 = vpack.c.bf16 %v1202_v58, %v1201_v12  ;;  %1894 = vst [vmem:[%s4062_s4 + $0x50] sm:$0xff] %v1778_v8   ;;  %v1818_v33 = vpack.c.bf16 %v1204_v1, %v1203_v50  ;;  %v1823_v15 = vpack.c.bf16 %v1206_v54, %v1205_v6 }
 0x2a6   :  { %1891 = vst [vmem:[%s4062_s4 + $0x38] sm:$0xff] %v1763_v0   ;;  %1895 = vst [vmem:[%s4062_s4 + $0x58] sm:$0xff] %v1783_v30   ;;  %v1828_v27 = vpack.c.bf16 %v1208_v61, %v1207_v39  ;;  %v1833_v23 = vpack.c.bf16 %v1210_v11, %v1209_v47  ;;  %v1838_v49 = vpack.c.bf16 %v1212_v2, %v1211_v10 }
 0x2a7   :  { %1896 = vst [vmem:[%s4062_s4 + $0x60] sm:$0xff] %v1788_v24   ;;  %1897 = vst [vmem:[%s4062_s4 + $0x68] sm:$0xff] %v1793_v43   ;;  %v1843_v13 = vpack.c.bf16 %v1214_v44, %v1213_v3  ;;  %v1848_v36 = vpack.c.bf16 %v1216_v28, %v1215_v46  ;;  %v1853_v19 = vpack.c.bf16 %v1218_v34, %v1217_v38 }
 0x2a8   :  { %1898 = vst [vmem:[%s4062_s4 + $0x70] sm:$0xff] %v1798_v51   ;;  %1899 = vst [vmem:[%s4062_s4 + $0x78] sm:$0xff] %v1803_v16   ;;  %v1858_v29 = vpack.c.bf16 %v1220_v60, %v1219_v20  ;;  %v1863_v42 = vpack.c.bf16 %v1222_v25, %v1221_v56  ;;  %v1868_v40 = vpack.c.bf16 %v1224_v7, %v1223_v55 }
 0x2a9   :  { %1900 = vst [vmem:[%s4062_s4 + $0x80] sm:$0xff] %v1808_v26   ;;  %1901 = vst [vmem:[%s4062_s4 + $0x88] sm:$0xff] %v1813_v48   ;;  %v1873_v12 = vpack.c.bf16 %v1226_v5, %v1225_v63  ;;  %v1878_v58 = vpack.c.bf16 %v1228_v31, %v1227_v53  ;;  %v1883_v50 = vpack.c.bf16 %v1230_v62, %v1229_v17 }
 0x2aa   :  { %1902 = vst [vmem:[%s4062_s4 + $0x90] sm:$0xff] %v1818_v33   ;;  %1903 = vst [vmem:[%s4062_s4 + $0x98] sm:$0xff] %v1823_v15  }
 0x2ab   :  { %1904 = vst [vmem:[%s4062_s4 + $0xa0] sm:$0xff] %v1828_v27   ;;  %1905 = vst [vmem:[%s4062_s4 + $0xa8] sm:$0xff] %v1833_v23  }
 0x2ac   :  { %1906 = vst [vmem:[%s4062_s4 + $0xb0] sm:$0xff] %v1838_v49   ;;  %1907 = vst [vmem:[%s4062_s4 + $0xb8] sm:$0xff] %v1843_v13  }
 0x2ad   :  { %1908 = vst [vmem:[%s4062_s4 + $0xc0] sm:$0xff] %v1848_v36   ;;  %1909 = vst [vmem:[%s4062_s4 + $0xc8] sm:$0xff] %v1853_v19  }
 0x2ae   :  { %1910 = vst [vmem:[%s4062_s4 + $0xd0] sm:$0xff] %v1858_v29   ;;  %1911 = vst [vmem:[%s4062_s4 + $0xd8] sm:$0xff] %v1863_v42  }
 0x2af   :  { %1912 = vst [vmem:[%s4062_s4 + $0xe0] sm:$0xff] %v1868_v40   ;;  %1913 = vst [vmem:[%s4062_s4 + $0xe8] sm:$0xff] %v1873_v12  }
 0x2b0   :  { %1914 = vst [vmem:[%s4062_s4 + $0xf0] sm:$0xff] %v1878_v58   ;;  %1915 = vst [vmem:[%s4062_s4 + $0xf8] sm:$0xff] %v1883_v50  }

// kernel: discriminator_forward.7
= control target key start
LH: loop header
LB: loop body
LE: loop exit
PB: predicated region body
PF: predicated region fallthrough
CT: control target
= control target key end

     0   :  { %s993_s1 = inlined_call_operand.vmem [shape: bf16[256,128], index: 1, kind: input, shape index: {}]   ;;  %s994_s0 = inlined_call_operand.vmem [shape: bf16[128,256], index: 0, kind: input, shape index: {}]   ;;  %s995_s2 = inlined_call_operand.vmem [shape: f32[1,128], index: 2, kind: input, shape index: {}]   ;;  %s996_s3 = inlined_call_operand.vmem [shape: f32[1,128], index: 3, kind: input, shape index: {}]   ;;  %s997_s4 = inlined_call_operand.vmem [shape: bf16[128,128], index: 4, kind: output, shape index: {}]  }
   0x1   :  { %v788_v0 = vld [vmem:[%s993_s1 + $0x40] sm:$0xff]   ;;  %v790_v2 = vld [vmem:[%s993_s1 + $0x48] sm:$0xff]   ;;  %v792_v4 = vld [vmem:[%s993_s1 + $0x50] sm:$0xff]  }
   0x2   :  { %v789_v1 = vld [vmem:[%s993_s1] sm:$0xff]   ;;  %708 = vmatprep.subr.bf16.mxu0 %v788_v0  ;;  %772 = vmatprep.subr.bf16.mxu1 %v788_v0  ;;  %v791_v3 = vld [vmem:[%s993_s1 + $0x8] sm:$0xff]   ;;  %v793_v5 = vld [vmem:[%s993_s1 + $0x10] sm:$0xff]  }
   0x3   :  { %709 = vmatpush3.bf16.msra.mxu0 %v789_v1  ;;  %780 = vmatpush3.bf16.msra.mxu1 %v789_v1  ;;  %v794_v6 = vld [vmem:[%s993_s1 + $0x58] sm:$0xff]   ;;  %v796_v8 = vld [vmem:[%s993_s1 + $0x60] sm:$0xff]   ;;  %v798_v10 = vld [vmem:[%s993_s1 + $0x68] sm:$0xff]  }
   0x4   :  { %710 = vmatprep.subr.bf16.mxu0 %v790_v2  ;;  %773 = vmatprep.subr.bf16.mxu1 %v790_v2  ;;  %v795_v7 = vld [vmem:[%s993_s1 + $0x18] sm:$0xff]   ;;  %v797_v9 = vld [vmem:[%s993_s1 + $0x20] sm:$0xff]   ;;  %v799_v12 = vld [vmem:[%s993_s1 + $0x28] sm:$0xff]  }
   0x5   :  { %v806_v11 = vld [vmem:[%s994_s0 + $0x4] ss:$8 sps:$4 sm:$0xff]   ;;  %v800_v14 = vld [vmem:[%s993_s1 + $0x70] sm:$0xff]   ;;  %v802_v16 = vld [vmem:[%s993_s1 + $0x78] sm:$0xff]  }
   0x6   :  { %v812_v13 = vld [vmem:[%s994_s0 + $0x44] ss:$8 sps:$4 sm:$0xff]   ;;  %274 = vmatprep.mubr.bf16.mxu0 %v806_v11  ;;  %v801_v15 = vld [vmem:[%s993_s1 + $0x30] sm:$0xff]   ;;  %v803_v17 = vld [vmem:[%s993_s1 + $0x38] sm:$0xff]  }
   0x7   :  { %711 = vmatpush3.bf16.msra.mxu0 %v791_v3  ;;  %781 = vmatpush3.bf16.msra.mxu1 %v791_v3  ;;  %v804_v18 = vld [vmem:[%s994_s0] ss:$8 sps:$4 sm:$0xff]   ;;  %v807_v20 = vld [vmem:[%s994_s0 + $0x14] ss:$8 sps:$4 sm:$0xff]   ;;  %v809_v22 = vld [vmem:[%s994_s0 + $0x10] ss:$8 sps:$4 sm:$0xff]  }
   0x8   :  { %712 = vmatprep.subr.bf16.mxu0 %v792_v4  ;;  %774 = vmatprep.subr.bf16.mxu1 %v792_v4  ;;  %v810_v19 = vld [vmem:[%s994_s0 + $0x40] ss:$8 sps:$4 sm:$0xff]   ;;  %v816_v21 = vld [vmem:[%s994_s0 + $0x54] ss:$8 sps:$4 sm:$0xff]   ;;  %v818_v23 = vld [vmem:[%s994_s0 + $0x50] ss:$8 sps:$4 sm:$0xff]  }
   0x9   :  { %306 = vmatprep.mubr.bf16.mxu1 %v812_v13  ;;  %v813_v24 = vld [vmem:[%s994_s0 + $0x24] ss:$8 sps:$4 sm:$0xff]   ;;  %v815_v26 = vld [vmem:[%s994_s0 + $0x20] ss:$8 sps:$4 sm:$0xff]   ;;  %v819_v28 = vld [vmem:[%s994_s0 + $0x34] ss:$8 sps:$4 sm:$0xff]  }
   0xa   :  { %v822_v25 = vld [vmem:[%s994_s0 + $0x64] ss:$8 sps:$4 sm:$0xff]   ;;  %v824_v27 = vld [vmem:[%s994_s0 + $0x60] ss:$8 sps:$4 sm:$0xff]   ;;  %v825_v29 = vld [vmem:[%s994_s0 + $0x74] ss:$8 sps:$4 sm:$0xff]  }
   0xb   :  { %713 = vmatpush3.bf16.msra.mxu0 %v793_v5  ;;  %782 = vmatpush3.bf16.msra.mxu1 %v793_v5  ;;  %v821_v30 = vld [vmem:[%s994_s0 + $0x30] ss:$8 sps:$4 sm:$0xff]  }
   0xc   :  { %714 = vmatprep.subr.bf16.mxu0 %v794_v6  ;;  %775 = vmatprep.subr.bf16.mxu1 %v794_v6  ;;  %v827_v31 = vld [vmem:[%s994_s0 + $0x70] ss:$8 sps:$4 sm:$0xff]  }
   0xf   :  { %715 = vmatpush3.bf16.msra.mxu0 %v795_v7  ;;  %783 = vmatpush3.bf16.msra.mxu1 %v795_v7 }
  0x10   :  { %716 = vmatprep.subr.bf16.mxu0 %v796_v8  ;;  %776 = vmatprep.subr.bf16.mxu1 %v796_v8 }
  0x13   :  { %717 = vmatpush3.bf16.msra.mxu0 %v797_v9  ;;  %784 = vmatpush3.bf16.msra.mxu1 %v797_v9 }
  0x14   :  { %718 = vmatprep.subr.bf16.mxu0 %v798_v10  ;;  %777 = vmatprep.subr.bf16.mxu1 %v798_v10 }
  0x17   :  { %719 = vmatpush3.bf16.msra.mxu0 %v799_v12  ;;  %785 = vmatpush3.bf16.msra.mxu1 %v799_v12 }
  0x18   :  { %720 = vmatprep.subr.bf16.mxu0 %v800_v14  ;;  %778 = vmatprep.subr.bf16.mxu1 %v800_v14 }
  0x1b   :  { %721 = vmatpush3.bf16.msra.mxu0 %v801_v15  ;;  %786 = vmatpush3.bf16.msra.mxu1 %v801_v15 }
  0x1c   :  { %722 = vmatprep.subr.bf16.mxu0 %v802_v16  ;;  %779 = vmatprep.subr.bf16.mxu1 %v802_v16 }
  0x1f   :  { %723 = vmatpush3.bf16.msra.mxu0 %v803_v17  ;;  %787 = vmatpush3.bf16.msra.mxu1 %v803_v17 }
  0x22   :  { %275 = vmatmul.mubr.bf16.vlgmr.msra.gmra.mrb[0].mxu0 %v804_v18  ;;  %307 = vmatmul.mubr.bf16.vlgmr.msra.gmra.mrb[0].mxu1 %v810_v19 }
  0x23   :  { %282 = vmatprep.mubr.bf16.mxu0 %v807_v20  ;;  %314 = vmatprep.mubr.bf16.mxu1 %v816_v21 }
  0x2a   :  { %283 = vmatmul.mubr.bf16.gmra.mrb[4].mxu0 %v809_v22  ;;  %315 = vmatmul.mubr.bf16.gmra.mrb[4].mxu1 %v818_v23 }
  0x2b   :  { %290 = vmatprep.mubr.bf16.mxu0 %v813_v24  ;;  %322 = vmatprep.mubr.bf16.mxu1 %v822_v25 }
  0x32   :  { %291 = vmatmul.mubr.bf16.gmra.mrb[8].mxu0 %v815_v26  ;;  %323 = vmatmul.mubr.bf16.gmra.mrb[8].mxu1 %v824_v27 }
  0x33   :  { %298 = vmatprep.mubr.bf16.mxu0 %v819_v28  ;;  %330 = vmatprep.mubr.bf16.mxu1 %v825_v29 }
  0x3a   :  { %299 = vmatmul.mubr.bf16.gmra.mrb[12].mxu0 %v821_v30  ;;  %331 = vmatmul.mubr.bf16.gmra.mrb[12].mxu1 %v827_v31 }
  0xf5   :  { %v724_v32 = vpop.f32.mrb[0].mxu0  ;;  %v748_v33 = vpop.f32.mrb[0].mxu1 }
  0xf6   :  { %v725_v34 = vpop.f32.mrb[1].mxu0  ;;  %v749_v35 = vpop.f32.mrb[1].mxu1 }
  0xf7   :  { %v951_v36 = vadd.f32 %v725_v34, %v724_v32  ;;  %v727_v37 = vpop.f32.mrb[2].mxu0  ;;  %v953_v38 = vadd.f32 %v749_v35, %v748_v33  ;;  %v751_v39 = vpop.f32.mrb[2].mxu1 }
  0xf8   :  { %v728_v40 = vpop.f32.mrb[3].mxu0  ;;  %v752_v41 = vpop.f32.mrb[3].mxu1 }
  0xf9   :  { %v729_v42 = vadd.f32 %v728_v40, %v727_v37  ;;  %v955_v43 = vadd.f32 %v752_v41, %v751_v39 }
  0xfb   :  { %v339_v44 = vadd.f32 %v729_v42, %v951_v36 }
  0xfd   :  { %v730_v45 = vpop.f32.mrb[4].mxu0  ;;  %v754_v46 = vpop.f32.mrb[4].mxu1 }
  0xfe   :  { %v731_v47 = vpop.f32.mrb[5].mxu0  ;;  %v755_v48 = vpop.f32.mrb[5].mxu1 }
  0xff   :  { %v732_v49 = vadd.f32 %v731_v47, %v730_v45  ;;  %v733_v50 = vpop.f32.mrb[6].mxu0  ;;  %v756_v51 = vadd.f32 %v755_v48, %v754_v46  ;;  %v757_v52 = vpop.f32.mrb[6].mxu1 }
 0x100   :  { %v734_v53 = vpop.f32.mrb[7].mxu0  ;;  %v758_v54 = vpop.f32.mrb[7].mxu1 }
 0x101   :  { %v340_v55 = vadd.f32 %v732_v49, %v339_v44  ;;  %v735_v56 = vadd.f32 %v734_v53, %v733_v50  ;;  %v759_v57 = vadd.f32 %v758_v54, %v757_v52 }
 0x103   :  { %v341_v58 = vadd.f32 %v735_v56, %v340_v55 }
 0x105   :  { %v736_v59 = vpop.f32.mrb[8].mxu0  ;;  %v760_v60 = vpop.f32.mrb[8].mxu1 }
 0x106   :  { %v737_v61 = vpop.f32.mrb[9].mxu0  ;;  %v761_v62 = vpop.f32.mrb[9].mxu1 }
 0x107   :  { %v738_v63 = vadd.f32 %v737_v61, %v736_v59  ;;  %v739_v0 = vpop.f32.mrb[10].mxu0  ;;  %v762_v1 = vadd.f32 %v761_v62, %v760_v60  ;;  %v763_v2 = vpop.f32.mrb[10].mxu1 }
 0x108   :  { %v740_v3 = vpop.f32.mrb[11].mxu0  ;;  %v764_v4 = vpop.f32.mrb[11].mxu1 }
 0x109   :  { %v342_v5 = vadd.f32 %v738_v63, %v341_v58  ;;  %v741_v6 = vadd.f32 %v740_v3, %v739_v0  ;;  %v765_v7 = vadd.f32 %v764_v4, %v763_v2 }
 0x10b   :  { %v343_v8 = vadd.f32 %v741_v6, %v342_v5 }
 0x10d   :  { %v742_v9 = vpop.f32.mrb[12].mxu0  ;;  %v766_v10 = vpop.f32.mrb[12].mxu1 }
 0x10e   :  { %v743_v11 = vpop.f32.mrb[13].mxu0  ;;  %v767_v12 = vpop.f32.mrb[13].mxu1 }
 0x10f   :  { %v744_v13 = vadd.f32 %v743_v11, %v742_v9  ;;  %v745_v14 = vpop.f32.mrb[14].mxu0  ;;  %v768_v15 = vadd.f32 %v767_v12, %v766_v10  ;;  %v769_v16 = vpop.f32.mrb[14].mxu1 }
 0x110   :  { %v746_v17 = vpop.f32.mrb[15].mxu0  ;;  %v770_v18 = vpop.f32.mrb[15].mxu1 }
 0x111   :  { %v344_v19 = vadd.f32 %v744_v13, %v343_v8  ;;  %v747_v20 = vadd.f32 %v746_v17, %v745_v14  ;;  %v771_v21 = vadd.f32 %v770_v18, %v769_v16 }
 0x113   :  { %v345_v22 = vadd.f32 %v747_v20, %v344_v19 }
 0x115   :  { %v346_v23 = vadd.f32 %v953_v38, %v345_v22 }
 0x117   :  { %v347_v24 = vadd.f32 %v955_v43, %v346_v23 }
 0x119   :  { %v348_v25 = vadd.f32 %v756_v51, %v347_v24 }
 0x11b   :  { %v349_v26 = vadd.f32 %v759_v57, %v348_v25 }
 0x11d   :  { %v350_v27 = vadd.f32 %v762_v1, %v349_v26 }
 0x11f   :  { %v351_v28 = vadd.f32 %v765_v7, %v350_v27 }
 0x121   :  { %v352_v29 = vadd.f32 %v768_v15, %v351_v28 }
 0x123   :  { %v353_v30 = vadd.f32 %v771_v21, %v352_v29 }
 0x125   :  { %v354_v31 = vrot.slane %v353_v30, 4 }
 0x127   :  { %v355_v32 = vadd.f32 %v354_v31, %v353_v30 }
 0x129   :  { %v356_v33 = vrot.slane %v355_v32, 2 }
 0x12b   :  { %v357_v34 = vadd.f32 %v356_v33, %v355_v32 }
 0x12d   :  { %v358_v35 = vrot.slane %v357_v34, 1 }
 0x12f   :  { %v359_v37 = vadd.f32 %v358_v35, %v357_v34 }
 0x131   :  { %v360_v39 = vmul.f32 0.0078125, %v359_v37 }
 0x133   :  { %v361_v40 = vsub.f32 %v951_v36, %v360_v39  ;;  %v362_v41 = vsub.f32 %v729_v42, %v360_v39  ;;  %v363_v44 = vsub.f32 %v732_v49, %v360_v39  ;;  %v364_v45 = vsub.f32 %v735_v56, %v360_v39 }
 0x134   :  { %v365_v46 = vsub.f32 %v738_v63, %v360_v39  ;;  %v366_v47 = vsub.f32 %v741_v6, %v360_v39  ;;  %v367_v48 = vsub.f32 %v744_v13, %v360_v39  ;;  %v368_v50 = vsub.f32 %v747_v20, %v360_v39 }
 0x135   :  { %v369_v52 = vsub.f32 %v953_v38, %v360_v39  ;;  %v370_v53 = vsub.f32 %v955_v43, %v360_v39  ;;  %v371_v54 = vsub.f32 %v756_v51, %v360_v39  ;;  %v372_v55 = vsub.f32 %v759_v57, %v360_v39 }
 0x136   :  { %v373_v58 = vsub.f32 %v762_v1, %v360_v39  ;;  %v374_v59 = vsub.f32 %v765_v7, %v360_v39  ;;  %v375_v60 = vsub.f32 %v768_v15, %v360_v39  ;;  %v376_v61 = vsub.f32 %v771_v21, %v360_v39 }
 0x137   :  { %v377_v62 = vmul.f32 %v361_v40, %v361_v40  ;;  %v378_v0 = vmul.f32 %v362_v41, %v362_v41  ;;  %v379_v36 = vmul.f32 %v363_v44, %v363_v44  ;;  %v380_v49 = vmul.f32 %v364_v45, %v364_v45 }
 0x138   :  { %v381_v63 = vmul.f32 %v365_v46, %v365_v46  ;;  %v382_v3 = vmul.f32 %v366_v47, %v366_v47  ;;  %v383_v5 = vmul.f32 %v367_v48, %v367_v48  ;;  %v384_v6 = vmul.f32 %v368_v50, %v368_v50 }
 0x139   :  { %v393_v42 = vadd.f32 %v378_v0, %v377_v62  ;;  %v385_v51 = vmul.f32 %v369_v52, %v369_v52  ;;  %v386_v1 = vmul.f32 %v370_v53, %v370_v53  ;;  %v387_v8 = vmul.f32 %v371_v54, %v371_v54  ;;  %v627_v62 = vld [vmem:[%s995_s2] ss:$0 sm:$0xff] }
 0x13a   :  { %v388_v10 = vmul.f32 %v372_v55, %v372_v55  ;;  %v389_v12 = vmul.f32 %v373_v58, %v373_v58  ;;  %v390_v14 = vmul.f32 %v374_v59, %v374_v59  ;;  %v391_v16 = vmul.f32 %v375_v60, %v375_v60 }
 0x13b   :  { %v394_v56 = vadd.f32 %v393_v42, %v379_v36  ;;  %v392_v18 = vmul.f32 %v376_v61, %v376_v61 }
 0x13d   :  { %v395_v2 = vadd.f32 %v394_v56, %v380_v49 }
 0x13f   :  { %v396_v4 = vadd.f32 %v395_v2, %v381_v63 }
 0x141   :  { %v397_v38 = vadd.f32 %v396_v4, %v382_v3 }
 0x143   :  { %v398_v43 = vadd.f32 %v397_v38, %v383_v5 }
 0x145   :  { %v399_v57 = vadd.f32 %v398_v43, %v384_v6 }
 0x147   :  { %v400_v7 = vadd.f32 %v399_v57, %v385_v51 }
 0x149   :  { %v401_v9 = vadd.f32 %v400_v7, %v386_v1 }
 0x14b   :  { %v402_v11 = vadd.f32 %v401_v9, %v387_v8 }
 0x14d   :  { %v403_v13 = vadd.f32 %v402_v11, %v388_v10 }
 0x14f   :  { %v404_v15 = vadd.f32 %v403_v13, %v389_v12 }
 0x151   :  { %v405_v17 = vadd.f32 %v404_v15, %v390_v14 }
 0x153   :  { %v406_v19 = vadd.f32 %v405_v17, %v391_v16 }
 0x155   :  { %v407_v20 = vadd.f32 %v406_v19, %v392_v18 }
 0x157   :  { %v408_v21 = vrot.slane %v407_v20, 4 }
 0x159   :  { %v409_v22 = vadd.f32 %v408_v21, %v407_v20 }
 0x15b   :  { %v410_v23 = vrot.slane %v409_v22, 2 }
 0x15d   :  { %v411_v24 = vadd.f32 %v410_v23, %v409_v22 }
 0x15f   :  { %v412_v25 = vrot.slane %v411_v24, 1 }
 0x161   :  { %v413_v26 = vadd.f32 %v412_v25, %v411_v24 }
 0x163   :  { %v414_v27 = vmul.f32 0.0078125, %v413_v26 }
 0x165   :  { %v415_v28 = vadd.f32 1e-05, %v414_v27 }
 0x167   :  { %828 = vrsqrt.f32 %v415_v28 }
 0x171   :  { %v829_v29 = vpop.eup %828 }
 0x172   :  { %v417_v30 = vmul.f32 %v829_v29, %v361_v40  ;;  %v418_v31 = vmul.f32 %v829_v29, %v362_v41  ;;  %v419_v32 = vmul.f32 %v829_v29, %v363_v44  ;;  %v420_v33 = vmul.f32 %v829_v29, %v364_v45 }
 0x173   :  { %v421_v34 = vmul.f32 %v829_v29, %v365_v46  ;;  %v422_v35 = vmul.f32 %v829_v29, %v366_v47  ;;  %v423_v37 = vmul.f32 %v829_v29, %v367_v48  ;;  %v424_v39 = vmul.f32 %v829_v29, %v368_v50  ;;  %v628_v48 = vld [vmem:[%s996_s3] ss:$0 sm:$0xff] }
 0x174   :  { %v425_v0 = vmul.f32 %v829_v29, %v369_v52  ;;  %v426_v36 = vmul.f32 %v829_v29, %v370_v53  ;;  %v427_v42 = vmul.f32 %v829_v29, %v371_v54  ;;  %v428_v49 = vmul.f32 %v829_v29, %v372_v55 }
 0x175   :  { %v429_v56 = vmul.f32 %v829_v29, %v373_v58  ;;  %v430_v63 = vmul.f32 %v829_v29, %v374_v59  ;;  %v431_v2 = vmul.f32 %v829_v29, %v375_v60  ;;  %v432_v3 = vmul.f32 %v829_v29, %v376_v61 }
 0x176   :  { %v440_v40 = vmul.f32 %v627_v62, %v417_v30  ;;  %v441_v41 = vmul.f32 %v627_v62, %v418_v31  ;;  %v442_v44 = vmul.f32 %v627_v62, %v419_v32  ;;  %v443_v45 = vmul.f32 %v627_v62, %v420_v33 }
 0x177   :  { %v444_v46 = vmul.f32 %v627_v62, %v421_v34  ;;  %v445_v47 = vmul.f32 %v627_v62, %v422_v35  ;;  %v446_v50 = vmul.f32 %v627_v62, %v423_v37  ;;  %v447_v4 = vmul.f32 %v627_v62, %v424_v39 }
 0x178   :  { %v448_v52 = vmul.f32 %v627_v62, %v425_v0  ;;  %v449_v53 = vmul.f32 %v627_v62, %v426_v36  ;;  %v450_v54 = vmul.f32 %v627_v62, %v427_v42  ;;  %v451_v55 = vmul.f32 %v627_v62, %v428_v49 }
 0x179   :  { %v452_v58 = vmul.f32 %v627_v62, %v429_v56  ;;  %v453_v59 = vmul.f32 %v627_v62, %v430_v63  ;;  %v454_v60 = vmul.f32 %v627_v62, %v431_v2  ;;  %v463_v61 = vadd.f32 %v628_v48, %v440_v40 }
 0x17a   :  { %v464_v5 = vadd.f32 %v628_v48, %v441_v41  ;;  %v465_v38 = vadd.f32 %v628_v48, %v442_v44  ;;  %v455_v6 = vmul.f32 %v627_v62, %v432_v3  ;;  %v466_v43 = vadd.f32 %v628_v48, %v443_v45 }
 0x17b   :  { %v467_v51 = vadd.f32 %v628_v48, %v444_v46  ;;  %v468_v57 = vadd.f32 %v628_v48, %v445_v47  ;;  %v469_v1 = vadd.f32 %v628_v48, %v446_v50  ;;  %v470_v7 = vadd.f32 %v628_v48, %v447_v4 }
 0x17c   :  { %v471_v8 = vadd.f32 %v628_v48, %v448_v52  ;;  %v472_v9 = vadd.f32 %v628_v48, %v449_v53  ;;  %v473_v10 = vadd.f32 %v628_v48, %v450_v54  ;;  %v474_v11 = vadd.f32 %v628_v48, %v451_v55 }
 0x17d   :  { %v475_v12 = vadd.f32 %v628_v48, %v452_v58  ;;  %v476_v13 = vadd.f32 %v628_v48, %v453_v59  ;;  %v477_v14 = vadd.f32 %v628_v48, %v454_v60  ;;  %v479_v15 = vmul.f32 0.2, %v463_v61 }
 0x17e   :  { %v480_v16 = vmul.f32 0.2, %v464_v5  ;;  %v481_v17 = vmul.f32 0.2, %v465_v38  ;;  %v478_v18 = vadd.f32 %v628_v48, %v455_v6  ;;  %v482_v19 = vmul.f32 0.2, %v466_v43 }
 0x17f   :  { %v483_v20 = vmul.f32 0.2, %v467_v51  ;;  %v484_v21 = vmul.f32 0.2, %v468_v57  ;;  %v485_v22 = vmul.f32 0.2, %v469_v1  ;;  %v495_v25 = vmax.f32 %v463_v61, %v479_v15 }
 0x180   :  { %v486_v23 = vmul.f32 0.2, %v470_v7  ;;  %v487_v24 = vmul.f32 0.2, %v471_v8  ;;  %v488_v26 = vmul.f32 0.2, %v472_v9  ;;  %v496_v29 = vmax.f32 %v464_v5, %v480_v16 }
 0x181   :  { %v489_v27 = vmul.f32 0.2, %v473_v10  ;;  %v490_v28 = vmul.f32 0.2, %v474_v11  ;;  %v491_v30 = vmul.f32 0.2, %v475_v12  ;;  %v497_v33 = vmax.f32 %v465_v38, %v481_v17 }
 0x182   :  { %v492_v31 = vmul.f32 0.2, %v476_v13  ;;  %v493_v32 = vmul.f32 0.2, %v477_v14  ;;  %v494_v34 = vmul.f32 0.2, %v478_v18  ;;  %v498_v35 = vmax.f32 %v466_v43, %v482_v19 }
 0x183   :  { %v499_v37 = vmax.f32 %v467_v51, %v483_v20  ;;  %v500_v39 = vmax.f32 %v468_v57, %v484_v21  ;;  %v501_v62 = vmax.f32 %v469_v1, %v485_v22  ;;  %v502_v0 = vmax.f32 %v470_v7, %v486_v23 }
 0x184   :  { %v503_v36 = vmax.f32 %v471_v8, %v487_v24  ;;  %v504_v42 = vmax.f32 %v472_v9, %v488_v26  ;;  %v505_v49 = vmax.f32 %v473_v10, %v489_v27  ;;  %v506_v56 = vmax.f32 %v474_v11, %v490_v28 }
 0x185   :  { %v507_v63 = vmax.f32 %v475_v12, %v491_v30  ;;  %v508_v2 = vmax.f32 %v476_v13, %v492_v31  ;;  %v509_v3 = vmax.f32 %v477_v14, %v493_v32  ;;  %v510_v40 = vmax.f32 %v478_v18, %v494_v34 }
 0x186   :  { %v664_v41 = vpack.c.bf16 %v496_v29, %v495_v25  ;;  %v669_v44 = vpack.c.bf16 %v498_v35, %v497_v33  ;;  %v674_v45 = vpack.c.bf16 %v500_v39, %v499_v37  ;;  %v679_v46 = vpack.c.bf16 %v502_v0, %v501_v62 }
 0x187   :  { %v684_v47 = vpack.c.bf16 %v504_v42, %v503_v36  ;;  %v689_v48 = vpack.c.bf16 %v506_v56, %v505_v49  ;;  %v694_v50 = vpack.c.bf16 %v508_v2, %v507_v63  ;;  %v699_v4 = vpack.c.bf16 %v510_v40, %v509_v3 }
 0x188   :  { %665 = vst [vmem:[%s997_s4] sm:$0xff] %v664_v41   ;;  %701 = vst [vmem:[%s997_s4 + $0x8] sm:$0xff] %v669_v44  }
 0x189   :  { %702 = vst [vmem:[%s997_s4 + $0x10] sm:$0xff] %v674_v45   ;;  %703 = vst [vmem:[%s997_s4 + $0x18] sm:$0xff] %v679_v46  }
 0x18a   :  { %704 = vst [vmem:[%s997_s4 + $0x20] sm:$0xff] %v684_v47   ;;  %705 = vst [vmem:[%s997_s4 + $0x28] sm:$0xff] %v689_v48  }
 0x18b   :  { %706 = vst [vmem:[%s997_s4 + $0x30] sm:$0xff] %v694_v50   ;;  %707 = vst [vmem:[%s997_s4 + $0x38] sm:$0xff] %v699_v4  }

// kernel: discriminator_forward.8
= control target key start
LH: loop header
LB: loop body
LE: loop exit
PB: predicated region body
PF: predicated region fallthrough
CT: control target
= control target key end

     0   :  { %s828_s1 = inlined_call_operand.vmem [shape: bf16[512,128], index: 1, kind: input, shape index: {}]   ;;  %s829_s0 = inlined_call_operand.vmem [shape: bf16[32,512], index: 0, kind: input, shape index: {}]   ;;  %s830_s2 = inlined_call_operand.vmem [shape: f32[1,128], index: 2, kind: input, shape index: {}]   ;;  %s831_s3 = inlined_call_operand.vmem [shape: f32[1,128], index: 3, kind: input, shape index: {}]   ;;  %s832_s4 = inlined_call_operand.vmem [shape: bf16[32,128], index: 4, kind: output, shape index: {}]  }
   0x1   :  { %v625_v0 = vld [vmem:[%s828_s1 + $0x40] sm:$0xff]   ;;  %v629_v4 = vld [vmem:[%s828_s1 + $0x48] sm:$0xff]   ;;  %v633_v8 = vld [vmem:[%s828_s1 + $0x50] sm:$0xff]  }
   0x2   :  { %v626_v1 = vld [vmem:[%s828_s1 + $0xc0] sm:$0xff]   ;;  %569 = vmatprep.subr.bf16.mxu0 %v625_v0  ;;  %v630_v5 = vld [vmem:[%s828_s1 + $0xc8] sm:$0xff]   ;;  %v634_v9 = vld [vmem:[%s828_s1 + $0xd0] sm:$0xff]  }
   0x3   :  { %v627_v2 = vld [vmem:[%s828_s1] sm:$0xff]   ;;  %597 = vmatprep.subr.bf16.mxu1 %v626_v1  ;;  %v631_v6 = vld [vmem:[%s828_s1 + $0x8] sm:$0xff]   ;;  %v635_v10 = vld [vmem:[%s828_s1 + $0x10] sm:$0xff]  }
   0x4   :  { %v628_v3 = vld [vmem:[%s828_s1 + $0x80] sm:$0xff]   ;;  %570 = vmatpush3.bf16.msra.mxu0 %v627_v2  ;;  %v632_v7 = vld [vmem:[%s828_s1 + $0x88] sm:$0xff]   ;;  %v636_v11 = vld [vmem:[%s828_s1 + $0x90] sm:$0xff]  }
   0x5   :  { %598 = vmatpush3.bf16.msra.mxu1 %v628_v3  ;;  %571 = vmatprep.subr.bf16.mxu0 %v629_v4  ;;  %v637_v12 = vld [vmem:[%s828_s1 + $0x58] sm:$0xff]   ;;  %v641_v16 = vld [vmem:[%s828_s1 + $0x60] sm:$0xff]   ;;  %v645_v20 = vld [vmem:[%s828_s1 + $0x68] sm:$0xff]  }
   0x6   :  { %599 = vmatprep.subr.bf16.mxu1 %v630_v5  ;;  %v638_v13 = vld [vmem:[%s828_s1 + $0xd8] sm:$0xff]   ;;  %v642_v17 = vld [vmem:[%s828_s1 + $0xe0] sm:$0xff]   ;;  %v646_v21 = vld [vmem:[%s828_s1 + $0xe8] sm:$0xff]  }
   0x7   :  { %v639_v14 = vld [vmem:[%s828_s1 + $0x18] sm:$0xff]   ;;  %v643_v18 = vld [vmem:[%s828_s1 + $0x20] sm:$0xff]   ;;  %v647_v22 = vld [vmem:[%s828_s1 + $0x28] sm:$0xff]  }
   0x8   :  { %572 = vmatpush3.bf16.msra.mxu0 %v631_v6  ;;  %v640_v15 = vld [vmem:[%s828_s1 + $0x98] sm:$0xff]   ;;  %v644_v19 = vld [vmem:[%s828_s1 + $0xa0] sm:$0xff]   ;;  %v648_v23 = vld [vmem:[%s828_s1 + $0xa8] sm:$0xff]  }
   0x9   :  { %600 = vmatpush3.bf16.msra.mxu1 %v632_v7  ;;  %573 = vmatprep.subr.bf16.mxu0 %v633_v8  ;;  %v649_v24 = vld [vmem:[%s828_s1 + $0x70] sm:$0xff]   ;;  %v653_v28 = vld [vmem:[%s828_s1 + $0x78] sm:$0xff]  }
   0xa   :  { %601 = vmatprep.subr.bf16.mxu1 %v634_v9  ;;  %v650_v25 = vld [vmem:[%s828_s1 + $0xf0] sm:$0xff]   ;;  %v654_v29 = vld [vmem:[%s828_s1 + $0xf8] sm:$0xff]  }
   0xb   :  { %v651_v26 = vld [vmem:[%s828_s1 + $0x30] sm:$0xff]   ;;  %v655_v30 = vld [vmem:[%s828_s1 + $0x38] sm:$0xff]  }
   0xc   :  { %574 = vmatpush3.bf16.msra.mxu0 %v635_v10  ;;  %v652_v27 = vld [vmem:[%s828_s1 + $0xb0] sm:$0xff]   ;;  %v656_v31 = vld [vmem:[%s828_s1 + $0xb8] sm:$0xff]  }
   0xd   :  { %602 = vmatpush3.bf16.msra.mxu1 %v636_v11  ;;  %575 = vmatprep.subr.bf16.mxu0 %v637_v12  ;;  %v657_v32 = vld [vmem:[%s829_s0] ss:$16 sps:$4 sm:$0xff]   ;;  %v659_v33 = vld [vmem:[%s829_s0 + $0x4] ss:$16 sps:$4 sm:$0xff]   ;;  %v660_v34 = vld [vmem:[%s829_s0 + $0x8] ss:$16 sps:$4 sm:$0xff]  }
   0xe   :  { %603 = vmatprep.subr.bf16.mxu1 %v638_v13  ;;  %v662_v35 = vld [vmem:[%s829_s0 + $0xc] ss:$16 sps:$4 sm:$0xff]   ;;  %354 = vmatprep.mubr.bf16.mxu0 %v659_v33  ;;  %v663_v36 = vld [vmem:[%s829_s0 + $0x24] ss:$16 sps:$4 sm:$0xff]   ;;  %v667_v38 = vld [vmem:[%s829_s0 + $0x20] ss:$16 sps:$4 sm:$0xff]  }
   0xf   :  { %403 = vmatprep.mubr.bf16.mxu1 %v662_v35  ;;  %v665_v37 = vld [vmem:[%s829_s0 + $0x2c] ss:$16 sps:$4 sm:$0xff]   ;;  %v668_v39 = vld [vmem:[%s829_s0 + $0x28] ss:$16 sps:$4 sm:$0xff]  }
  0x10   :  { %576 = vmatpush3.bf16.msra.mxu0 %v639_v14 }
  0x11   :  { %604 = vmatpush3.bf16.msra.mxu1 %v640_v15  ;;  %577 = vmatprep.subr.bf16.mxu0 %v641_v16 }
  0x12   :  { %605 = vmatprep.subr.bf16.mxu1 %v642_v17 }
  0x14   :  { %578 = vmatpush3.bf16.msra.mxu0 %v643_v18 }
  0x15   :  { %606 = vmatpush3.bf16.msra.mxu1 %v644_v19  ;;  %579 = vmatprep.subr.bf16.mxu0 %v645_v20 }
  0x16   :  { %607 = vmatprep.subr.bf16.mxu1 %v646_v21 }
  0x18   :  { %580 = vmatpush3.bf16.msra.mxu0 %v647_v22 }
  0x19   :  { %608 = vmatpush3.bf16.msra.mxu1 %v648_v23  ;;  %581 = vmatprep.subr.bf16.mxu0 %v649_v24 }
  0x1a   :  { %609 = vmatprep.subr.bf16.mxu1 %v650_v25 }
  0x1c   :  { %582 = vmatpush3.bf16.msra.mxu0 %v651_v26 }
  0x1d   :  { %610 = vmatpush3.bf16.msra.mxu1 %v652_v27  ;;  %583 = vmatprep.subr.bf16.mxu0 %v653_v28 }
  0x1e   :  { %611 = vmatprep.subr.bf16.mxu1 %v654_v29 }
  0x20   :  { %584 = vmatpush3.bf16.msra.mxu0 %v655_v30 }
  0x21   :  { %612 = vmatpush3.bf16.msra.mxu1 %v656_v31 }
  0x23   :  { %355 = vmatmul.mubr.bf16.vlgmr.msra.gmra.mrb[0].mxu0 %v657_v32 }
  0x24   :  { %404 = vmatmul.mubr.bf16.vlgmr.msra.gmra.mrb[0].mxu1 %v660_v34  ;;  %362 = vmatprep.mubr.bf16.mxu0 %v663_v36  ;;  %v548_v34 = vld [vmem:[%s830_s2] ss:$0 sm:$0xff] }
  0x25   :  { %411 = vmatprep.mubr.bf16.mxu1 %v665_v37 }
  0x2b   :  { %363 = vmatmul.mubr.bf16.gmra.mrb[4].mxu0 %v667_v38 }
  0x2c   :  { %412 = vmatmul.mubr.bf16.gmra.mrb[4].mxu1 %v668_v39  ;;  %v549_v39 = vld [vmem:[%s831_s3] ss:$0 sm:$0xff] }
  0xf6   :  { %v585_v40 = vpop.f32.mrb[0].mxu0 }
  0xf7   :  { %v613_v41 = vpop.f32.mrb[0].mxu1  ;;  %v586_v42 = vpop.f32.mrb[1].mxu0 }
  0xf8   :  { %v587_v43 = vadd.f32 %v586_v42, %v585_v40  ;;  %v614_v44 = vpop.f32.mrb[1].mxu1  ;;  %v588_v45 = vpop.f32.mrb[2].mxu0 }
  0xf9   :  { %v615_v46 = vadd.f32 %v614_v44, %v613_v41  ;;  %v616_v47 = vpop.f32.mrb[2].mxu1  ;;  %v589_v48 = vpop.f32.mrb[3].mxu0 }
  0xfa   :  { %v590_v49 = vadd.f32 %v589_v48, %v588_v45  ;;  %v617_v50 = vpop.f32.mrb[3].mxu1 }
  0xfb   :  { %v406_v51 = vadd.f32 %v615_v46, %v587_v43  ;;  %v618_v52 = vadd.f32 %v617_v50, %v616_v47 }
  0xfd   :  { %v409_v53 = vadd.f32 %v618_v52, %v590_v49 }
  0xfe   :  { %v591_v54 = vpop.f32.mrb[4].mxu0 }
  0xff   :  { %v420_v55 = vadd.f32 %v409_v53, %v406_v51  ;;  %v619_v56 = vpop.f32.mrb[4].mxu1  ;;  %v592_v57 = vpop.f32.mrb[5].mxu0 }
 0x100   :  { %v593_v58 = vadd.f32 %v592_v57, %v591_v54  ;;  %v620_v59 = vpop.f32.mrb[5].mxu1  ;;  %v594_v60 = vpop.f32.mrb[6].mxu0 }
 0x101   :  { %v621_v61 = vadd.f32 %v620_v59, %v619_v56  ;;  %v622_v62 = vpop.f32.mrb[6].mxu1  ;;  %v595_v63 = vpop.f32.mrb[7].mxu0 }
 0x102   :  { %v596_v0 = vadd.f32 %v595_v63, %v594_v60  ;;  %v623_v1 = vpop.f32.mrb[7].mxu1 }
 0x103   :  { %v414_v2 = vadd.f32 %v621_v61, %v593_v58  ;;  %v624_v3 = vadd.f32 %v623_v1, %v622_v62 }
 0x105   :  { %v421_v4 = vadd.f32 %v420_v55, %v414_v2  ;;  %v417_v5 = vadd.f32 %v624_v3, %v596_v0 }
 0x107   :  { %v422_v6 = vadd.f32 %v421_v4, %v417_v5 }
 0x109   :  { %v423_v7 = vrot.slane %v422_v6, 4 }
 0x10b   :  { %v424_v8 = vadd.f32 %v423_v7, %v422_v6 }
 0x10d   :  { %v425_v9 = vrot.slane %v424_v8, 2 }
 0x10f   :  { %v426_v10 = vadd.f32 %v425_v9, %v424_v8 }
 0x111   :  { %v427_v11 = vrot.slane %v426_v10, 1 }
 0x113   :  { %v428_v12 = vadd.f32 %v427_v11, %v426_v10 }
 0x115   :  { %v429_v13 = vmul.f32 0.03125, %v428_v12 }
 0x117   :  { %v430_v14 = vsub.f32 %v406_v51, %v429_v13  ;;  %v431_v15 = vsub.f32 %v409_v53, %v429_v13  ;;  %v432_v16 = vsub.f32 %v414_v2, %v429_v13  ;;  %v433_v17 = vsub.f32 %v417_v5, %v429_v13 }
 0x119   :  { %v434_v18 = vmul.f32 %v430_v14, %v430_v14  ;;  %v435_v19 = vmul.f32 %v431_v15, %v431_v15  ;;  %v436_v20 = vmul.f32 %v432_v16, %v432_v16  ;;  %v437_v22 = vmul.f32 %v433_v17, %v433_v17 }
 0x11b   :  { %v438_v21 = vadd.f32 %v435_v19, %v434_v18 }
 0x11d   :  { %v439_v23 = vadd.f32 %v438_v21, %v436_v20 }
 0x11f   :  { %v440_v24 = vadd.f32 %v439_v23, %v437_v22 }
 0x121   :  { %v441_v25 = vrot.slane %v440_v24, 4 }
 0x123   :  { %v442_v26 = vadd.f32 %v441_v25, %v440_v24 }
 0x125   :  { %v443_v27 = vrot.slane %v442_v26, 2 }
 0x127   :  { %v444_v28 = vadd.f32 %v443_v27, %v442_v26 }
 0x129   :  { %v445_v29 = vrot.slane %v444_v28, 1 }
 0x12b   :  { %v446_v30 = vadd.f32 %v445_v29, %v444_v28 }
 0x12d   :  { %v447_v31 = vmul.f32 0.03125, %v446_v30 }
 0x12f   :  { %v448_v32 = vadd.f32 1e-05, %v447_v31 }
 0x131   :  { %669 = vrsqrt.f32 %v448_v32 }
 0x13b   :  { %v670_v33 = vpop.eup %669 }
 0x13c   :  { %v450_v35 = vmul.f32 %v670_v33, %v430_v14  ;;  %v451_v36 = vmul.f32 %v670_v33, %v431_v15  ;;  %v452_v37 = vmul.f32 %v670_v33, %v432_v16  ;;  %v453_v38 = vmul.f32 %v670_v33, %v433_v17 }
 0x13e   :  { %v461_v40 = vmul.f32 %v548_v34, %v450_v35  ;;  %v462_v41 = vmul.f32 %v548_v34, %v451_v36  ;;  %v463_v42 = vmul.f32 %v548_v34, %v452_v37  ;;  %v464_v43 = vmul.f32 %v548_v34, %v453_v38 }
 0x140   :  { %v472_v44 = vadd.f32 %v549_v39, %v461_v40  ;;  %v473_v45 = vadd.f32 %v549_v39, %v462_v41  ;;  %v474_v46 = vadd.f32 %v549_v39, %v463_v42  ;;  %v475_v47 = vadd.f32 %v549_v39, %v464_v43 }
 0x142   :  { %v476_v48 = vmul.f32 0.2, %v472_v44  ;;  %v477_v49 = vmul.f32 0.2, %v473_v45  ;;  %v478_v50 = vmul.f32 0.2, %v474_v46 }
 0x143   :  { %v479_v51 = vmul.f32 0.2, %v475_v47 }
 0x144   :  { %v480_v52 = vmax.f32 %v472_v44, %v476_v48  ;;  %v481_v53 = vmax.f32 %v473_v45, %v477_v49  ;;  %v482_v54 = vmax.f32 %v474_v46, %v478_v50 }
 0x145   :  { %v483_v55 = vmax.f32 %v475_v47, %v479_v51 }
 0x146   :  { %v561_v56 = vpack.c.bf16 %v481_v53, %v480_v52 }
 0x147   :  { %v566_v57 = vpack.c.bf16 %v483_v55, %v482_v54 }
 0x148   :  { %562 = vst [vmem:[%s832_s4] sm:$0xff] %v561_v56  }
 0x149   :  { %568 = vst [vmem:[%s832_s4 + $0x8] sm:$0xff] %v566_v57  }

// kernel: discriminator_forward.9
= control target key start
LH: loop header
LB: loop body
LE: loop exit
PB: predicated region body
PF: predicated region fallthrough
CT: control target
= control target key end

     0   :  { %s1223_s1 = inlined_call_operand.vmem [shape: bf16[1024,128], index: 1, kind: input, shape index: {}]   ;;  %s1224_s0 = inlined_call_operand.vmem [shape: bf16[16,1024], index: 0, kind: input, shape index: {}]   ;;  %s1225_s2 = inlined_call_operand.vmem [shape: f32[16,128], index: 2, kind: output, shape index: {}]  }
   0x1   :  { %v914_v0 = vld [vmem:[%s1223_s1 + $0x40] sm:$0xff]   ;;  %v918_v4 = vld [vmem:[%s1223_s1 + $0x48] sm:$0xff]   ;;  %v922_v8 = vld [vmem:[%s1223_s1 + $0x50] sm:$0xff]  }
   0x2   :  { %v915_v1 = vld [vmem:[%s1223_s1 + $0xc0] sm:$0xff]   ;;  %826 = vmatprep.subr.bf16.mxu0 %v914_v0  ;;  %v919_v5 = vld [vmem:[%s1223_s1 + $0xc8] sm:$0xff]   ;;  %v923_v9 = vld [vmem:[%s1223_s1 + $0xd0] sm:$0xff]  }
   0x3   :  { %v916_v2 = vld [vmem:[%s1223_s1] sm:$0xff]   ;;  %848 = vmatprep.subr.bf16.mxu1 %v915_v1  ;;  %v920_v6 = vld [vmem:[%s1223_s1 + $0x8] sm:$0xff]   ;;  %v924_v10 = vld [vmem:[%s1223_s1 + $0x10] sm:$0xff]  }
   0x4   :  { %v917_v3 = vld [vmem:[%s1223_s1 + $0x80] sm:$0xff]   ;;  %827 = vmatpush3.bf16.msra.mxu0 %v916_v2  ;;  %v921_v7 = vld [vmem:[%s1223_s1 + $0x88] sm:$0xff]   ;;  %v925_v11 = vld [vmem:[%s1223_s1 + $0x90] sm:$0xff]  }
   0x5   :  { %849 = vmatpush3.bf16.msra.mxu1 %v917_v3  ;;  %828 = vmatprep.subr.bf16.mxu0 %v918_v4  ;;  %v926_v12 = vld [vmem:[%s1223_s1 + $0x58] sm:$0xff]   ;;  %v930_v16 = vld [vmem:[%s1223_s1 + $0x60] sm:$0xff]   ;;  %v934_v20 = vld [vmem:[%s1223_s1 + $0x68] sm:$0xff]  }
   0x6   :  { %850 = vmatprep.subr.bf16.mxu1 %v919_v5  ;;  %v927_v13 = vld [vmem:[%s1223_s1 + $0xd8] sm:$0xff]   ;;  %v931_v17 = vld [vmem:[%s1223_s1 + $0xe0] sm:$0xff]   ;;  %v935_v21 = vld [vmem:[%s1223_s1 + $0xe8] sm:$0xff]  }
   0x7   :  { %v928_v14 = vld [vmem:[%s1223_s1 + $0x18] sm:$0xff]   ;;  %v932_v18 = vld [vmem:[%s1223_s1 + $0x20] sm:$0xff]   ;;  %v936_v22 = vld [vmem:[%s1223_s1 + $0x28] sm:$0xff]  }
   0x8   :  { %829 = vmatpush3.bf16.msra.mxu0 %v920_v6  ;;  %v929_v15 = vld [vmem:[%s1223_s1 + $0x98] sm:$0xff]   ;;  %v933_v19 = vld [vmem:[%s1223_s1 + $0xa0] sm:$0xff]   ;;  %v937_v23 = vld [vmem:[%s1223_s1 + $0xa8] sm:$0xff]  }
   0x9   :  { %851 = vmatpush3.bf16.msra.mxu1 %v921_v7  ;;  %830 = vmatprep.subr.bf16.mxu0 %v922_v8  ;;  %v938_v24 = vld [vmem:[%s1223_s1 + $0x70] sm:$0xff]   ;;  %v942_v28 = vld [vmem:[%s1223_s1 + $0x78] sm:$0xff]   ;;  %v12_v32 = vld [vmem:[%s1224_s0] sm:$0xff] }
   0xa   :  { %852 = vmatprep.subr.bf16.mxu1 %v923_v9  ;;  %v939_v25 = vld [vmem:[%s1223_s1 + $0xf0] sm:$0xff]   ;;  %v943_v29 = vld [vmem:[%s1223_s1 + $0xf8] sm:$0xff]   ;;  %v16_v33 = vld [vmem:[%s1224_s0 + $0x20] sm:$0xff] }
   0xb   :  { %v940_v26 = vld [vmem:[%s1223_s1 + $0x30] sm:$0xff]   ;;  %v944_v30 = vld [vmem:[%s1223_s1 + $0x38] sm:$0xff]   ;;  %v13_v34 = vld [vmem:[%s1224_s0 + $0x8] sm:$0xff]  ;;  %v754_v35 = vcombine.low %v12_v32, %v16_v33  ;;  %v755_v36 = vcombine.high %v12_v32, %v16_v33 }
   0xc   :  { %831 = vmatpush3.bf16.msra.mxu0 %v924_v10  ;;  %v941_v27 = vld [vmem:[%s1223_s1 + $0xb0] sm:$0xff]   ;;  %v945_v31 = vld [vmem:[%s1223_s1 + $0xb8] sm:$0xff]   ;;  %v17_v37 = vld [vmem:[%s1224_s0 + $0x28] sm:$0xff] }
   0xd   :  { %853 = vmatpush3.bf16.msra.mxu1 %v925_v11  ;;  %832 = vmatprep.subr.bf16.mxu0 %v926_v12  ;;  %v756_v38 = vcombine.low %v13_v34, %v17_v37  ;;  %v757_v39 = vcombine.high %v13_v34, %v17_v37  ;;  %v946_v40 = vld [vmem:[%s1223_s1 + $0x140] sm:$0xff]   ;;  %v950_v44 = vld [vmem:[%s1223_s1 + $0x148] sm:$0xff]   ;;  %v954_v48 = vld [vmem:[%s1223_s1 + $0x150] sm:$0xff]  }
   0xe   :  { %854 = vmatprep.subr.bf16.mxu1 %v927_v13  ;;  %604 = vmatprep.mubr.bf16.mxu0 %v755_v36  ;;  %v947_v41 = vld [vmem:[%s1223_s1 + $0x1c0] sm:$0xff]   ;;  %v951_v45 = vld [vmem:[%s1223_s1 + $0x1c8] sm:$0xff]   ;;  %v955_v49 = vld [vmem:[%s1223_s1 + $0x1d0] sm:$0xff]  }
   0xf   :  { %645 = vmatprep.mubr.bf16.mxu1 %v757_v39  ;;  %v948_v42 = vld [vmem:[%s1223_s1 + $0x100] sm:$0xff]   ;;  %v952_v46 = vld [vmem:[%s1223_s1 + $0x108] sm:$0xff]   ;;  %v956_v50 = vld [vmem:[%s1223_s1 + $0x110] sm:$0xff]  }
  0x10   :  { %833 = vmatpush3.bf16.msra.mxu0 %v928_v14  ;;  %v949_v43 = vld [vmem:[%s1223_s1 + $0x180] sm:$0xff]   ;;  %v953_v47 = vld [vmem:[%s1223_s1 + $0x188] sm:$0xff]   ;;  %v957_v51 = vld [vmem:[%s1223_s1 + $0x190] sm:$0xff]  }
  0x11   :  { %855 = vmatpush3.bf16.msra.mxu1 %v929_v15  ;;  %834 = vmatprep.subr.bf16.mxu0 %v930_v16  ;;  %v958_v52 = vld [vmem:[%s1223_s1 + $0x158] sm:$0xff]   ;;  %v962_v56 = vld [vmem:[%s1223_s1 + $0x160] sm:$0xff]   ;;  %v966_v60 = vld [vmem:[%s1223_s1 + $0x168] sm:$0xff]  }
  0x12   :  { %856 = vmatprep.subr.bf16.mxu1 %v931_v17  ;;  %v959_v53 = vld [vmem:[%s1223_s1 + $0x1d8] sm:$0xff]   ;;  %v963_v57 = vld [vmem:[%s1223_s1 + $0x1e0] sm:$0xff]   ;;  %v967_v61 = vld [vmem:[%s1223_s1 + $0x1e8] sm:$0xff]  }
  0x13   :  { %v960_v54 = vld [vmem:[%s1223_s1 + $0x118] sm:$0xff]   ;;  %v964_v58 = vld [vmem:[%s1223_s1 + $0x120] sm:$0xff]   ;;  %v968_v62 = vld [vmem:[%s1223_s1 + $0x128] sm:$0xff]  }
  0x14   :  { %835 = vmatpush3.bf16.msra.mxu0 %v932_v18  ;;  %v961_v55 = vld [vmem:[%s1223_s1 + $0x198] sm:$0xff]   ;;  %v965_v59 = vld [vmem:[%s1223_s1 + $0x1a0] sm:$0xff]   ;;  %v969_v63 = vld [vmem:[%s1223_s1 + $0x1a8] sm:$0xff]  }
  0x15   :  { %857 = vmatpush3.bf16.msra.mxu1 %v933_v19  ;;  %836 = vmatprep.subr.bf16.mxu0 %v934_v20  ;;  %v970_v0 = vld [vmem:[%s1223_s1 + $0x170] sm:$0xff]   ;;  %v974_v4 = vld [vmem:[%s1223_s1 + $0x178] sm:$0xff]  }
  0x16   :  { %858 = vmatprep.subr.bf16.mxu1 %v935_v21  ;;  %v971_v1 = vld [vmem:[%s1223_s1 + $0x1f0] sm:$0xff]   ;;  %v975_v5 = vld [vmem:[%s1223_s1 + $0x1f8] sm:$0xff]  }
  0x17   :  { %v972_v2 = vld [vmem:[%s1223_s1 + $0x130] sm:$0xff]   ;;  %v976_v6 = vld [vmem:[%s1223_s1 + $0x138] sm:$0xff]  }
  0x18   :  { %837 = vmatpush3.bf16.msra.mxu0 %v936_v22  ;;  %v973_v3 = vld [vmem:[%s1223_s1 + $0x1b0] sm:$0xff]   ;;  %v977_v7 = vld [vmem:[%s1223_s1 + $0x1b8] sm:$0xff]  }
  0x19   :  { %859 = vmatpush3.bf16.msra.mxu1 %v937_v23  ;;  %838 = vmatprep.subr.bf16.mxu0 %v938_v24  ;;  %v14_v8 = vld [vmem:[%s1224_s0 + $0x10] sm:$0xff]  ;;  %v15_v12 = vld [vmem:[%s1224_s0 + $0x18] sm:$0xff] }
  0x1a   :  { %860 = vmatprep.subr.bf16.mxu1 %v939_v25  ;;  %v18_v9 = vld [vmem:[%s1224_s0 + $0x30] sm:$0xff]  ;;  %v19_v13 = vld [vmem:[%s1224_s0 + $0x38] sm:$0xff] }
  0x1b   :  { %v758_v10 = vcombine.low %v14_v8, %v18_v9  ;;  %v759_v11 = vcombine.high %v14_v8, %v18_v9  ;;  %v760_v14 = vcombine.low %v15_v12, %v19_v13  ;;  %v761_v15 = vcombine.high %v15_v12, %v19_v13 }
  0x1c   :  { %839 = vmatpush3.bf16.msra.mxu0 %v940_v26 }
  0x1d   :  { %861 = vmatpush3.bf16.msra.mxu1 %v941_v27  ;;  %840 = vmatprep.subr.bf16.mxu0 %v942_v28 }
  0x1e   :  { %862 = vmatprep.subr.bf16.mxu1 %v943_v29 }
  0x20   :  { %841 = vmatpush3.bf16.msra.mxu0 %v944_v30 }
  0x21   :  { %863 = vmatpush3.bf16.msra.mxu1 %v945_v31  ;;  %870 = vmatprep.subr.bf16.mxu0 %v946_v40 }
  0x22   :  { %892 = vmatprep.subr.bf16.mxu1 %v947_v41 }
  0x23   :  { %605 = vmatmul.mubr.bf16.vlgmr.msra.gmra.mrb[0].mxu0 %v754_v35 }
  0x24   :  { %646 = vmatmul.mubr.bf16.vlgmr.msra.gmra.mrb[0].mxu1 %v756_v38  ;;  %871 = vmatpush3.bf16.msra.mxu0 %v948_v42 }
  0x25   :  { %893 = vmatpush3.bf16.msra.mxu1 %v949_v43  ;;  %872 = vmatprep.subr.bf16.mxu0 %v950_v44 }
  0x26   :  { %894 = vmatprep.subr.bf16.mxu1 %v951_v45  ;;  %686 = vmatprep.mubr.bf16.mxu0 %v759_v11 }
  0x27   :  { %727 = vmatprep.mubr.bf16.mxu1 %v761_v15 }
  0x28   :  { %873 = vmatpush3.bf16.msra.mxu0 %v952_v46 }
  0x29   :  { %895 = vmatpush3.bf16.msra.mxu1 %v953_v47  ;;  %874 = vmatprep.subr.bf16.mxu0 %v954_v48 }
  0x2a   :  { %896 = vmatprep.subr.bf16.mxu1 %v955_v49 }
  0x2c   :  { %875 = vmatpush3.bf16.msra.mxu0 %v956_v50 }
  0x2d   :  { %897 = vmatpush3.bf16.msra.mxu1 %v957_v51  ;;  %876 = vmatprep.subr.bf16.mxu0 %v958_v52 }
  0x2e   :  { %898 = vmatprep.subr.bf16.mxu1 %v959_v53 }
  0x30   :  { %877 = vmatpush3.bf16.msra.mxu0 %v960_v54 }
  0x31   :  { %899 = vmatpush3.bf16.msra.mxu1 %v961_v55  ;;  %878 = vmatprep.subr.bf16.mxu0 %v962_v56 }
  0x32   :  { %900 = vmatprep.subr.bf16.mxu1 %v963_v57 }
  0x34   :  { %879 = vmatpush3.bf16.msra.mxu0 %v964_v58 }
  0x35   :  { %901 = vmatpush3.bf16.msra.mxu1 %v965_v59  ;;  %880 = vmatprep.subr.bf16.mxu0 %v966_v60 }
  0x36   :  { %902 = vmatprep.subr.bf16.mxu1 %v967_v61 }
  0x38   :  { %881 = vmatpush3.bf16.msra.mxu0 %v968_v62 }
  0x39   :  { %903 = vmatpush3.bf16.msra.mxu1 %v969_v63  ;;  %882 = vmatprep.subr.bf16.mxu0 %v970_v0 }
  0x3a   :  { %904 = vmatprep.subr.bf16.mxu1 %v971_v1 }
  0x3c   :  { %883 = vmatpush3.bf16.msra.mxu0 %v972_v2 }
  0x3d   :  { %905 = vmatpush3.bf16.msra.mxu1 %v973_v3  ;;  %884 = vmatprep.subr.bf16.mxu0 %v974_v4 }
  0x3e   :  { %906 = vmatprep.subr.bf16.mxu1 %v975_v5 }
  0x40   :  { %885 = vmatpush3.bf16.msra.mxu0 %v976_v6 }
  0x41   :  { %907 = vmatpush3.bf16.msra.mxu1 %v977_v7 }
  0x43   :  { %687 = vmatmul.mubr.bf16.vlgmr.msra.gmra.mrb[4].mxu0 %v758_v10 }
  0x44   :  { %728 = vmatmul.mubr.bf16.vlgmr.msra.gmra.mrb[4].mxu1 %v760_v14 }
  0xf6   :  { %v842_v16 = vpop.f32.mrb[0].mxu0 }
  0xf7   :  { %v864_v17 = vpop.f32.mrb[0].mxu1  ;;  %v843_v18 = vpop.f32.mrb[1].mxu0 }
  0xf8   :  { %v844_v19 = vadd.f32 %v843_v18, %v842_v16  ;;  %v865_v20 = vpop.f32.mrb[1].mxu1  ;;  %v845_v21 = vpop.f32.mrb[2].mxu0 }
  0xf9   :  { %v866_v22 = vadd.f32 %v865_v20, %v864_v17  ;;  %v867_v23 = vpop.f32.mrb[2].mxu1  ;;  %v846_v24 = vpop.f32.mrb[3].mxu0 }
  0xfa   :  { %v847_v25 = vadd.f32 %v846_v24, %v845_v21  ;;  %v868_v26 = vpop.f32.mrb[3].mxu1 }
  0xfb   :  { %v648_v27 = vadd.f32 %v866_v22, %v844_v19  ;;  %v869_v28 = vadd.f32 %v868_v26, %v867_v23 }
  0xfd   :  { %v651_v29 = vadd.f32 %v869_v28, %v847_v25 }
 0x116   :  { %v886_v30 = vpop.f32.mrb[4].mxu0 }
 0x117   :  { %v908_v31 = vpop.f32.mrb[4].mxu1  ;;  %v887_v32 = vpop.f32.mrb[5].mxu0 }
 0x118   :  { %v888_v33 = vadd.f32 %v887_v32, %v886_v30  ;;  %v909_v34 = vpop.f32.mrb[5].mxu1  ;;  %v889_v35 = vpop.f32.mrb[6].mxu0 }
 0x119   :  { %v910_v36 = vadd.f32 %v909_v34, %v908_v31  ;;  %v911_v37 = vpop.f32.mrb[6].mxu1  ;;  %v890_v38 = vpop.f32.mrb[7].mxu0 }
 0x11a   :  { %v689_v39 = vadd.f32 %v888_v33, %v648_v27  ;;  %v891_v40 = vadd.f32 %v890_v38, %v889_v35  ;;  %v912_v41 = vpop.f32.mrb[7].mxu1 }
 0x11b   :  { %v913_v42 = vadd.f32 %v912_v41, %v911_v37 }
 0x11c   :  { %v730_v43 = vadd.f32 %v910_v36, %v689_v39  ;;  %v692_v44 = vadd.f32 %v891_v40, %v651_v29 }
 0x11e   :  { %v736_v45 = vsub.f32 0.0, %v730_v43  ;;  %v733_v46 = vadd.f32 %v913_v42, %v692_v44 }
 0x120   :  { %v738_v47 = vmul.f32 1.442695, %v736_v45  ;;  %v737_v48 = vsub.f32 0.0, %v733_v46 }
 0x122   :  { %978 = vpow2.f32 %v738_v47  ;;  %v740_v49 = vmul.f32 1.442695, %v737_v48 }
 0x124   :  { %980 = vpow2.f32 %v740_v49 }
 0x12c   :  { %v979_v50 = vpop.eup %978 }
 0x12d   :  { %v742_v51 = vadd.f32 1.0, %v979_v50 }
 0x12e   :  { %v981_v52 = vpop.eup %980 }
 0x12f   :  { %982 = vrcp.f32 %v742_v51  ;;  %v743_v53 = vadd.f32 1.0, %v981_v52 }
 0x131   :  { %984 = vrcp.f32 %v743_v53 }
 0x139   :  { %v983_v54 = vpop.eup %982 }
 0x13a   :  { %748 = vst [vmem:[%s1225_s2] sm:$0xff] %v983_v54 }
 0x13b   :  { %v985_v55 = vpop.eup %984 }
 0x13c   :  { %749 = vst [vmem:[%s1225_s2 + $0x8] sm:$0xff] %v985_v55 }

</bundles_post_ra>
